<compile_context>
chip_gen: v7x
topology: tpu7x:2x2x1
jax: 0.10.0
libtpu: 0.0.40
codegen_flags: <defaults>
</compile_context>

<pallas_src>
import functools

import jax
import jax.numpy as jnp
from jax.experimental import pallas as pl
from jax.experimental.pallas import tpu as pltpu


def rnn_kernel(x_ref, w_ref, b_ref, fc_ref, out_ref,
               *, hidden_size, n_lstm, n_gru, seq_len, batch):
    H, T, B = hidden_size, seq_len, batch

    layer_in = x_ref[...]                                   # (T*B, H) bf16
    h = jnp.zeros((B, H), jnp.float32)

    # ---------------- LSTM stack (PyTorch gate order: i, f, g, o) ----------------
    # g-gate columns of W_ih / W_hh / b were pre-scaled x2 in the wrapper so that
    # tanh(g_pre) == 2*sigmoid(2*g_pre) - 1 folds into the single sigmoid below.
    for layer in range(n_lstm):
        w_l = w_ref[layer]                                  # (H, 8H) bf16, resident in vregs
        w_ih = w_l[:, :4 * H]                               # W_ih^T
        w_hh = w_l[:, 4 * H:]                               # W_hh^T
        b_l = b_ref[layer]                                  # (1, 4H) f32 == b_ih + b_hh

        # Hoisted input projection for the whole sequence: one tall MXU matmul.
        gi_all = jnp.dot(layer_in, w_ih,
                         preferred_element_type=jnp.float32) + b_l    # (T*B, 4H) f32

        h = jnp.zeros((B, H), jnp.float32)
        c = jnp.zeros((B, H), jnp.float32)
        outs = []
        for t in range(T):                                  # static, fully unrolled
            gates = (jnp.dot(h.astype(jnp.bfloat16), w_hh,
                             preferred_element_type=jnp.float32)
                     + gi_all[t * B:(t + 1) * B, :])        # (B, 4H)
            sg = jax.nn.sigmoid(gates)                      # ONE EUP pass over 4H=128 lanes
            i = sg[:, 0 * H:1 * H]
            f = sg[:, 1 * H:2 * H]
            g = 2.0 * sg[:, 2 * H:3 * H] - 1.0              # == tanh(original g pre-act), VPU fixup
            o = sg[:, 3 * H:4 * H]
            c = f * c + i * g
            h = o * jnp.tanh(c)
            outs.append(h)                                  # stays in vregs (no VMEM round-trip)
        layer_in = jnp.concatenate(outs, axis=0).astype(jnp.bfloat16)  # (T*B, H)

    # ---------------- GRU stack (PyTorch gate order: r, z, n) ----------------
    # Packed weight columns: [W_ih^T (3H) | 0 (H) | W_hh^T (3H) | 0 (H)]
    # Packed bias columns  : [b_ih_rz + b_hh_rz (2H) | b_ih_n (H) | b_hh_n (H)]
    # so gi_all[:, 3H:4H] carries b_hh_n for free (the padded weight columns are zero).
    for layer in range(n_gru):
        w_l = w_ref[n_lstm + layer]                         # (H, 8H) bf16
        w_ih = w_l[:, :4 * H]
        w_hh = w_l[:, 4 * H:]
        b_l = b_ref[n_lstm + layer]                         # (1, 4H) f32
        last = (layer == n_gru - 1)

        gi_all = jnp.dot(layer_in, w_ih,
                         preferred_element_type=jnp.float32) + b_l    # (T*B, 4H)

        h = jnp.zeros((B, H), jnp.float32)
        outs = []
        for t in range(T):                                  # static, fully unrolled
            gi = gi_all[t * B:(t + 1) * B, :]
            gh = jnp.dot(h.astype(jnp.bfloat16), w_hh,
                         preferred_element_type=jnp.float32)           # (B, 4H); last H cols == 0
            rz = jax.nn.sigmoid(gi[:, :2 * H] + gh[:, :2 * H])         # r and z in one EUP pass
            r = rz[:, :H]
            z = rz[:, H:2 * H]
            n = jnp.tanh(gi[:, 2 * H:3 * H]
                         + r * (gh[:, 2 * H:3 * H] + gi[:, 3 * H:4 * H]))
            h = (1.0 - z) * n + z * h
            if not last:                                    # last layer: only h[T-1] is consumed
                outs.append(h)
        if not last:
            layer_in = jnp.concatenate(outs, axis=0).astype(jnp.bfloat16)

    # ------------- last timestep -> Linear -> ReLU (Dropout = identity) -------------
    fc = fc_ref[...]                                        # (H+1, O_pad) bf16
    fc_w = fc[:H, :]
    fc_b = fc[H:H + 1, :].astype(jnp.float32)
    y = jnp.dot(h.astype(jnp.bfloat16), fc_w,
                preferred_element_type=jnp.float32) + fc_b
    out_ref[...] = jnp.maximum(y, 0.0)                      # lane-dense (B_pad, O_pad) store


def pack_params(params, *, hidden_size, n_lstm, n_gru):
    """Pack the 10 parameter arrays into 3 kernel slabs (weights / biases / FC)."""
    H = hidden_size
    O = params["fc_w"].shape[1]
    O_pad = -(-O // 128) * 128
    n_layers = n_lstm + n_gru

    # x2 on the LSTM g-gate columns implements tanh(x) = 2*sigmoid(2x) - 1 in-kernel.
    g_scale = jnp.ones((4 * H,), jnp.float32).at[2 * H:3 * H].set(2.0)

    w_slab = jnp.zeros((n_layers, H, 8 * H), jnp.float32)
    w_slab = w_slab.at[:n_lstm, :, :4 * H].set(params["lstm_wih"] * g_scale)
    w_slab = w_slab.at[:n_lstm, :, 4 * H:].set(params["lstm_whh"] * g_scale)
    w_slab = w_slab.at[n_lstm:, :, :3 * H].set(params["gru_wih"])
    w_slab = w_slab.at[n_lstm:, :, 4 * H:7 * H].set(params["gru_whh"])
    w_slab = w_slab.astype(jnp.bfloat16)

    b_slab = jnp.zeros((n_layers, 1, 4 * H), jnp.float32)
    b_slab = b_slab.at[:n_lstm].set(params["lstm_b"] * g_scale)
    b_slab = b_slab.at[n_lstm:, :, :2 * H].set(
        params["gru_bih"][:, :, :2 * H] + params["gru_bhh"][:, :, :2 * H])
    b_slab = b_slab.at[n_lstm:, :, 2 * H:3 * H].set(params["gru_bih"][:, :, 2 * H:])
    b_slab = b_slab.at[n_lstm:, :, 3 * H:].set(params["gru_bhh"][:, :, 2 * H:])

    fc_slab = jnp.zeros((H + 1, O_pad), jnp.float32)
    fc_slab = fc_slab.at[:H, :O].set(params["fc_w"])
    fc_slab = fc_slab.at[H, :O].set(params["fc_b"][0])
    fc_slab = fc_slab.astype(jnp.bfloat16)

    return dict(w=w_slab, b=b_slab, fc=fc_slab, out_dims=(O, O_pad))


def neural_net_forward(x, packed, *, hidden_size, n_lstm, n_gru):
    B, T, D = x.shape
    H = hidden_size
    assert D == H, "nn.GRU(input_size) fed the LSTM output requires input_size == hidden_size"
    O, O_pad = packed["out_dims"]

    # Pad batch to the 8-row sublane width so every vreg / MXU / EUP op is full-tile.
    B_pad = max(8, -(-B // 8) * 8)
    x_tm = jnp.transpose(x, (1, 0, 2)).astype(jnp.float32)           # (T, B, H) time-major
    x_tm = jnp.pad(x_tm, ((0, 0), (0, B_pad - B), (0, 0)))           # (T, B_pad, H)
    x_flat = x_tm.reshape(T * B_pad, H).astype(jnp.bfloat16)         # (T*B_pad, H)

    kernel = functools.partial(rnn_kernel, hidden_size=H, n_lstm=n_lstm,
                               n_gru=n_gru, seq_len=T, batch=B_pad)
    out_pad = pl.pallas_call(
        kernel,
        out_shape=jax.ShapeDtypeStruct((B_pad, O_pad), jnp.float32),
        in_specs=[pl.BlockSpec(memory_space=pltpu.MemorySpace.VMEM)] * 4,
        out_specs=pl.BlockSpec(memory_space=pltpu.MemorySpace.VMEM),
    )(x_flat, packed["w"], packed["b"], packed["fc"])
    return out_pad[:B, :O]


def init_params(key, hidden_size, n_lstm, n_gru, output_size):
    H = hidden_size
    bound = 1.0 / float(H) ** 0.5
    keys = jax.random.split(key, 10)

    def u(k, shape):
        return jax.random.uniform(k, shape, jnp.float32, -bound, bound)

    return dict(
        lstm_wih=u(keys[0], (n_lstm, H, 4 * H)),            # W_ih^T per layer
        lstm_whh=u(keys[1], (n_lstm, H, 4 * H)),            # W_hh^T per layer
        lstm_b=u(keys[2], (n_lstm, 1, 4 * H)) + u(keys[3], (n_lstm, 1, 4 * H)),  # b_ih+b_hh
        gru_wih=u(keys[4], (n_gru, H, 3 * H)),
        gru_whh=u(keys[5], (n_gru, H, 3 * H)),
        gru_bih=u(keys[6], (n_gru, 1, 3 * H)),
        gru_bhh=u(keys[7], (n_gru, 1, 3 * H)),
        fc_w=u(keys[8], (H, output_size)),                  # Linear weight^T
        fc_b=u(keys[9], (1, output_size)),
    )


def reference_forward(x, params, *, hidden_size, n_lstm, n_gru):
    """Pure-JAX reference mirroring torch.nn.LSTM/GRU/Linear+ReLU semantics."""
    H = hidden_size
    B, T, _ = x.shape
    seq = x.astype(jnp.float32)
    for layer in range(n_lstm):
        w_ih, w_hh, b = params["lstm_wih"][layer], params["lstm_whh"][layer], params["lstm_b"][layer]
        h = jnp.zeros((B, H), jnp.float32)
        c = jnp.zeros((B, H), jnp.float32)
        outs = []
        for t in range(T):
            gates = seq[:, t, :] @ w_ih + h @ w_hh + b
            i = jax.nn.sigmoid(gates[:, :H])
            f = jax.nn.sigmoid(gates[:, H:2 * H])
            g = jnp.tanh(gates[:, 2 * H:3 * H])
            o = jax.nn.sigmoid(gates[:, 3 * H:])
            c = f * c + i * g
            h = o * jnp.tanh(c)
            outs.append(h)
        seq = jnp.stack(outs, axis=1)
    for layer in range(n_gru):
        w_ih, w_hh = params["gru_wih"][layer], params["gru_whh"][layer]
        b_ih, b_hh = params["gru_bih"][layer], params["gru_bhh"][layer]
        h = jnp.zeros((B, H), jnp.float32)
        outs = []
        for t in range(T):
            gi = seq[:, t, :] @ w_ih + b_ih
            gh = h @ w_hh + b_hh
            r = jax.nn.sigmoid(gi[:, :H] + gh[:, :H])
            z = jax.nn.sigmoid(gi[:, H:2 * H] + gh[:, H:2 * H])
            n = jnp.tanh(gi[:, 2 * H:] + r * gh[:, 2 * H:])
            h = (1.0 - z) * n + z * h
            outs.append(h)
        seq = jnp.stack(outs, axis=1)
    h_last = seq[:, -1, :]
    return jnp.maximum(h_last @ params["fc_w"] + params["fc_b"], 0.0)


if __name__ == "__main__":
    arch = {"hidden_size": 32, "num_lstm_layers": 2, "num_gru_layers": 2, "dropout": 0.1}
    input_size = 32          # must equal hidden_size (see assertion in neural_net_forward)
    output_size = 8
    B, T = 2, 8

    key = jax.random.PRNGKey(0)
    pkey, xkey = jax.random.split(key)
    params = init_params(pkey, arch["hidden_size"], arch["num_lstm_layers"],
                         arch["num_gru_layers"], output_size)
    x = jax.random.normal(xkey, (B, T, input_size), jnp.float32)

    packed = pack_params(params, hidden_size=arch["hidden_size"],
                         n_lstm=arch["num_lstm_layers"], n_gru=arch["num_gru_layers"])

    out = neural_net_forward(x, packed,
                             hidden_size=arch["hidden_size"],
                             n_lstm=arch["num_lstm_layers"],
                             n_gru=arch["num_gru_layers"])
    out = jax.block_until_ready(out)

    # Reference uses the kernel's effective (bf16-rounded) weights so the only residual
    # difference is the per-step bf16 activation cast + matmul precision.
    def bf16_round(a):
        return a.astype(jnp.bfloat16).astype(jnp.float32)

    params_ref = dict(params)
    for k in ("lstm_wih", "lstm_whh", "gru_wih", "gru_whh", "fc_w", "fc_b"):
        params_ref[k] = bf16_round(params[k])
    ref = reference_forward(bf16_round(x), params_ref,
                            hidden_size=arch["hidden_size"],
                            n_lstm=arch["num_lstm_layers"],
                            n_gru=arch["num_gru_layers"])

    assert out.shape == (B, output_size)
    assert jnp.allclose(out, ref, atol=2e-2, rtol=2e-2), (out, ref)
    print("KERNEL_OK")
</pallas_src>

<mosaic_0001>
module attributes {stable_mosaic.version = 11 : i64} {
  func.func @rnn_kernel(%arg0: memref<64x32xbf16, #tpu.memory_space<vmem>>, %arg1: memref<4x32x256xbf16, #tpu.memory_space<vmem>>, %arg2: memref<4x1x128xf32, #tpu.memory_space<vmem>>, %arg3: memref<33x128xbf16, #tpu.memory_space<vmem>>, %arg4: memref<8x128xf32, #tpu.memory_space<vmem>>) attributes {dimension_semantics = [], scalar_prefetch = 0 : i64, scratch_operands = 0 : i64, tpu.core_type = #tpu.core_type<tc>} {
    %c0 = arith.constant 0 : index
    %c0_0 = arith.constant 0 : index
    %0 = vector.load %arg0[%c0, %c0_0] : memref<64x32xbf16, #tpu.memory_space<vmem>>, vector<64x32xbf16>
    %c0_1 = arith.constant 0 : index
    %c0_2 = arith.constant 0 : index
    %c0_3 = arith.constant 0 : index
    %1 = vector.load %arg1[%c0_1, %c0_2, %c0_3] : memref<4x32x256xbf16, #tpu.memory_space<vmem>>, vector<1x32x256xbf16>
    %2 = vector.shape_cast %1 : vector<1x32x256xbf16> to vector<32x256xbf16>
    %3 = vector.extract_strided_slice %2 {offsets = [0, 0], sizes = [32, 128], strides = [1, 1]} : vector<32x256xbf16> to vector<32x128xbf16>
    %4 = vector.extract_strided_slice %2 {offsets = [0, 128], sizes = [32, 128], strides = [1, 1]} : vector<32x256xbf16> to vector<32x128xbf16>
    %c0_4 = arith.constant 0 : index
    %c0_5 = arith.constant 0 : index
    %c0_6 = arith.constant 0 : index
    %5 = vector.load %arg2[%c0_4, %c0_5, %c0_6] : memref<4x1x128xf32, #tpu.memory_space<vmem>>, vector<1x1x128xf32>
    %6 = vector.shape_cast %5 : vector<1x1x128xf32> to vector<1x128xf32>
    %cst = arith.constant dense<0.000000e+00> : vector<64x128xf32>
    %7 = tpu.matmul %0, %3, %cst {dimension_numbers = #tpu.dot_dimension_numbers<[1], [0], [0], [1], [0, 0, 1, 1], [], []>} : vector<64x32xbf16>, vector<32x128xbf16>, vector<64x128xf32> -> vector<64x128xf32>
    %8 = vector.broadcast %6 : vector<1x128xf32> to vector<64x128xf32>
    %9 = arith.addf %7, %8 : vector<64x128xf32>
    %cst_7 = arith.constant 0.000000e+00 : f32
    %10 = vector.broadcast %cst_7 : f32 to vector<8x32xf32>
    %cst_8 = arith.constant 0.000000e+00 : f32
    %11 = vector.broadcast %cst_8 : f32 to vector<8x32xf32>
    %12 = arith.truncf %10 : vector<8x32xf32> to vector<8x32xbf16>
    %cst_9 = arith.constant dense<0.000000e+00> : vector<8x128xf32>
    %13 = tpu.matmul %12, %4, %cst_9 {dimension_numbers = #tpu.dot_dimension_numbers<[1], [0], [0], [1], [0, 0, 1, 1], [], []>} : vector<8x32xbf16>, vector<32x128xbf16>, vector<8x128xf32> -> vector<8x128xf32>
    %14 = vector.extract_strided_slice %9 {offsets = [0, 0], sizes = [8, 128], strides = [1, 1]} : vector<64x128xf32> to vector<8x128xf32>
    %15 = arith.addf %13, %14 : vector<8x128xf32>
    %16 = arith.negf %15 : vector<8x128xf32>
    %17 = math.exp %16 : vector<8x128xf32>
    %cst_10 = arith.constant 1.000000e+00 : f32
    %18 = vector.broadcast %cst_10 : f32 to vector<8x128xf32>
    %19 = arith.addf %18, %17 : vector<8x128xf32>
    %20 = arith.divf %18, %19 : vector<8x128xf32>
    %21 = vector.extract_strided_slice %20 {offsets = [0, 0], sizes = [8, 32], strides = [1, 1]} : vector<8x128xf32> to vector<8x32xf32>
    %22 = vector.extract_strided_slice %20 {offsets = [0, 32], sizes = [8, 32], strides = [1, 1]} : vector<8x128xf32> to vector<8x32xf32>
    %23 = vector.extract_strided_slice %20 {offsets = [0, 64], sizes = [8, 32], strides = [1, 1]} : vector<8x128xf32> to vector<8x32xf32>
    %cst_11 = arith.constant 2.000000e+00 : f32
    %24 = vector.broadcast %cst_11 : f32 to vector<8x32xf32>
    %25 = arith.mulf %24, %23 : vector<8x32xf32>
    %cst_12 = arith.constant 1.000000e+00 : f32
    %26 = vector.broadcast %cst_12 : f32 to vector<8x32xf32>
    %27 = arith.subf %25, %26 : vector<8x32xf32>
    %28 = vector.extract_strided_slice %20 {offsets = [0, 96], sizes = [8, 32], strides = [1, 1]} : vector<8x128xf32> to vector<8x32xf32>
    %29 = arith.mulf %22, %11 : vector<8x32xf32>
    %30 = arith.mulf %21, %27 : vector<8x32xf32>
    %31 = arith.addf %29, %30 : vector<8x32xf32>
    %32 = math.tanh %31 : vector<8x32xf32>
    %33 = arith.mulf %28, %32 : vector<8x32xf32>
    %34 = arith.truncf %33 : vector<8x32xf32> to vector<8x32xbf16>
    %cst_13 = arith.constant dense<0.000000e+00> : vector<8x128xf32>
    %35 = tpu.matmul %34, %4, %cst_13 {dimension_numbers = #tpu.dot_dimension_numbers<[1], [0], [0], [1], [0, 0, 1, 1], [], []>} : vector<8x32xbf16>, vector<32x128xbf16>, vector<8x128xf32> -> vector<8x128xf32>
    %36 = vector.extract_strided_slice %9 {offsets = [8, 0], sizes = [8, 128], strides = [1, 1]} : vector<64x128xf32> to vector<8x128xf32>
    %37 = arith.addf %35, %36 : vector<8x128xf32>
    %38 = arith.negf %37 : vector<8x128xf32>
    %39 = math.exp %38 : vector<8x128xf32>
    %cst_14 = arith.constant 1.000000e+00 : f32
    %40 = vector.broadcast %cst_14 : f32 to vector<8x128xf32>
    %41 = arith.addf %40, %39 : vector<8x128xf32>
    %42 = arith.divf %40, %41 : vector<8x128xf32>
    %43 = vector.extract_strided_slice %42 {offsets = [0, 0], sizes = [8, 32], strides = [1, 1]} : vector<8x128xf32> to vector<8x32xf32>
    %44 = vector.extract_strided_slice %42 {offsets = [0, 32], sizes = [8, 32], strides = [1, 1]} : vector<8x128xf32> to vector<8x32xf32>
    %45 = vector.extract_strided_slice %42 {offsets = [0, 64], sizes = [8, 32], strides = [1, 1]} : vector<8x128xf32> to vector<8x32xf32>
    %cst_15 = arith.constant 2.000000e+00 : f32
    %46 = vector.broadcast %cst_15 : f32 to vector<8x32xf32>
    %47 = arith.mulf %46, %45 : vector<8x32xf32>
    %cst_16 = arith.constant 1.000000e+00 : f32
    %48 = vector.broadcast %cst_16 : f32 to vector<8x32xf32>
    %49 = arith.subf %47, %48 : vector<8x32xf32>
    %50 = vector.extract_strided_slice %42 {offsets = [0, 96], sizes = [8, 32], strides = [1, 1]} : vector<8x128xf32> to vector<8x32xf32>
    %51 = arith.mulf %44, %31 : vector<8x32xf32>
    %52 = arith.mulf %43, %49 : vector<8x32xf32>
    %53 = arith.addf %51, %52 : vector<8x32xf32>
    %54 = math.tanh %53 : vector<8x32xf32>
    %55 = arith.mulf %50, %54 : vector<8x32xf32>
    %56 = arith.truncf %55 : vector<8x32xf32> to vector<8x32xbf16>
    %cst_17 = arith.constant dense<0.000000e+00> : vector<8x128xf32>
    %57 = tpu.matmul %56, %4, %cst_17 {dimension_numbers = #tpu.dot_dimension_numbers<[1], [0], [0], [1], [0, 0, 1, 1], [], []>} : vector<8x32xbf16>, vector<32x128xbf16>, vector<8x128xf32> -> vector<8x128xf32>
    %58 = vector.extract_strided_slice %9 {offsets = [16, 0], sizes = [8, 128], strides = [1, 1]} : vector<64x128xf32> to vector<8x128xf32>
    %59 = arith.addf %57, %58 : vector<8x128xf32>
    %60 = arith.negf %59 : vector<8x128xf32>
    %61 = math.exp %60 : vector<8x128xf32>
    %cst_18 = arith.constant 1.000000e+00 : f32
    %62 = vector.broadcast %cst_18 : f32 to vector<8x128xf32>
    %63 = arith.addf %62, %61 : vector<8x128xf32>
    %64 = arith.divf %62, %63 : vector<8x128xf32>
    %65 = vector.extract_strided_slice %64 {offsets = [0, 0], sizes = [8, 32], strides = [1, 1]} : vector<8x128xf32> to vector<8x32xf32>
    %66 = vector.extract_strided_slice %64 {offsets = [0, 32], sizes = [8, 32], strides = [1, 1]} : vector<8x128xf32> to vector<8x32xf32>
    %67 = vector.extract_strided_slice %64 {offsets = [0, 64], sizes = [8, 32], strides = [1, 1]} : vector<8x128xf32> to vector<8x32xf32>
    %cst_19 = arith.constant 2.000000e+00 : f32
    %68 = vector.broadcast %cst_19 : f32 to vector<8x32xf32>
    %69 = arith.mulf %68, %67 : vector<8x32xf32>
    %cst_20 = arith.constant 1.000000e+00 : f32
    %70 = vector.broadcast %cst_20 : f32 to vector<8x32xf32>
    %71 = arith.subf %69, %70 : vector<8x32xf32>
    %72 = vector.extract_strided_slice %64 {offsets = [0, 96], sizes = [8, 32], strides = [1, 1]} : vector<8x128xf32> to vector<8x32xf32>
    %73 = arith.mulf %66, %53 : vector<8x32xf32>
    %74 = arith.mulf %65, %71 : vector<8x32xf32>
    %75 = arith.addf %73, %74 : vector<8x32xf32>
    %76 = math.tanh %75 : vector<8x32xf32>
    %77 = arith.mulf %72, %76 : vector<8x32xf32>
    %78 = arith.truncf %77 : vector<8x32xf32> to vector<8x32xbf16>
    %cst_21 = arith.constant dense<0.000000e+00> : vector<8x128xf32>
    %79 = tpu.matmul %78, %4, %cst_21 {dimension_numbers = #tpu.dot_dimension_numbers<[1], [0], [0], [1], [0, 0, 1, 1], [], []>} : vector<8x32xbf16>, vector<32x128xbf16>, vector<8x128xf32> -> vector<8x128xf32>
    %80 = vector.extract_strided_slice %9 {offsets = [24, 0], sizes = [8, 128], strides = [1, 1]} : vector<64x128xf32> to vector<8x128xf32>
    %81 = arith.addf %79, %80 : vector<8x128xf32>
    %82 = arith.negf %81 : vector<8x128xf32>
    %83 = math.exp %82 : vector<8x128xf32>
    %cst_22 = arith.constant 1.000000e+00 : f32
    %84 = vector.broadcast %cst_22 : f32 to vector<8x128xf32>
    %85 = arith.addf %84, %83 : vector<8x128xf32>
    %86 = arith.divf %84, %85 : vector<8x128xf32>
    %87 = vector.extract_strided_slice %86 {offsets = [0, 0], sizes = [8, 32], strides = [1, 1]} : vector<8x128xf32> to vector<8x32xf32>
    %88 = vector.extract_strided_slice %86 {offsets = [0, 32], sizes = [8, 32], strides = [1, 1]} : vector<8x128xf32> to vector<8x32xf32>
    %89 = vector.extract_strided_slice %86 {offsets = [0, 64], sizes = [8, 32], strides = [1, 1]} : vector<8x128xf32> to vector<8x32xf32>
    %cst_23 = arith.constant 2.000000e+00 : f32
    %90 = vector.broadcast %cst_23 : f32 to vector<8x32xf32>
    %91 = arith.mulf %90, %89 : vector<8x32xf32>
    %cst_24 = arith.constant 1.000000e+00 : f32
    %92 = vector.broadcast %cst_24 : f32 to vector<8x32xf32>
    %93 = arith.subf %91, %92 : vector<8x32xf32>
    %94 = vector.extract_strided_slice %86 {offsets = [0, 96], sizes = [8, 32], strides = [1, 1]} : vector<8x128xf32> to vector<8x32xf32>
    %95 = arith.mulf %88, %75 : vector<8x32xf32>
    %96 = arith.mulf %87, %93 : vector<8x32xf32>
    %97 = arith.addf %95, %96 : vector<8x32xf32>
    %98 = math.tanh %97 : vector<8x32xf32>
    %99 = arith.mulf %94, %98 : vector<8x32xf32>
    %100 = arith.truncf %99 : vector<8x32xf32> to vector<8x32xbf16>
    %cst_25 = arith.constant dense<0.000000e+00> : vector<8x128xf32>
    %101 = tpu.matmul %100, %4, %cst_25 {dimension_numbers = #tpu.dot_dimension_numbers<[1], [0], [0], [1], [0, 0, 1, 1], [], []>} : vector<8x32xbf16>, vector<32x128xbf16>, vector<8x128xf32> -> vector<8x128xf32>
    %102 = vector.extract_strided_slice %9 {offsets = [32, 0], sizes = [8, 128], strides = [1, 1]} : vector<64x128xf32> to vector<8x128xf32>
    %103 = arith.addf %101, %102 : vector<8x128xf32>
    %104 = arith.negf %103 : vector<8x128xf32>
    %105 = math.exp %104 : vector<8x128xf32>
    %cst_26 = arith.constant 1.000000e+00 : f32
    %106 = vector.broadcast %cst_26 : f32 to vector<8x128xf32>
    %107 = arith.addf %106, %105 : vector<8x128xf32>
    %108 = arith.divf %106, %107 : vector<8x128xf32>
    %109 = vector.extract_strided_slice %108 {offsets = [0, 0], sizes = [8, 32], strides = [1, 1]} : vector<8x128xf32> to vector<8x32xf32>
    %110 = vector.extract_strided_slice %108 {offsets = [0, 32], sizes = [8, 32], strides = [1, 1]} : vector<8x128xf32> to vector<8x32xf32>
    %111 = vector.extract_strided_slice %108 {offsets = [0, 64], sizes = [8, 32], strides = [1, 1]} : vector<8x128xf32> to vector<8x32xf32>
    %cst_27 = arith.constant 2.000000e+00 : f32
    %112 = vector.broadcast %cst_27 : f32 to vector<8x32xf32>
    %113 = arith.mulf %112, %111 : vector<8x32xf32>
    %cst_28 = arith.constant 1.000000e+00 : f32
    %114 = vector.broadcast %cst_28 : f32 to vector<8x32xf32>
    %115 = arith.subf %113, %114 : vector<8x32xf32>
    %116 = vector.extract_strided_slice %108 {offsets = [0, 96], sizes = [8, 32], strides = [1, 1]} : vector<8x128xf32> to vector<8x32xf32>
    %117 = arith.mulf %110, %97 : vector<8x32xf32>
    %118 = arith.mulf %109, %115 : vector<8x32xf32>
    %119 = arith.addf %117, %118 : vector<8x32xf32>
    %120 = math.tanh %119 : vector<8x32xf32>
    %121 = arith.mulf %116, %120 : vector<8x32xf32>
    %122 = arith.truncf %121 : vector<8x32xf32> to vector<8x32xbf16>
    %cst_29 = arith.constant dense<0.000000e+00> : vector<8x128xf32>
    %123 = tpu.matmul %122, %4, %cst_29 {dimension_numbers = #tpu.dot_dimension_numbers<[1], [0], [0], [1], [0, 0, 1, 1], [], []>} : vector<8x32xbf16>, vector<32x128xbf16>, vector<8x128xf32> -> vector<8x128xf32>
    %124 = vector.extract_strided_slice %9 {offsets = [40, 0], sizes = [8, 128], strides = [1, 1]} : vector<64x128xf32> to vector<8x128xf32>
    %125 = arith.addf %123, %124 : vector<8x128xf32>
    %126 = arith.negf %125 : vector<8x128xf32>
    %127 = math.exp %126 : vector<8x128xf32>
    %cst_30 = arith.constant 1.000000e+00 : f32
    %128 = vector.broadcast %cst_30 : f32 to vector<8x128xf32>
    %129 = arith.addf %128, %127 : vector<8x128xf32>
    %130 = arith.divf %128, %129 : vector<8x128xf32>
    %131 = vector.extract_strided_slice %130 {offsets = [0, 0], sizes = [8, 32], strides = [1, 1]} : vector<8x128xf32> to vector<8x32xf32>
    %132 = vector.extract_strided_slice %130 {offsets = [0, 32], sizes = [8, 32], strides = [1, 1]} : vector<8x128xf32> to vector<8x32xf32>
    %133 = vector.extract_strided_slice %130 {offsets = [0, 64], sizes = [8, 32], strides = [1, 1]} : vector<8x128xf32> to vector<8x32xf32>
    %cst_31 = arith.constant 2.000000e+00 : f32
    %134 = vector.broadcast %cst_31 : f32 to vector<8x32xf32>
    %135 = arith.mulf %134, %133 : vector<8x32xf32>
    %cst_32 = arith.constant 1.000000e+00 : f32
    %136 = vector.broadcast %cst_32 : f32 to vector<8x32xf32>
    %137 = arith.subf %135, %136 : vector<8x32xf32>
    %138 = vector.extract_strided_slice %130 {offsets = [0, 96], sizes = [8, 32], strides = [1, 1]} : vector<8x128xf32> to vector<8x32xf32>
    %139 = arith.mulf %132, %119 : vector<8x32xf32>
    %140 = arith.mulf %131, %137 : vector<8x32xf32>
    %141 = arith.addf %139, %140 : vector<8x32xf32>
    %142 = math.tanh %141 : vector<8x32xf32>
    %143 = arith.mulf %138, %142 : vector<8x32xf32>
    %144 = arith.truncf %143 : vector<8x32xf32> to vector<8x32xbf16>
    %cst_33 = arith.constant dense<0.000000e+00> : vector<8x128xf32>
    %145 = tpu.matmul %144, %4, %cst_33 {dimension_numbers = #tpu.dot_dimension_numbers<[1], [0], [0], [1], [0, 0, 1, 1], [], []>} : vector<8x32xbf16>, vector<32x128xbf16>, vector<8x128xf32> -> vector<8x128xf32>
    %146 = vector.extract_strided_slice %9 {offsets = [48, 0], sizes = [8, 128], strides = [1, 1]} : vector<64x128xf32> to vector<8x128xf32>
    %147 = arith.addf %145, %146 : vector<8x128xf32>
    %148 = arith.negf %147 : vector<8x128xf32>
    %149 = math.exp %148 : vector<8x128xf32>
    %cst_34 = arith.constant 1.000000e+00 : f32
    %150 = vector.broadcast %cst_34 : f32 to vector<8x128xf32>
    %151 = arith.addf %150, %149 : vector<8x128xf32>
    %152 = arith.divf %150, %151 : vector<8x128xf32>
    %153 = vector.extract_strided_slice %152 {offsets = [0, 0], sizes = [8, 32], strides = [1, 1]} : vector<8x128xf32> to vector<8x32xf32>
    %154 = vector.extract_strided_slice %152 {offsets = [0, 32], sizes = [8, 32], strides = [1, 1]} : vector<8x128xf32> to vector<8x32xf32>
    %155 = vector.extract_strided_slice %152 {offsets = [0, 64], sizes = [8, 32], strides = [1, 1]} : vector<8x128xf32> to vector<8x32xf32>
    %cst_35 = arith.constant 2.000000e+00 : f32
    %156 = vector.broadcast %cst_35 : f32 to vector<8x32xf32>
    %157 = arith.mulf %156, %155 : vector<8x32xf32>
    %cst_36 = arith.constant 1.000000e+00 : f32
    %158 = vector.broadcast %cst_36 : f32 to vector<8x32xf32>
    %159 = arith.subf %157, %158 : vector<8x32xf32>
    %160 = vector.extract_strided_slice %152 {offsets = [0, 96], sizes = [8, 32], strides = [1, 1]} : vector<8x128xf32> to vector<8x32xf32>
    %161 = arith.mulf %154, %141 : vector<8x32xf32>
    %162 = arith.mulf %153, %159 : vector<8x32xf32>
    %163 = arith.addf %161, %162 : vector<8x32xf32>
    %164 = math.tanh %163 : vector<8x32xf32>
    %165 = arith.mulf %160, %164 : vector<8x32xf32>
    %166 = arith.truncf %165 : vector<8x32xf32> to vector<8x32xbf16>
    %cst_37 = arith.constant dense<0.000000e+00> : vector<8x128xf32>
    %167 = tpu.matmul %166, %4, %cst_37 {dimension_numbers = #tpu.dot_dimension_numbers<[1], [0], [0], [1], [0, 0, 1, 1], [], []>} : vector<8x32xbf16>, vector<32x128xbf16>, vector<8x128xf32> -> vector<8x128xf32>
    %168 = vector.extract_strided_slice %9 {offsets = [56, 0], sizes = [8, 128], strides = [1, 1]} : vector<64x128xf32> to vector<8x128xf32>
    %169 = arith.addf %167, %168 : vector<8x128xf32>
    %170 = arith.negf %169 : vector<8x128xf32>
    %171 = math.exp %170 : vector<8x128xf32>
    %cst_38 = arith.constant 1.000000e+00 : f32
    %172 = vector.broadcast %cst_38 : f32 to vector<8x128xf32>
    %173 = arith.addf %172, %171 : vector<8x128xf32>
    %174 = arith.divf %172, %173 : vector<8x128xf32>
    %175 = vector.extract_strided_slice %174 {offsets = [0, 0], sizes = [8, 32], strides = [1, 1]} : vector<8x128xf32> to vector<8x32xf32>
    %176 = vector.extract_strided_slice %174 {offsets = [0, 32], sizes = [8, 32], strides = [1, 1]} : vector<8x128xf32> to vector<8x32xf32>
    %177 = vector.extract_strided_slice %174 {offsets = [0, 64], sizes = [8, 32], strides = [1, 1]} : vector<8x128xf32> to vector<8x32xf32>
    %cst_39 = arith.constant 2.000000e+00 : f32
    %178 = vector.broadcast %cst_39 : f32 to vector<8x32xf32>
    %179 = arith.mulf %178, %177 : vector<8x32xf32>
    %cst_40 = arith.constant 1.000000e+00 : f32
    %180 = vector.broadcast %cst_40 : f32 to vector<8x32xf32>
    %181 = arith.subf %179, %180 : vector<8x32xf32>
    %182 = vector.extract_strided_slice %174 {offsets = [0, 96], sizes = [8, 32], strides = [1, 1]} : vector<8x128xf32> to vector<8x32xf32>
    %183 = arith.mulf %176, %163 : vector<8x32xf32>
    %184 = arith.mulf %175, %181 : vector<8x32xf32>
    %185 = arith.addf %183, %184 : vector<8x32xf32>
    %186 = math.tanh %185 : vector<8x32xf32>
    %187 = arith.mulf %182, %186 : vector<8x32xf32>
    %188 = tpu.concatenate %33, %55, %77, %99, %121, %143, %165, %187 in 0 : vector<8x32xf32>, vector<8x32xf32>, vector<8x32xf32>, vector<8x32xf32>, vector<8x32xf32>, vector<8x32xf32>, vector<8x32xf32>, vector<8x32xf32> -> vector<64x32xf32>
    %189 = arith.truncf %188 : vector<64x32xf32> to vector<64x32xbf16>
    %c1 = arith.constant 1 : index
    %c0_41 = arith.constant 0 : index
    %c0_42 = arith.constant 0 : index
    %190 = vector.load %arg1[%c1, %c0_41, %c0_42] : memref<4x32x256xbf16, #tpu.memory_space<vmem>>, vector<1x32x256xbf16>
    %191 = vector.shape_cast %190 : vector<1x32x256xbf16> to vector<32x256xbf16>
    %192 = vector.extract_strided_slice %191 {offsets = [0, 0], sizes = [32, 128], strides = [1, 1]} : vector<32x256xbf16> to vector<32x128xbf16>
    %193 = vector.extract_strided_slice %191 {offsets = [0, 128], sizes = [32, 128], strides = [1, 1]} : vector<32x256xbf16> to vector<32x128xbf16>
    %c1_43 = arith.constant 1 : index
    %c0_44 = arith.constant 0 : index
    %c0_45 = arith.constant 0 : index
    %194 = vector.load %arg2[%c1_43, %c0_44, %c0_45] : memref<4x1x128xf32, #tpu.memory_space<vmem>>, vector<1x1x128xf32>
    %195 = vector.shape_cast %194 : vector<1x1x128xf32> to vector<1x128xf32>
    %cst_46 = arith.constant dense<0.000000e+00> : vector<64x128xf32>
    %196 = tpu.matmul %189, %192, %cst_46 {dimension_numbers = #tpu.dot_dimension_numbers<[1], [0], [0], [1], [0, 0, 1, 1], [], []>} : vector<64x32xbf16>, vector<32x128xbf16>, vector<64x128xf32> -> vector<64x128xf32>
    %197 = vector.broadcast %195 : vector<1x128xf32> to vector<64x128xf32>
    %198 = arith.addf %196, %197 : vector<64x128xf32>
    %cst_47 = arith.constant 0.000000e+00 : f32
    %199 = vector.broadcast %cst_47 : f32 to vector<8x32xf32>
    %cst_48 = arith.constant 0.000000e+00 : f32
    %200 = vector.broadcast %cst_48 : f32 to vector<8x32xf32>
    %201 = arith.truncf %199 : vector<8x32xf32> to vector<8x32xbf16>
    %cst_49 = arith.constant dense<0.000000e+00> : vector<8x128xf32>
    %202 = tpu.matmul %201, %193, %cst_49 {dimension_numbers = #tpu.dot_dimension_numbers<[1], [0], [0], [1], [0, 0, 1, 1], [], []>} : vector<8x32xbf16>, vector<32x128xbf16>, vector<8x128xf32> -> vector<8x128xf32>
    %203 = vector.extract_strided_slice %198 {offsets = [0, 0], sizes = [8, 128], strides = [1, 1]} : vector<64x128xf32> to vector<8x128xf32>
    %204 = arith.addf %202, %203 : vector<8x128xf32>
    %205 = arith.negf %204 : vector<8x128xf32>
    %206 = math.exp %205 : vector<8x128xf32>
    %cst_50 = arith.constant 1.000000e+00 : f32
    %207 = vector.broadcast %cst_50 : f32 to vector<8x128xf32>
    %208 = arith.addf %207, %206 : vector<8x128xf32>
    %209 = arith.divf %207, %208 : vector<8x128xf32>
    %210 = vector.extract_strided_slice %209 {offsets = [0, 0], sizes = [8, 32], strides = [1, 1]} : vector<8x128xf32> to vector<8x32xf32>
    %211 = vector.extract_strided_slice %209 {offsets = [0, 32], sizes = [8, 32], strides = [1, 1]} : vector<8x128xf32> to vector<8x32xf32>
    %212 = vector.extract_strided_slice %209 {offsets = [0, 64], sizes = [8, 32], strides = [1, 1]} : vector<8x128xf32> to vector<8x32xf32>
    %cst_51 = arith.constant 2.000000e+00 : f32
    %213 = vector.broadcast %cst_51 : f32 to vector<8x32xf32>
    %214 = arith.mulf %213, %212 : vector<8x32xf32>
    %cst_52 = arith.constant 1.000000e+00 : f32
    %215 = vector.broadcast %cst_52 : f32 to vector<8x32xf32>
    %216 = arith.subf %214, %215 : vector<8x32xf32>
    %217 = vector.extract_strided_slice %209 {offsets = [0, 96], sizes = [8, 32], strides = [1, 1]} : vector<8x128xf32> to vector<8x32xf32>
    %218 = arith.mulf %211, %200 : vector<8x32xf32>
    %219 = arith.mulf %210, %216 : vector<8x32xf32>
    %220 = arith.addf %218, %219 : vector<8x32xf32>
    %221 = math.tanh %220 : vector<8x32xf32>
    %222 = arith.mulf %217, %221 : vector<8x32xf32>
    %223 = arith.truncf %222 : vector<8x32xf32> to vector<8x32xbf16>
    %cst_53 = arith.constant dense<0.000000e+00> : vector<8x128xf32>
    %224 = tpu.matmul %223, %193, %cst_53 {dimension_numbers = #tpu.dot_dimension_numbers<[1], [0], [0], [1], [0, 0, 1, 1], [], []>} : vector<8x32xbf16>, vector<32x128xbf16>, vector<8x128xf32> -> vector<8x128xf32>
    %225 = vector.extract_strided_slice %198 {offsets = [8, 0], sizes = [8, 128], strides = [1, 1]} : vector<64x128xf32> to vector<8x128xf32>
    %226 = arith.addf %224, %225 : vector<8x128xf32>
    %227 = arith.negf %226 : vector<8x128xf32>
    %228 = math.exp %227 : vector<8x128xf32>
    %cst_54 = arith.constant 1.000000e+00 : f32
    %229 = vector.broadcast %cst_54 : f32 to vector<8x128xf32>
    %230 = arith.addf %229, %228 : vector<8x128xf32>
    %231 = arith.divf %229, %230 : vector<8x128xf32>
    %232 = vector.extract_strided_slice %231 {offsets = [0, 0], sizes = [8, 32], strides = [1, 1]} : vector<8x128xf32> to vector<8x32xf32>
    %233 = vector.extract_strided_slice %231 {offsets = [0, 32], sizes = [8, 32], strides = [1, 1]} : vector<8x128xf32> to vector<8x32xf32>
    %234 = vector.extract_strided_slice %231 {offsets = [0, 64], sizes = [8, 32], strides = [1, 1]} : vector<8x128xf32> to vector<8x32xf32>
    %cst_55 = arith.constant 2.000000e+00 : f32
    %235 = vector.broadcast %cst_55 : f32 to vector<8x32xf32>
    %236 = arith.mulf %235, %234 : vector<8x32xf32>
    %cst_56 = arith.constant 1.000000e+00 : f32
    %237 = vector.broadcast %cst_56 : f32 to vector<8x32xf32>
    %238 = arith.subf %236, %237 : vector<8x32xf32>
    %239 = vector.extract_strided_slice %231 {offsets = [0, 96], sizes = [8, 32], strides = [1, 1]} : vector<8x128xf32> to vector<8x32xf32>
    %240 = arith.mulf %233, %220 : vector<8x32xf32>
    %241 = arith.mulf %232, %238 : vector<8x32xf32>
    %242 = arith.addf %240, %241 : vector<8x32xf32>
    %243 = math.tanh %242 : vector<8x32xf32>
    %244 = arith.mulf %239, %243 : vector<8x32xf32>
    %245 = arith.truncf %244 : vector<8x32xf32> to vector<8x32xbf16>
    %cst_57 = arith.constant dense<0.000000e+00> : vector<8x128xf32>
    %246 = tpu.matmul %245, %193, %cst_57 {dimension_numbers = #tpu.dot_dimension_numbers<[1], [0], [0], [1], [0, 0, 1, 1], [], []>} : vector<8x32xbf16>, vector<32x128xbf16>, vector<8x128xf32> -> vector<8x128xf32>
    %247 = vector.extract_strided_slice %198 {offsets = [16, 0], sizes = [8, 128], strides = [1, 1]} : vector<64x128xf32> to vector<8x128xf32>
    %248 = arith.addf %246, %247 : vector<8x128xf32>
    %249 = arith.negf %248 : vector<8x128xf32>
    %250 = math.exp %249 : vector<8x128xf32>
    %cst_58 = arith.constant 1.000000e+00 : f32
    %251 = vector.broadcast %cst_58 : f32 to vector<8x128xf32>
    %252 = arith.addf %251, %250 : vector<8x128xf32>
    %253 = arith.divf %251, %252 : vector<8x128xf32>
    %254 = vector.extract_strided_slice %253 {offsets = [0, 0], sizes = [8, 32], strides = [1, 1]} : vector<8x128xf32> to vector<8x32xf32>
    %255 = vector.extract_strided_slice %253 {offsets = [0, 32], sizes = [8, 32], strides = [1, 1]} : vector<8x128xf32> to vector<8x32xf32>
    %256 = vector.extract_strided_slice %253 {offsets = [0, 64], sizes = [8, 32], strides = [1, 1]} : vector<8x128xf32> to vector<8x32xf32>
    %cst_59 = arith.constant 2.000000e+00 : f32
    %257 = vector.broadcast %cst_59 : f32 to vector<8x32xf32>
    %258 = arith.mulf %257, %256 : vector<8x32xf32>
    %cst_60 = arith.constant 1.000000e+00 : f32
    %259 = vector.broadcast %cst_60 : f32 to vector<8x32xf32>
    %260 = arith.subf %258, %259 : vector<8x32xf32>
    %261 = vector.extract_strided_slice %253 {offsets = [0, 96], sizes = [8, 32], strides = [1, 1]} : vector<8x128xf32> to vector<8x32xf32>
    %262 = arith.mulf %255, %242 : vector<8x32xf32>
    %263 = arith.mulf %254, %260 : vector<8x32xf32>
    %264 = arith.addf %262, %263 : vector<8x32xf32>
    %265 = math.tanh %264 : vector<8x32xf32>
    %266 = arith.mulf %261, %265 : vector<8x32xf32>
    %267 = arith.truncf %266 : vector<8x32xf32> to vector<8x32xbf16>
    %cst_61 = arith.constant dense<0.000000e+00> : vector<8x128xf32>
    %268 = tpu.matmul %267, %193, %cst_61 {dimension_numbers = #tpu.dot_dimension_numbers<[1], [0], [0], [1], [0, 0, 1, 1], [], []>} : vector<8x32xbf16>, vector<32x128xbf16>, vector<8x128xf32> -> vector<8x128xf32>
    %269 = vector.extract_strided_slice %198 {offsets = [24, 0], sizes = [8, 128], strides = [1, 1]} : vector<64x128xf32> to vector<8x128xf32>
    %270 = arith.addf %268, %269 : vector<8x128xf32>
    %271 = arith.negf %270 : vector<8x128xf32>
    %272 = math.exp %271 : vector<8x128xf32>
    %cst_62 = arith.constant 1.000000e+00 : f32
    %273 = vector.broadcast %cst_62 : f32 to vector<8x128xf32>
    %274 = arith.addf %273, %272 : vector<8x128xf32>
    %275 = arith.divf %273, %274 : vector<8x128xf32>
    %276 = vector.extract_strided_slice %275 {offsets = [0, 0], sizes = [8, 32], strides = [1, 1]} : vector<8x128xf32> to vector<8x32xf32>
    %277 = vector.extract_strided_slice %275 {offsets = [0, 32], sizes = [8, 32], strides = [1, 1]} : vector<8x128xf32> to vector<8x32xf32>
    %278 = vector.extract_strided_slice %275 {offsets = [0, 64], sizes = [8, 32], strides = [1, 1]} : vector<8x128xf32> to vector<8x32xf32>
    %cst_63 = arith.constant 2.000000e+00 : f32
    %279 = vector.broadcast %cst_63 : f32 to vector<8x32xf32>
    %280 = arith.mulf %279, %278 : vector<8x32xf32>
    %cst_64 = arith.constant 1.000000e+00 : f32
    %281 = vector.broadcast %cst_64 : f32 to vector<8x32xf32>
    %282 = arith.subf %280, %281 : vector<8x32xf32>
    %283 = vector.extract_strided_slice %275 {offsets = [0, 96], sizes = [8, 32], strides = [1, 1]} : vector<8x128xf32> to vector<8x32xf32>
    %284 = arith.mulf %277, %264 : vector<8x32xf32>
    %285 = arith.mulf %276, %282 : vector<8x32xf32>
    %286 = arith.addf %284, %285 : vector<8x32xf32>
    %287 = math.tanh %286 : vector<8x32xf32>
    %288 = arith.mulf %283, %287 : vector<8x32xf32>
    %289 = arith.truncf %288 : vector<8x32xf32> to vector<8x32xbf16>
    %cst_65 = arith.constant dense<0.000000e+00> : vector<8x128xf32>
    %290 = tpu.matmul %289, %193, %cst_65 {dimension_numbers = #tpu.dot_dimension_numbers<[1], [0], [0], [1], [0, 0, 1, 1], [], []>} : vector<8x32xbf16>, vector<32x128xbf16>, vector<8x128xf32> -> vector<8x128xf32>
    %291 = vector.extract_strided_slice %198 {offsets = [32, 0], sizes = [8, 128], strides = [1, 1]} : vector<64x128xf32> to vector<8x128xf32>
    %292 = arith.addf %290, %291 : vector<8x128xf32>
    %293 = arith.negf %292 : vector<8x128xf32>
    %294 = math.exp %293 : vector<8x128xf32>
    %cst_66 = arith.constant 1.000000e+00 : f32
    %295 = vector.broadcast %cst_66 : f32 to vector<8x128xf32>
    %296 = arith.addf %295, %294 : vector<8x128xf32>
    %297 = arith.divf %295, %296 : vector<8x128xf32>
    %298 = vector.extract_strided_slice %297 {offsets = [0, 0], sizes = [8, 32], strides = [1, 1]} : vector<8x128xf32> to vector<8x32xf32>
    %299 = vector.extract_strided_slice %297 {offsets = [0, 32], sizes = [8, 32], strides = [1, 1]} : vector<8x128xf32> to vector<8x32xf32>
    %300 = vector.extract_strided_slice %297 {offsets = [0, 64], sizes = [8, 32], strides = [1, 1]} : vector<8x128xf32> to vector<8x32xf32>
    %cst_67 = arith.constant 2.000000e+00 : f32
    %301 = vector.broadcast %cst_67 : f32 to vector<8x32xf32>
    %302 = arith.mulf %301, %300 : vector<8x32xf32>
    %cst_68 = arith.constant 1.000000e+00 : f32
    %303 = vector.broadcast %cst_68 : f32 to vector<8x32xf32>
    %304 = arith.subf %302, %303 : vector<8x32xf32>
    %305 = vector.extract_strided_slice %297 {offsets = [0, 96], sizes = [8, 32], strides = [1, 1]} : vector<8x128xf32> to vector<8x32xf32>
    %306 = arith.mulf %299, %286 : vector<8x32xf32>
    %307 = arith.mulf %298, %304 : vector<8x32xf32>
    %308 = arith.addf %306, %307 : vector<8x32xf32>
    %309 = math.tanh %308 : vector<8x32xf32>
    %310 = arith.mulf %305, %309 : vector<8x32xf32>
    %311 = arith.truncf %310 : vector<8x32xf32> to vector<8x32xbf16>
    %cst_69 = arith.constant dense<0.000000e+00> : vector<8x128xf32>
    %312 = tpu.matmul %311, %193, %cst_69 {dimension_numbers = #tpu.dot_dimension_numbers<[1], [0], [0], [1], [0, 0, 1, 1], [], []>} : vector<8x32xbf16>, vector<32x128xbf16>, vector<8x128xf32> -> vector<8x128xf32>
    %313 = vector.extract_strided_slice %198 {offsets = [40, 0], sizes = [8, 128], strides = [1, 1]} : vector<64x128xf32> to vector<8x128xf32>
    %314 = arith.addf %312, %313 : vector<8x128xf32>
    %315 = arith.negf %314 : vector<8x128xf32>
    %316 = math.exp %315 : vector<8x128xf32>
    %cst_70 = arith.constant 1.000000e+00 : f32
    %317 = vector.broadcast %cst_70 : f32 to vector<8x128xf32>
    %318 = arith.addf %317, %316 : vector<8x128xf32>
    %319 = arith.divf %317, %318 : vector<8x128xf32>
    %320 = vector.extract_strided_slice %319 {offsets = [0, 0], sizes = [8, 32], strides = [1, 1]} : vector<8x128xf32> to vector<8x32xf32>
    %321 = vector.extract_strided_slice %319 {offsets = [0, 32], sizes = [8, 32], strides = [1, 1]} : vector<8x128xf32> to vector<8x32xf32>
    %322 = vector.extract_strided_slice %319 {offsets = [0, 64], sizes = [8, 32], strides = [1, 1]} : vector<8x128xf32> to vector<8x32xf32>
    %cst_71 = arith.constant 2.000000e+00 : f32
    %323 = vector.broadcast %cst_71 : f32 to vector<8x32xf32>
    %324 = arith.mulf %323, %322 : vector<8x32xf32>
    %cst_72 = arith.constant 1.000000e+00 : f32
    %325 = vector.broadcast %cst_72 : f32 to vector<8x32xf32>
    %326 = arith.subf %324, %325 : vector<8x32xf32>
    %327 = vector.extract_strided_slice %319 {offsets = [0, 96], sizes = [8, 32], strides = [1, 1]} : vector<8x128xf32> to vector<8x32xf32>
    %328 = arith.mulf %321, %308 : vector<8x32xf32>
    %329 = arith.mulf %320, %326 : vector<8x32xf32>
    %330 = arith.addf %328, %329 : vector<8x32xf32>
    %331 = math.tanh %330 : vector<8x32xf32>
    %332 = arith.mulf %327, %331 : vector<8x32xf32>
    %333 = arith.truncf %332 : vector<8x32xf32> to vector<8x32xbf16>
    %cst_73 = arith.constant dense<0.000000e+00> : vector<8x128xf32>
    %334 = tpu.matmul %333, %193, %cst_73 {dimension_numbers = #tpu.dot_dimension_numbers<[1], [0], [0], [1], [0, 0, 1, 1], [], []>} : vector<8x32xbf16>, vector<32x128xbf16>, vector<8x128xf32> -> vector<8x128xf32>
    %335 = vector.extract_strided_slice %198 {offsets = [48, 0], sizes = [8, 128], strides = [1, 1]} : vector<64x128xf32> to vector<8x128xf32>
    %336 = arith.addf %334, %335 : vector<8x128xf32>
    %337 = arith.negf %336 : vector<8x128xf32>
    %338 = math.exp %337 : vector<8x128xf32>
    %cst_74 = arith.constant 1.000000e+00 : f32
    %339 = vector.broadcast %cst_74 : f32 to vector<8x128xf32>
    %340 = arith.addf %339, %338 : vector<8x128xf32>
    %341 = arith.divf %339, %340 : vector<8x128xf32>
    %342 = vector.extract_strided_slice %341 {offsets = [0, 0], sizes = [8, 32], strides = [1, 1]} : vector<8x128xf32> to vector<8x32xf32>
    %343 = vector.extract_strided_slice %341 {offsets = [0, 32], sizes = [8, 32], strides = [1, 1]} : vector<8x128xf32> to vector<8x32xf32>
    %344 = vector.extract_strided_slice %341 {offsets = [0, 64], sizes = [8, 32], strides = [1, 1]} : vector<8x128xf32> to vector<8x32xf32>
    %cst_75 = arith.constant 2.000000e+00 : f32
    %345 = vector.broadcast %cst_75 : f32 to vector<8x32xf32>
    %346 = arith.mulf %345, %344 : vector<8x32xf32>
    %cst_76 = arith.constant 1.000000e+00 : f32
    %347 = vector.broadcast %cst_76 : f32 to vector<8x32xf32>
    %348 = arith.subf %346, %347 : vector<8x32xf32>
    %349 = vector.extract_strided_slice %341 {offsets = [0, 96], sizes = [8, 32], strides = [1, 1]} : vector<8x128xf32> to vector<8x32xf32>
    %350 = arith.mulf %343, %330 : vector<8x32xf32>
    %351 = arith.mulf %342, %348 : vector<8x32xf32>
    %352 = arith.addf %350, %351 : vector<8x32xf32>
    %353 = math.tanh %352 : vector<8x32xf32>
    %354 = arith.mulf %349, %353 : vector<8x32xf32>
    %355 = arith.truncf %354 : vector<8x32xf32> to vector<8x32xbf16>
    %cst_77 = arith.constant dense<0.000000e+00> : vector<8x128xf32>
    %356 = tpu.matmul %355, %193, %cst_77 {dimension_numbers = #tpu.dot_dimension_numbers<[1], [0], [0], [1], [0, 0, 1, 1], [], []>} : vector<8x32xbf16>, vector<32x128xbf16>, vector<8x128xf32> -> vector<8x128xf32>
    %357 = vector.extract_strided_slice %198 {offsets = [56, 0], sizes = [8, 128], strides = [1, 1]} : vector<64x128xf32> to vector<8x128xf32>
    %358 = arith.addf %356, %357 : vector<8x128xf32>
    %359 = arith.negf %358 : vector<8x128xf32>
    %360 = math.exp %359 : vector<8x128xf32>
    %cst_78 = arith.constant 1.000000e+00 : f32
    %361 = vector.broadcast %cst_78 : f32 to vector<8x128xf32>
    %362 = arith.addf %361, %360 : vector<8x128xf32>
    %363 = arith.divf %361, %362 : vector<8x128xf32>
    %364 = vector.extract_strided_slice %363 {offsets = [0, 0], sizes = [8, 32], strides = [1, 1]} : vector<8x128xf32> to vector<8x32xf32>
    %365 = vector.extract_strided_slice %363 {offsets = [0, 32], sizes = [8, 32], strides = [1, 1]} : vector<8x128xf32> to vector<8x32xf32>
    %366 = vector.extract_strided_slice %363 {offsets = [0, 64], sizes = [8, 32], strides = [1, 1]} : vector<8x128xf32> to vector<8x32xf32>
    %cst_79 = arith.constant 2.000000e+00 : f32
    %367 = vector.broadcast %cst_79 : f32 to vector<8x32xf32>
    %368 = arith.mulf %367, %366 : vector<8x32xf32>
    %cst_80 = arith.constant 1.000000e+00 : f32
    %369 = vector.broadcast %cst_80 : f32 to vector<8x32xf32>
    %370 = arith.subf %368, %369 : vector<8x32xf32>
    %371 = vector.extract_strided_slice %363 {offsets = [0, 96], sizes = [8, 32], strides = [1, 1]} : vector<8x128xf32> to vector<8x32xf32>
    %372 = arith.mulf %365, %352 : vector<8x32xf32>
    %373 = arith.mulf %364, %370 : vector<8x32xf32>
    %374 = arith.addf %372, %373 : vector<8x32xf32>
    %375 = math.tanh %374 : vector<8x32xf32>
    %376 = arith.mulf %371, %375 : vector<8x32xf32>
    %377 = tpu.concatenate %222, %244, %266, %288, %310, %332, %354, %376 in 0 : vector<8x32xf32>, vector<8x32xf32>, vector<8x32xf32>, vector<8x32xf32>, vector<8x32xf32>, vector<8x32xf32>, vector<8x32xf32>, vector<8x32xf32> -> vector<64x32xf32>
    %378 = arith.truncf %377 : vector<64x32xf32> to vector<64x32xbf16>
    %c2 = arith.constant 2 : index
    %c0_81 = arith.constant 0 : index
    %c0_82 = arith.constant 0 : index
    %379 = vector.load %arg1[%c2, %c0_81, %c0_82] : memref<4x32x256xbf16, #tpu.memory_space<vmem>>, vector<1x32x256xbf16>
    %380 = vector.shape_cast %379 : vector<1x32x256xbf16> to vector<32x256xbf16>
    %381 = vector.extract_strided_slice %380 {offsets = [0, 0], sizes = [32, 128], strides = [1, 1]} : vector<32x256xbf16> to vector<32x128xbf16>
    %382 = vector.extract_strided_slice %380 {offsets = [0, 128], sizes = [32, 128], strides = [1, 1]} : vector<32x256xbf16> to vector<32x128xbf16>
    %c2_83 = arith.constant 2 : index
    %c0_84 = arith.constant 0 : index
    %c0_85 = arith.constant 0 : index
    %383 = vector.load %arg2[%c2_83, %c0_84, %c0_85] : memref<4x1x128xf32, #tpu.memory_space<vmem>>, vector<1x1x128xf32>
    %384 = vector.shape_cast %383 : vector<1x1x128xf32> to vector<1x128xf32>
    %cst_86 = arith.constant dense<0.000000e+00> : vector<64x128xf32>
    %385 = tpu.matmul %378, %381, %cst_86 {dimension_numbers = #tpu.dot_dimension_numbers<[1], [0], [0], [1], [0, 0, 1, 1], [], []>} : vector<64x32xbf16>, vector<32x128xbf16>, vector<64x128xf32> -> vector<64x128xf32>
    %386 = vector.broadcast %384 : vector<1x128xf32> to vector<64x128xf32>
    %387 = arith.addf %385, %386 : vector<64x128xf32>
    %cst_87 = arith.constant 0.000000e+00 : f32
    %388 = vector.broadcast %cst_87 : f32 to vector<8x32xf32>
    %389 = vector.extract_strided_slice %387 {offsets = [0, 0], sizes = [8, 128], strides = [1, 1]} : vector<64x128xf32> to vector<8x128xf32>
    %390 = arith.truncf %388 : vector<8x32xf32> to vector<8x32xbf16>
    %cst_88 = arith.constant dense<0.000000e+00> : vector<8x128xf32>
    %391 = tpu.matmul %390, %382, %cst_88 {dimension_numbers = #tpu.dot_dimension_numbers<[1], [0], [0], [1], [0, 0, 1, 1], [], []>} : vector<8x32xbf16>, vector<32x128xbf16>, vector<8x128xf32> -> vector<8x128xf32>
    %392 = vector.extract_strided_slice %389 {offsets = [0, 0], sizes = [8, 64], strides = [1, 1]} : vector<8x128xf32> to vector<8x64xf32>
    %393 = vector.extract_strided_slice %391 {offsets = [0, 0], sizes = [8, 64], strides = [1, 1]} : vector<8x128xf32> to vector<8x64xf32>
    %394 = arith.addf %392, %393 : vector<8x64xf32>
    %395 = arith.negf %394 : vector<8x64xf32>
    %396 = math.exp %395 : vector<8x64xf32>
    %cst_89 = arith.constant 1.000000e+00 : f32
    %397 = vector.broadcast %cst_89 : f32 to vector<8x64xf32>
    %398 = arith.addf %397, %396 : vector<8x64xf32>
    %399 = arith.divf %397, %398 : vector<8x64xf32>
    %400 = vector.extract_strided_slice %399 {offsets = [0, 0], sizes = [8, 32], strides = [1, 1]} : vector<8x64xf32> to vector<8x32xf32>
    %401 = vector.extract_strided_slice %399 {offsets = [0, 32], sizes = [8, 32], strides = [1, 1]} : vector<8x64xf32> to vector<8x32xf32>
    %402 = vector.extract_strided_slice %389 {offsets = [0, 64], sizes = [8, 32], strides = [1, 1]} : vector<8x128xf32> to vector<8x32xf32>
    %403 = vector.extract_strided_slice %391 {offsets = [0, 64], sizes = [8, 32], strides = [1, 1]} : vector<8x128xf32> to vector<8x32xf32>
    %404 = vector.extract_strided_slice %389 {offsets = [0, 96], sizes = [8, 32], strides = [1, 1]} : vector<8x128xf32> to vector<8x32xf32>
    %405 = arith.addf %403, %404 : vector<8x32xf32>
    %406 = arith.mulf %400, %405 : vector<8x32xf32>
    %407 = arith.addf %402, %406 : vector<8x32xf32>
    %408 = math.tanh %407 : vector<8x32xf32>
    %cst_90 = arith.constant 1.000000e+00 : f32
    %409 = vector.broadcast %cst_90 : f32 to vector<8x32xf32>
    %410 = arith.subf %409, %401 : vector<8x32xf32>
    %411 = arith.mulf %410, %408 : vector<8x32xf32>
    %412 = arith.mulf %401, %388 : vector<8x32xf32>
    %413 = arith.addf %411, %412 : vector<8x32xf32>
    %414 = vector.extract_strided_slice %387 {offsets = [8, 0], sizes = [8, 128], strides = [1, 1]} : vector<64x128xf32> to vector<8x128xf32>
    %415 = arith.truncf %413 : vector<8x32xf32> to vector<8x32xbf16>
    %cst_91 = arith.constant dense<0.000000e+00> : vector<8x128xf32>
    %416 = tpu.matmul %415, %382, %cst_91 {dimension_numbers = #tpu.dot_dimension_numbers<[1], [0], [0], [1], [0, 0, 1, 1], [], []>} : vector<8x32xbf16>, vector<32x128xbf16>, vector<8x128xf32> -> vector<8x128xf32>
    %417 = vector.extract_strided_slice %414 {offsets = [0, 0], sizes = [8, 64], strides = [1, 1]} : vector<8x128xf32> to vector<8x64xf32>
    %418 = vector.extract_strided_slice %416 {offsets = [0, 0], sizes = [8, 64], strides = [1, 1]} : vector<8x128xf32> to vector<8x64xf32>
    %419 = arith.addf %417, %418 : vector<8x64xf32>
    %420 = arith.negf %419 : vector<8x64xf32>
    %421 = math.exp %420 : vector<8x64xf32>
    %cst_92 = arith.constant 1.000000e+00 : f32
    %422 = vector.broadcast %cst_92 : f32 to vector<8x64xf32>
    %423 = arith.addf %422, %421 : vector<8x64xf32>
    %424 = arith.divf %422, %423 : vector<8x64xf32>
    %425 = vector.extract_strided_slice %424 {offsets = [0, 0], sizes = [8, 32], strides = [1, 1]} : vector<8x64xf32> to vector<8x32xf32>
    %426 = vector.extract_strided_slice %424 {offsets = [0, 32], sizes = [8, 32], strides = [1, 1]} : vector<8x64xf32> to vector<8x32xf32>
    %427 = vector.extract_strided_slice %414 {offsets = [0, 64], sizes = [8, 32], strides = [1, 1]} : vector<8x128xf32> to vector<8x32xf32>
    %428 = vector.extract_strided_slice %416 {offsets = [0, 64], sizes = [8, 32], strides = [1, 1]} : vector<8x128xf32> to vector<8x32xf32>
    %429 = vector.extract_strided_slice %414 {offsets = [0, 96], sizes = [8, 32], strides = [1, 1]} : vector<8x128xf32> to vector<8x32xf32>
    %430 = arith.addf %428, %429 : vector<8x32xf32>
    %431 = arith.mulf %425, %430 : vector<8x32xf32>
    %432 = arith.addf %427, %431 : vector<8x32xf32>
    %433 = math.tanh %432 : vector<8x32xf32>
    %cst_93 = arith.constant 1.000000e+00 : f32
    %434 = vector.broadcast %cst_93 : f32 to vector<8x32xf32>
    %435 = arith.subf %434, %426 : vector<8x32xf32>
    %436 = arith.mulf %435, %433 : vector<8x32xf32>
    %437 = arith.mulf %426, %413 : vector<8x32xf32>
    %438 = arith.addf %436, %437 : vector<8x32xf32>
    %439 = vector.extract_strided_slice %387 {offsets = [16, 0], sizes = [8, 128], strides = [1, 1]} : vector<64x128xf32> to vector<8x128xf32>
    %440 = arith.truncf %438 : vector<8x32xf32> to vector<8x32xbf16>
    %cst_94 = arith.constant dense<0.000000e+00> : vector<8x128xf32>
    %441 = tpu.matmul %440, %382, %cst_94 {dimension_numbers = #tpu.dot_dimension_numbers<[1], [0], [0], [1], [0, 0, 1, 1], [], []>} : vector<8x32xbf16>, vector<32x128xbf16>, vector<8x128xf32> -> vector<8x128xf32>
    %442 = vector.extract_strided_slice %439 {offsets = [0, 0], sizes = [8, 64], strides = [1, 1]} : vector<8x128xf32> to vector<8x64xf32>
    %443 = vector.extract_strided_slice %441 {offsets = [0, 0], sizes = [8, 64], strides = [1, 1]} : vector<8x128xf32> to vector<8x64xf32>
    %444 = arith.addf %442, %443 : vector<8x64xf32>
    %445 = arith.negf %444 : vector<8x64xf32>
    %446 = math.exp %445 : vector<8x64xf32>
    %cst_95 = arith.constant 1.000000e+00 : f32
    %447 = vector.broadcast %cst_95 : f32 to vector<8x64xf32>
    %448 = arith.addf %447, %446 : vector<8x64xf32>
    %449 = arith.divf %447, %448 : vector<8x64xf32>
    %450 = vector.extract_strided_slice %449 {offsets = [0, 0], sizes = [8, 32], strides = [1, 1]} : vector<8x64xf32> to vector<8x32xf32>
    %451 = vector.extract_strided_slice %449 {offsets = [0, 32], sizes = [8, 32], strides = [1, 1]} : vector<8x64xf32> to vector<8x32xf32>
    %452 = vector.extract_strided_slice %439 {offsets = [0, 64], sizes = [8, 32], strides = [1, 1]} : vector<8x128xf32> to vector<8x32xf32>
    %453 = vector.extract_strided_slice %441 {offsets = [0, 64], sizes = [8, 32], strides = [1, 1]} : vector<8x128xf32> to vector<8x32xf32>
    %454 = vector.extract_strided_slice %439 {offsets = [0, 96], sizes = [8, 32], strides = [1, 1]} : vector<8x128xf32> to vector<8x32xf32>
    %455 = arith.addf %453, %454 : vector<8x32xf32>
    %456 = arith.mulf %450, %455 : vector<8x32xf32>
    %457 = arith.addf %452, %456 : vector<8x32xf32>
    %458 = math.tanh %457 : vector<8x32xf32>
    %cst_96 = arith.constant 1.000000e+00 : f32
    %459 = vector.broadcast %cst_96 : f32 to vector<8x32xf32>
    %460 = arith.subf %459, %451 : vector<8x32xf32>
    %461 = arith.mulf %460, %458 : vector<8x32xf32>
    %462 = arith.mulf %451, %438 : vector<8x32xf32>
    %463 = arith.addf %461, %462 : vector<8x32xf32>
    %464 = vector.extract_strided_slice %387 {offsets = [24, 0], sizes = [8, 128], strides = [1, 1]} : vector<64x128xf32> to vector<8x128xf32>
    %465 = arith.truncf %463 : vector<8x32xf32> to vector<8x32xbf16>
    %cst_97 = arith.constant dense<0.000000e+00> : vector<8x128xf32>
    %466 = tpu.matmul %465, %382, %cst_97 {dimension_numbers = #tpu.dot_dimension_numbers<[1], [0], [0], [1], [0, 0, 1, 1], [], []>} : vector<8x32xbf16>, vector<32x128xbf16>, vector<8x128xf32> -> vector<8x128xf32>
    %467 = vector.extract_strided_slice %464 {offsets = [0, 0], sizes = [8, 64], strides = [1, 1]} : vector<8x128xf32> to vector<8x64xf32>
    %468 = vector.extract_strided_slice %466 {offsets = [0, 0], sizes = [8, 64], strides = [1, 1]} : vector<8x128xf32> to vector<8x64xf32>
    %469 = arith.addf %467, %468 : vector<8x64xf32>
    %470 = arith.negf %469 : vector<8x64xf32>
    %471 = math.exp %470 : vector<8x64xf32>
    %cst_98 = arith.constant 1.000000e+00 : f32
    %472 = vector.broadcast %cst_98 : f32 to vector<8x64xf32>
    %473 = arith.addf %472, %471 : vector<8x64xf32>
    %474 = arith.divf %472, %473 : vector<8x64xf32>
    %475 = vector.extract_strided_slice %474 {offsets = [0, 0], sizes = [8, 32], strides = [1, 1]} : vector<8x64xf32> to vector<8x32xf32>
    %476 = vector.extract_strided_slice %474 {offsets = [0, 32], sizes = [8, 32], strides = [1, 1]} : vector<8x64xf32> to vector<8x32xf32>
    %477 = vector.extract_strided_slice %464 {offsets = [0, 64], sizes = [8, 32], strides = [1, 1]} : vector<8x128xf32> to vector<8x32xf32>
    %478 = vector.extract_strided_slice %466 {offsets = [0, 64], sizes = [8, 32], strides = [1, 1]} : vector<8x128xf32> to vector<8x32xf32>
    %479 = vector.extract_strided_slice %464 {offsets = [0, 96], sizes = [8, 32], strides = [1, 1]} : vector<8x128xf32> to vector<8x32xf32>
    %480 = arith.addf %478, %479 : vector<8x32xf32>
    %481 = arith.mulf %475, %480 : vector<8x32xf32>
    %482 = arith.addf %477, %481 : vector<8x32xf32>
    %483 = math.tanh %482 : vector<8x32xf32>
    %cst_99 = arith.constant 1.000000e+00 : f32
    %484 = vector.broadcast %cst_99 : f32 to vector<8x32xf32>
    %485 = arith.subf %484, %476 : vector<8x32xf32>
    %486 = arith.mulf %485, %483 : vector<8x32xf32>
    %487 = arith.mulf %476, %463 : vector<8x32xf32>
    %488 = arith.addf %486, %487 : vector<8x32xf32>
    %489 = vector.extract_strided_slice %387 {offsets = [32, 0], sizes = [8, 128], strides = [1, 1]} : vector<64x128xf32> to vector<8x128xf32>
    %490 = arith.truncf %488 : vector<8x32xf32> to vector<8x32xbf16>
    %cst_100 = arith.constant dense<0.000000e+00> : vector<8x128xf32>
    %491 = tpu.matmul %490, %382, %cst_100 {dimension_numbers = #tpu.dot_dimension_numbers<[1], [0], [0], [1], [0, 0, 1, 1], [], []>} : vector<8x32xbf16>, vector<32x128xbf16>, vector<8x128xf32> -> vector<8x128xf32>
    %492 = vector.extract_strided_slice %489 {offsets = [0, 0], sizes = [8, 64], strides = [1, 1]} : vector<8x128xf32> to vector<8x64xf32>
    %493 = vector.extract_strided_slice %491 {offsets = [0, 0], sizes = [8, 64], strides = [1, 1]} : vector<8x128xf32> to vector<8x64xf32>
    %494 = arith.addf %492, %493 : vector<8x64xf32>
    %495 = arith.negf %494 : vector<8x64xf32>
    %496 = math.exp %495 : vector<8x64xf32>
    %cst_101 = arith.constant 1.000000e+00 : f32
    %497 = vector.broadcast %cst_101 : f32 to vector<8x64xf32>
    %498 = arith.addf %497, %496 : vector<8x64xf32>
    %499 = arith.divf %497, %498 : vector<8x64xf32>
    %500 = vector.extract_strided_slice %499 {offsets = [0, 0], sizes = [8, 32], strides = [1, 1]} : vector<8x64xf32> to vector<8x32xf32>
    %501 = vector.extract_strided_slice %499 {offsets = [0, 32], sizes = [8, 32], strides = [1, 1]} : vector<8x64xf32> to vector<8x32xf32>
    %502 = vector.extract_strided_slice %489 {offsets = [0, 64], sizes = [8, 32], strides = [1, 1]} : vector<8x128xf32> to vector<8x32xf32>
    %503 = vector.extract_strided_slice %491 {offsets = [0, 64], sizes = [8, 32], strides = [1, 1]} : vector<8x128xf32> to vector<8x32xf32>
    %504 = vector.extract_strided_slice %489 {offsets = [0, 96], sizes = [8, 32], strides = [1, 1]} : vector<8x128xf32> to vector<8x32xf32>
    %505 = arith.addf %503, %504 : vector<8x32xf32>
    %506 = arith.mulf %500, %505 : vector<8x32xf32>
    %507 = arith.addf %502, %506 : vector<8x32xf32>
    %508 = math.tanh %507 : vector<8x32xf32>
    %cst_102 = arith.constant 1.000000e+00 : f32
    %509 = vector.broadcast %cst_102 : f32 to vector<8x32xf32>
    %510 = arith.subf %509, %501 : vector<8x32xf32>
    %511 = arith.mulf %510, %508 : vector<8x32xf32>
    %512 = arith.mulf %501, %488 : vector<8x32xf32>
    %513 = arith.addf %511, %512 : vector<8x32xf32>
    %514 = vector.extract_strided_slice %387 {offsets = [40, 0], sizes = [8, 128], strides = [1, 1]} : vector<64x128xf32> to vector<8x128xf32>
    %515 = arith.truncf %513 : vector<8x32xf32> to vector<8x32xbf16>
    %cst_103 = arith.constant dense<0.000000e+00> : vector<8x128xf32>
    %516 = tpu.matmul %515, %382, %cst_103 {dimension_numbers = #tpu.dot_dimension_numbers<[1], [0], [0], [1], [0, 0, 1, 1], [], []>} : vector<8x32xbf16>, vector<32x128xbf16>, vector<8x128xf32> -> vector<8x128xf32>
    %517 = vector.extract_strided_slice %514 {offsets = [0, 0], sizes = [8, 64], strides = [1, 1]} : vector<8x128xf32> to vector<8x64xf32>
    %518 = vector.extract_strided_slice %516 {offsets = [0, 0], sizes = [8, 64], strides = [1, 1]} : vector<8x128xf32> to vector<8x64xf32>
    %519 = arith.addf %517, %518 : vector<8x64xf32>
    %520 = arith.negf %519 : vector<8x64xf32>
    %521 = math.exp %520 : vector<8x64xf32>
    %cst_104 = arith.constant 1.000000e+00 : f32
    %522 = vector.broadcast %cst_104 : f32 to vector<8x64xf32>
    %523 = arith.addf %522, %521 : vector<8x64xf32>
    %524 = arith.divf %522, %523 : vector<8x64xf32>
    %525 = vector.extract_strided_slice %524 {offsets = [0, 0], sizes = [8, 32], strides = [1, 1]} : vector<8x64xf32> to vector<8x32xf32>
    %526 = vector.extract_strided_slice %524 {offsets = [0, 32], sizes = [8, 32], strides = [1, 1]} : vector<8x64xf32> to vector<8x32xf32>
    %527 = vector.extract_strided_slice %514 {offsets = [0, 64], sizes = [8, 32], strides = [1, 1]} : vector<8x128xf32> to vector<8x32xf32>
    %528 = vector.extract_strided_slice %516 {offsets = [0, 64], sizes = [8, 32], strides = [1, 1]} : vector<8x128xf32> to vector<8x32xf32>
    %529 = vector.extract_strided_slice %514 {offsets = [0, 96], sizes = [8, 32], strides = [1, 1]} : vector<8x128xf32> to vector<8x32xf32>
    %530 = arith.addf %528, %529 : vector<8x32xf32>
    %531 = arith.mulf %525, %530 : vector<8x32xf32>
    %532 = arith.addf %527, %531 : vector<8x32xf32>
    %533 = math.tanh %532 : vector<8x32xf32>
    %cst_105 = arith.constant 1.000000e+00 : f32
    %534 = vector.broadcast %cst_105 : f32 to vector<8x32xf32>
    %535 = arith.subf %534, %526 : vector<8x32xf32>
    %536 = arith.mulf %535, %533 : vector<8x32xf32>
    %537 = arith.mulf %526, %513 : vector<8x32xf32>
    %538 = arith.addf %536, %537 : vector<8x32xf32>
    %539 = vector.extract_strided_slice %387 {offsets = [48, 0], sizes = [8, 128], strides = [1, 1]} : vector<64x128xf32> to vector<8x128xf32>
    %540 = arith.truncf %538 : vector<8x32xf32> to vector<8x32xbf16>
    %cst_106 = arith.constant dense<0.000000e+00> : vector<8x128xf32>
    %541 = tpu.matmul %540, %382, %cst_106 {dimension_numbers = #tpu.dot_dimension_numbers<[1], [0], [0], [1], [0, 0, 1, 1], [], []>} : vector<8x32xbf16>, vector<32x128xbf16>, vector<8x128xf32> -> vector<8x128xf32>
    %542 = vector.extract_strided_slice %539 {offsets = [0, 0], sizes = [8, 64], strides = [1, 1]} : vector<8x128xf32> to vector<8x64xf32>
    %543 = vector.extract_strided_slice %541 {offsets = [0, 0], sizes = [8, 64], strides = [1, 1]} : vector<8x128xf32> to vector<8x64xf32>
    %544 = arith.addf %542, %543 : vector<8x64xf32>
    %545 = arith.negf %544 : vector<8x64xf32>
    %546 = math.exp %545 : vector<8x64xf32>
    %cst_107 = arith.constant 1.000000e+00 : f32
    %547 = vector.broadcast %cst_107 : f32 to vector<8x64xf32>
    %548 = arith.addf %547, %546 : vector<8x64xf32>
    %549 = arith.divf %547, %548 : vector<8x64xf32>
    %550 = vector.extract_strided_slice %549 {offsets = [0, 0], sizes = [8, 32], strides = [1, 1]} : vector<8x64xf32> to vector<8x32xf32>
    %551 = vector.extract_strided_slice %549 {offsets = [0, 32], sizes = [8, 32], strides = [1, 1]} : vector<8x64xf32> to vector<8x32xf32>
    %552 = vector.extract_strided_slice %539 {offsets = [0, 64], sizes = [8, 32], strides = [1, 1]} : vector<8x128xf32> to vector<8x32xf32>
    %553 = vector.extract_strided_slice %541 {offsets = [0, 64], sizes = [8, 32], strides = [1, 1]} : vector<8x128xf32> to vector<8x32xf32>
    %554 = vector.extract_strided_slice %539 {offsets = [0, 96], sizes = [8, 32], strides = [1, 1]} : vector<8x128xf32> to vector<8x32xf32>
    %555 = arith.addf %553, %554 : vector<8x32xf32>
    %556 = arith.mulf %550, %555 : vector<8x32xf32>
    %557 = arith.addf %552, %556 : vector<8x32xf32>
    %558 = math.tanh %557 : vector<8x32xf32>
    %cst_108 = arith.constant 1.000000e+00 : f32
    %559 = vector.broadcast %cst_108 : f32 to vector<8x32xf32>
    %560 = arith.subf %559, %551 : vector<8x32xf32>
    %561 = arith.mulf %560, %558 : vector<8x32xf32>
    %562 = arith.mulf %551, %538 : vector<8x32xf32>
    %563 = arith.addf %561, %562 : vector<8x32xf32>
    %564 = vector.extract_strided_slice %387 {offsets = [56, 0], sizes = [8, 128], strides = [1, 1]} : vector<64x128xf32> to vector<8x128xf32>
    %565 = arith.truncf %563 : vector<8x32xf32> to vector<8x32xbf16>
    %cst_109 = arith.constant dense<0.000000e+00> : vector<8x128xf32>
    %566 = tpu.matmul %565, %382, %cst_109 {dimension_numbers = #tpu.dot_dimension_numbers<[1], [0], [0], [1], [0, 0, 1, 1], [], []>} : vector<8x32xbf16>, vector<32x128xbf16>, vector<8x128xf32> -> vector<8x128xf32>
    %567 = vector.extract_strided_slice %564 {offsets = [0, 0], sizes = [8, 64], strides = [1, 1]} : vector<8x128xf32> to vector<8x64xf32>
    %568 = vector.extract_strided_slice %566 {offsets = [0, 0], sizes = [8, 64], strides = [1, 1]} : vector<8x128xf32> to vector<8x64xf32>
    %569 = arith.addf %567, %568 : vector<8x64xf32>
    %570 = arith.negf %569 : vector<8x64xf32>
    %571 = math.exp %570 : vector<8x64xf32>
    %cst_110 = arith.constant 1.000000e+00 : f32
    %572 = vector.broadcast %cst_110 : f32 to vector<8x64xf32>
    %573 = arith.addf %572, %571 : vector<8x64xf32>
    %574 = arith.divf %572, %573 : vector<8x64xf32>
    %575 = vector.extract_strided_slice %574 {offsets = [0, 0], sizes = [8, 32], strides = [1, 1]} : vector<8x64xf32> to vector<8x32xf32>
    %576 = vector.extract_strided_slice %574 {offsets = [0, 32], sizes = [8, 32], strides = [1, 1]} : vector<8x64xf32> to vector<8x32xf32>
    %577 = vector.extract_strided_slice %564 {offsets = [0, 64], sizes = [8, 32], strides = [1, 1]} : vector<8x128xf32> to vector<8x32xf32>
    %578 = vector.extract_strided_slice %566 {offsets = [0, 64], sizes = [8, 32], strides = [1, 1]} : vector<8x128xf32> to vector<8x32xf32>
    %579 = vector.extract_strided_slice %564 {offsets = [0, 96], sizes = [8, 32], strides = [1, 1]} : vector<8x128xf32> to vector<8x32xf32>
    %580 = arith.addf %578, %579 : vector<8x32xf32>
    %581 = arith.mulf %575, %580 : vector<8x32xf32>
    %582 = arith.addf %577, %581 : vector<8x32xf32>
    %583 = math.tanh %582 : vector<8x32xf32>
    %cst_111 = arith.constant 1.000000e+00 : f32
    %584 = vector.broadcast %cst_111 : f32 to vector<8x32xf32>
    %585 = arith.subf %584, %576 : vector<8x32xf32>
    %586 = arith.mulf %585, %583 : vector<8x32xf32>
    %587 = arith.mulf %576, %563 : vector<8x32xf32>
    %588 = arith.addf %586, %587 : vector<8x32xf32>
    %589 = tpu.concatenate %413, %438, %463, %488, %513, %538, %563, %588 in 0 : vector<8x32xf32>, vector<8x32xf32>, vector<8x32xf32>, vector<8x32xf32>, vector<8x32xf32>, vector<8x32xf32>, vector<8x32xf32>, vector<8x32xf32> -> vector<64x32xf32>
    %590 = arith.truncf %589 : vector<64x32xf32> to vector<64x32xbf16>
    %c3 = arith.constant 3 : index
    %c0_112 = arith.constant 0 : index
    %c0_113 = arith.constant 0 : index
    %591 = vector.load %arg1[%c3, %c0_112, %c0_113] : memref<4x32x256xbf16, #tpu.memory_space<vmem>>, vector<1x32x256xbf16>
    %592 = vector.shape_cast %591 : vector<1x32x256xbf16> to vector<32x256xbf16>
    %593 = vector.extract_strided_slice %592 {offsets = [0, 0], sizes = [32, 128], strides = [1, 1]} : vector<32x256xbf16> to vector<32x128xbf16>
    %594 = vector.extract_strided_slice %592 {offsets = [0, 128], sizes = [32, 128], strides = [1, 1]} : vector<32x256xbf16> to vector<32x128xbf16>
    %c3_114 = arith.constant 3 : index
    %c0_115 = arith.constant 0 : index
    %c0_116 = arith.constant 0 : index
    %595 = vector.load %arg2[%c3_114, %c0_115, %c0_116] : memref<4x1x128xf32, #tpu.memory_space<vmem>>, vector<1x1x128xf32>
    %596 = vector.shape_cast %595 : vector<1x1x128xf32> to vector<1x128xf32>
    %cst_117 = arith.constant dense<0.000000e+00> : vector<64x128xf32>
    %597 = tpu.matmul %590, %593, %cst_117 {dimension_numbers = #tpu.dot_dimension_numbers<[1], [0], [0], [1], [0, 0, 1, 1], [], []>} : vector<64x32xbf16>, vector<32x128xbf16>, vector<64x128xf32> -> vector<64x128xf32>
    %598 = vector.broadcast %596 : vector<1x128xf32> to vector<64x128xf32>
    %599 = arith.addf %597, %598 : vector<64x128xf32>
    %cst_118 = arith.constant 0.000000e+00 : f32
    %600 = vector.broadcast %cst_118 : f32 to vector<8x32xf32>
    %601 = vector.extract_strided_slice %599 {offsets = [0, 0], sizes = [8, 128], strides = [1, 1]} : vector<64x128xf32> to vector<8x128xf32>
    %602 = arith.truncf %600 : vector<8x32xf32> to vector<8x32xbf16>
    %cst_119 = arith.constant dense<0.000000e+00> : vector<8x128xf32>
    %603 = tpu.matmul %602, %594, %cst_119 {dimension_numbers = #tpu.dot_dimension_numbers<[1], [0], [0], [1], [0, 0, 1, 1], [], []>} : vector<8x32xbf16>, vector<32x128xbf16>, vector<8x128xf32> -> vector<8x128xf32>
    %604 = vector.extract_strided_slice %601 {offsets = [0, 0], sizes = [8, 64], strides = [1, 1]} : vector<8x128xf32> to vector<8x64xf32>
    %605 = vector.extract_strided_slice %603 {offsets = [0, 0], sizes = [8, 64], strides = [1, 1]} : vector<8x128xf32> to vector<8x64xf32>
    %606 = arith.addf %604, %605 : vector<8x64xf32>
    %607 = arith.negf %606 : vector<8x64xf32>
    %608 = math.exp %607 : vector<8x64xf32>
    %cst_120 = arith.constant 1.000000e+00 : f32
    %609 = vector.broadcast %cst_120 : f32 to vector<8x64xf32>
    %610 = arith.addf %609, %608 : vector<8x64xf32>
    %611 = arith.divf %609, %610 : vector<8x64xf32>
    %612 = vector.extract_strided_slice %611 {offsets = [0, 0], sizes = [8, 32], strides = [1, 1]} : vector<8x64xf32> to vector<8x32xf32>
    %613 = vector.extract_strided_slice %611 {offsets = [0, 32], sizes = [8, 32], strides = [1, 1]} : vector<8x64xf32> to vector<8x32xf32>
    %614 = vector.extract_strided_slice %601 {offsets = [0, 64], sizes = [8, 32], strides = [1, 1]} : vector<8x128xf32> to vector<8x32xf32>
    %615 = vector.extract_strided_slice %603 {offsets = [0, 64], sizes = [8, 32], strides = [1, 1]} : vector<8x128xf32> to vector<8x32xf32>
    %616 = vector.extract_strided_slice %601 {offsets = [0, 96], sizes = [8, 32], strides = [1, 1]} : vector<8x128xf32> to vector<8x32xf32>
    %617 = arith.addf %615, %616 : vector<8x32xf32>
    %618 = arith.mulf %612, %617 : vector<8x32xf32>
    %619 = arith.addf %614, %618 : vector<8x32xf32>
    %620 = math.tanh %619 : vector<8x32xf32>
    %cst_121 = arith.constant 1.000000e+00 : f32
    %621 = vector.broadcast %cst_121 : f32 to vector<8x32xf32>
    %622 = arith.subf %621, %613 : vector<8x32xf32>
    %623 = arith.mulf %622, %620 : vector<8x32xf32>
    %624 = arith.mulf %613, %600 : vector<8x32xf32>
    %625 = arith.addf %623, %624 : vector<8x32xf32>
    %626 = vector.extract_strided_slice %599 {offsets = [8, 0], sizes = [8, 128], strides = [1, 1]} : vector<64x128xf32> to vector<8x128xf32>
    %627 = arith.truncf %625 : vector<8x32xf32> to vector<8x32xbf16>
    %cst_122 = arith.constant dense<0.000000e+00> : vector<8x128xf32>
    %628 = tpu.matmul %627, %594, %cst_122 {dimension_numbers = #tpu.dot_dimension_numbers<[1], [0], [0], [1], [0, 0, 1, 1], [], []>} : vector<8x32xbf16>, vector<32x128xbf16>, vector<8x128xf32> -> vector<8x128xf32>
    %629 = vector.extract_strided_slice %626 {offsets = [0, 0], sizes = [8, 64], strides = [1, 1]} : vector<8x128xf32> to vector<8x64xf32>
    %630 = vector.extract_strided_slice %628 {offsets = [0, 0], sizes = [8, 64], strides = [1, 1]} : vector<8x128xf32> to vector<8x64xf32>
    %631 = arith.addf %629, %630 : vector<8x64xf32>
    %632 = arith.negf %631 : vector<8x64xf32>
    %633 = math.exp %632 : vector<8x64xf32>
    %cst_123 = arith.constant 1.000000e+00 : f32
    %634 = vector.broadcast %cst_123 : f32 to vector<8x64xf32>
    %635 = arith.addf %634, %633 : vector<8x64xf32>
    %636 = arith.divf %634, %635 : vector<8x64xf32>
    %637 = vector.extract_strided_slice %636 {offsets = [0, 0], sizes = [8, 32], strides = [1, 1]} : vector<8x64xf32> to vector<8x32xf32>
    %638 = vector.extract_strided_slice %636 {offsets = [0, 32], sizes = [8, 32], strides = [1, 1]} : vector<8x64xf32> to vector<8x32xf32>
    %639 = vector.extract_strided_slice %626 {offsets = [0, 64], sizes = [8, 32], strides = [1, 1]} : vector<8x128xf32> to vector<8x32xf32>
    %640 = vector.extract_strided_slice %628 {offsets = [0, 64], sizes = [8, 32], strides = [1, 1]} : vector<8x128xf32> to vector<8x32xf32>
    %641 = vector.extract_strided_slice %626 {offsets = [0, 96], sizes = [8, 32], strides = [1, 1]} : vector<8x128xf32> to vector<8x32xf32>
    %642 = arith.addf %640, %641 : vector<8x32xf32>
    %643 = arith.mulf %637, %642 : vector<8x32xf32>
    %644 = arith.addf %639, %643 : vector<8x32xf32>
    %645 = math.tanh %644 : vector<8x32xf32>
    %cst_124 = arith.constant 1.000000e+00 : f32
    %646 = vector.broadcast %cst_124 : f32 to vector<8x32xf32>
    %647 = arith.subf %646, %638 : vector<8x32xf32>
    %648 = arith.mulf %647, %645 : vector<8x32xf32>
    %649 = arith.mulf %638, %625 : vector<8x32xf32>
    %650 = arith.addf %648, %649 : vector<8x32xf32>
    %651 = vector.extract_strided_slice %599 {offsets = [16, 0], sizes = [8, 128], strides = [1, 1]} : vector<64x128xf32> to vector<8x128xf32>
    %652 = arith.truncf %650 : vector<8x32xf32> to vector<8x32xbf16>
    %cst_125 = arith.constant dense<0.000000e+00> : vector<8x128xf32>
    %653 = tpu.matmul %652, %594, %cst_125 {dimension_numbers = #tpu.dot_dimension_numbers<[1], [0], [0], [1], [0, 0, 1, 1], [], []>} : vector<8x32xbf16>, vector<32x128xbf16>, vector<8x128xf32> -> vector<8x128xf32>
    %654 = vector.extract_strided_slice %651 {offsets = [0, 0], sizes = [8, 64], strides = [1, 1]} : vector<8x128xf32> to vector<8x64xf32>
    %655 = vector.extract_strided_slice %653 {offsets = [0, 0], sizes = [8, 64], strides = [1, 1]} : vector<8x128xf32> to vector<8x64xf32>
    %656 = arith.addf %654, %655 : vector<8x64xf32>
    %657 = arith.negf %656 : vector<8x64xf32>
    %658 = math.exp %657 : vector<8x64xf32>
    %cst_126 = arith.constant 1.000000e+00 : f32
    %659 = vector.broadcast %cst_126 : f32 to vector<8x64xf32>
    %660 = arith.addf %659, %658 : vector<8x64xf32>
    %661 = arith.divf %659, %660 : vector<8x64xf32>
    %662 = vector.extract_strided_slice %661 {offsets = [0, 0], sizes = [8, 32], strides = [1, 1]} : vector<8x64xf32> to vector<8x32xf32>
    %663 = vector.extract_strided_slice %661 {offsets = [0, 32], sizes = [8, 32], strides = [1, 1]} : vector<8x64xf32> to vector<8x32xf32>
    %664 = vector.extract_strided_slice %651 {offsets = [0, 64], sizes = [8, 32], strides = [1, 1]} : vector<8x128xf32> to vector<8x32xf32>
    %665 = vector.extract_strided_slice %653 {offsets = [0, 64], sizes = [8, 32], strides = [1, 1]} : vector<8x128xf32> to vector<8x32xf32>
    %666 = vector.extract_strided_slice %651 {offsets = [0, 96], sizes = [8, 32], strides = [1, 1]} : vector<8x128xf32> to vector<8x32xf32>
    %667 = arith.addf %665, %666 : vector<8x32xf32>
    %668 = arith.mulf %662, %667 : vector<8x32xf32>
    %669 = arith.addf %664, %668 : vector<8x32xf32>
    %670 = math.tanh %669 : vector<8x32xf32>
    %cst_127 = arith.constant 1.000000e+00 : f32
    %671 = vector.broadcast %cst_127 : f32 to vector<8x32xf32>
    %672 = arith.subf %671, %663 : vector<8x32xf32>
    %673 = arith.mulf %672, %670 : vector<8x32xf32>
    %674 = arith.mulf %663, %650 : vector<8x32xf32>
    %675 = arith.addf %673, %674 : vector<8x32xf32>
    %676 = vector.extract_strided_slice %599 {offsets = [24, 0], sizes = [8, 128], strides = [1, 1]} : vector<64x128xf32> to vector<8x128xf32>
    %677 = arith.truncf %675 : vector<8x32xf32> to vector<8x32xbf16>
    %cst_128 = arith.constant dense<0.000000e+00> : vector<8x128xf32>
    %678 = tpu.matmul %677, %594, %cst_128 {dimension_numbers = #tpu.dot_dimension_numbers<[1], [0], [0], [1], [0, 0, 1, 1], [], []>} : vector<8x32xbf16>, vector<32x128xbf16>, vector<8x128xf32> -> vector<8x128xf32>
    %679 = vector.extract_strided_slice %676 {offsets = [0, 0], sizes = [8, 64], strides = [1, 1]} : vector<8x128xf32> to vector<8x64xf32>
    %680 = vector.extract_strided_slice %678 {offsets = [0, 0], sizes = [8, 64], strides = [1, 1]} : vector<8x128xf32> to vector<8x64xf32>
    %681 = arith.addf %679, %680 : vector<8x64xf32>
    %682 = arith.negf %681 : vector<8x64xf32>
    %683 = math.exp %682 : vector<8x64xf32>
    %cst_129 = arith.constant 1.000000e+00 : f32
    %684 = vector.broadcast %cst_129 : f32 to vector<8x64xf32>
    %685 = arith.addf %684, %683 : vector<8x64xf32>
    %686 = arith.divf %684, %685 : vector<8x64xf32>
    %687 = vector.extract_strided_slice %686 {offsets = [0, 0], sizes = [8, 32], strides = [1, 1]} : vector<8x64xf32> to vector<8x32xf32>
    %688 = vector.extract_strided_slice %686 {offsets = [0, 32], sizes = [8, 32], strides = [1, 1]} : vector<8x64xf32> to vector<8x32xf32>
    %689 = vector.extract_strided_slice %676 {offsets = [0, 64], sizes = [8, 32], strides = [1, 1]} : vector<8x128xf32> to vector<8x32xf32>
    %690 = vector.extract_strided_slice %678 {offsets = [0, 64], sizes = [8, 32], strides = [1, 1]} : vector<8x128xf32> to vector<8x32xf32>
    %691 = vector.extract_strided_slice %676 {offsets = [0, 96], sizes = [8, 32], strides = [1, 1]} : vector<8x128xf32> to vector<8x32xf32>
    %692 = arith.addf %690, %691 : vector<8x32xf32>
    %693 = arith.mulf %687, %692 : vector<8x32xf32>
    %694 = arith.addf %689, %693 : vector<8x32xf32>
    %695 = math.tanh %694 : vector<8x32xf32>
    %cst_130 = arith.constant 1.000000e+00 : f32
    %696 = vector.broadcast %cst_130 : f32 to vector<8x32xf32>
    %697 = arith.subf %696, %688 : vector<8x32xf32>
    %698 = arith.mulf %697, %695 : vector<8x32xf32>
    %699 = arith.mulf %688, %675 : vector<8x32xf32>
    %700 = arith.addf %698, %699 : vector<8x32xf32>
    %701 = vector.extract_strided_slice %599 {offsets = [32, 0], sizes = [8, 128], strides = [1, 1]} : vector<64x128xf32> to vector<8x128xf32>
    %702 = arith.truncf %700 : vector<8x32xf32> to vector<8x32xbf16>
    %cst_131 = arith.constant dense<0.000000e+00> : vector<8x128xf32>
    %703 = tpu.matmul %702, %594, %cst_131 {dimension_numbers = #tpu.dot_dimension_numbers<[1], [0], [0], [1], [0, 0, 1, 1], [], []>} : vector<8x32xbf16>, vector<32x128xbf16>, vector<8x128xf32> -> vector<8x128xf32>
    %704 = vector.extract_strided_slice %701 {offsets = [0, 0], sizes = [8, 64], strides = [1, 1]} : vector<8x128xf32> to vector<8x64xf32>
    %705 = vector.extract_strided_slice %703 {offsets = [0, 0], sizes = [8, 64], strides = [1, 1]} : vector<8x128xf32> to vector<8x64xf32>
    %706 = arith.addf %704, %705 : vector<8x64xf32>
    %707 = arith.negf %706 : vector<8x64xf32>
    %708 = math.exp %707 : vector<8x64xf32>
    %cst_132 = arith.constant 1.000000e+00 : f32
    %709 = vector.broadcast %cst_132 : f32 to vector<8x64xf32>
    %710 = arith.addf %709, %708 : vector<8x64xf32>
    %711 = arith.divf %709, %710 : vector<8x64xf32>
    %712 = vector.extract_strided_slice %711 {offsets = [0, 0], sizes = [8, 32], strides = [1, 1]} : vector<8x64xf32> to vector<8x32xf32>
    %713 = vector.extract_strided_slice %711 {offsets = [0, 32], sizes = [8, 32], strides = [1, 1]} : vector<8x64xf32> to vector<8x32xf32>
    %714 = vector.extract_strided_slice %701 {offsets = [0, 64], sizes = [8, 32], strides = [1, 1]} : vector<8x128xf32> to vector<8x32xf32>
    %715 = vector.extract_strided_slice %703 {offsets = [0, 64], sizes = [8, 32], strides = [1, 1]} : vector<8x128xf32> to vector<8x32xf32>
    %716 = vector.extract_strided_slice %701 {offsets = [0, 96], sizes = [8, 32], strides = [1, 1]} : vector<8x128xf32> to vector<8x32xf32>
    %717 = arith.addf %715, %716 : vector<8x32xf32>
    %718 = arith.mulf %712, %717 : vector<8x32xf32>
    %719 = arith.addf %714, %718 : vector<8x32xf32>
    %720 = math.tanh %719 : vector<8x32xf32>
    %cst_133 = arith.constant 1.000000e+00 : f32
    %721 = vector.broadcast %cst_133 : f32 to vector<8x32xf32>
    %722 = arith.subf %721, %713 : vector<8x32xf32>
    %723 = arith.mulf %722, %720 : vector<8x32xf32>
    %724 = arith.mulf %713, %700 : vector<8x32xf32>
    %725 = arith.addf %723, %724 : vector<8x32xf32>
    %726 = vector.extract_strided_slice %599 {offsets = [40, 0], sizes = [8, 128], strides = [1, 1]} : vector<64x128xf32> to vector<8x128xf32>
    %727 = arith.truncf %725 : vector<8x32xf32> to vector<8x32xbf16>
    %cst_134 = arith.constant dense<0.000000e+00> : vector<8x128xf32>
    %728 = tpu.matmul %727, %594, %cst_134 {dimension_numbers = #tpu.dot_dimension_numbers<[1], [0], [0], [1], [0, 0, 1, 1], [], []>} : vector<8x32xbf16>, vector<32x128xbf16>, vector<8x128xf32> -> vector<8x128xf32>
    %729 = vector.extract_strided_slice %726 {offsets = [0, 0], sizes = [8, 64], strides = [1, 1]} : vector<8x128xf32> to vector<8x64xf32>
    %730 = vector.extract_strided_slice %728 {offsets = [0, 0], sizes = [8, 64], strides = [1, 1]} : vector<8x128xf32> to vector<8x64xf32>
    %731 = arith.addf %729, %730 : vector<8x64xf32>
    %732 = arith.negf %731 : vector<8x64xf32>
    %733 = math.exp %732 : vector<8x64xf32>
    %cst_135 = arith.constant 1.000000e+00 : f32
    %734 = vector.broadcast %cst_135 : f32 to vector<8x64xf32>
    %735 = arith.addf %734, %733 : vector<8x64xf32>
    %736 = arith.divf %734, %735 : vector<8x64xf32>
    %737 = vector.extract_strided_slice %736 {offsets = [0, 0], sizes = [8, 32], strides = [1, 1]} : vector<8x64xf32> to vector<8x32xf32>
    %738 = vector.extract_strided_slice %736 {offsets = [0, 32], sizes = [8, 32], strides = [1, 1]} : vector<8x64xf32> to vector<8x32xf32>
    %739 = vector.extract_strided_slice %726 {offsets = [0, 64], sizes = [8, 32], strides = [1, 1]} : vector<8x128xf32> to vector<8x32xf32>
    %740 = vector.extract_strided_slice %728 {offsets = [0, 64], sizes = [8, 32], strides = [1, 1]} : vector<8x128xf32> to vector<8x32xf32>
    %741 = vector.extract_strided_slice %726 {offsets = [0, 96], sizes = [8, 32], strides = [1, 1]} : vector<8x128xf32> to vector<8x32xf32>
    %742 = arith.addf %740, %741 : vector<8x32xf32>
    %743 = arith.mulf %737, %742 : vector<8x32xf32>
    %744 = arith.addf %739, %743 : vector<8x32xf32>
    %745 = math.tanh %744 : vector<8x32xf32>
    %cst_136 = arith.constant 1.000000e+00 : f32
    %746 = vector.broadcast %cst_136 : f32 to vector<8x32xf32>
    %747 = arith.subf %746, %738 : vector<8x32xf32>
    %748 = arith.mulf %747, %745 : vector<8x32xf32>
    %749 = arith.mulf %738, %725 : vector<8x32xf32>
    %750 = arith.addf %748, %749 : vector<8x32xf32>
    %751 = vector.extract_strided_slice %599 {offsets = [48, 0], sizes = [8, 128], strides = [1, 1]} : vector<64x128xf32> to vector<8x128xf32>
    %752 = arith.truncf %750 : vector<8x32xf32> to vector<8x32xbf16>
    %cst_137 = arith.constant dense<0.000000e+00> : vector<8x128xf32>
    %753 = tpu.matmul %752, %594, %cst_137 {dimension_numbers = #tpu.dot_dimension_numbers<[1], [0], [0], [1], [0, 0, 1, 1], [], []>} : vector<8x32xbf16>, vector<32x128xbf16>, vector<8x128xf32> -> vector<8x128xf32>
    %754 = vector.extract_strided_slice %751 {offsets = [0, 0], sizes = [8, 64], strides = [1, 1]} : vector<8x128xf32> to vector<8x64xf32>
    %755 = vector.extract_strided_slice %753 {offsets = [0, 0], sizes = [8, 64], strides = [1, 1]} : vector<8x128xf32> to vector<8x64xf32>
    %756 = arith.addf %754, %755 : vector<8x64xf32>
    %757 = arith.negf %756 : vector<8x64xf32>
    %758 = math.exp %757 : vector<8x64xf32>
    %cst_138 = arith.constant 1.000000e+00 : f32
    %759 = vector.broadcast %cst_138 : f32 to vector<8x64xf32>
    %760 = arith.addf %759, %758 : vector<8x64xf32>
    %761 = arith.divf %759, %760 : vector<8x64xf32>
    %762 = vector.extract_strided_slice %761 {offsets = [0, 0], sizes = [8, 32], strides = [1, 1]} : vector<8x64xf32> to vector<8x32xf32>
    %763 = vector.extract_strided_slice %761 {offsets = [0, 32], sizes = [8, 32], strides = [1, 1]} : vector<8x64xf32> to vector<8x32xf32>
    %764 = vector.extract_strided_slice %751 {offsets = [0, 64], sizes = [8, 32], strides = [1, 1]} : vector<8x128xf32> to vector<8x32xf32>
    %765 = vector.extract_strided_slice %753 {offsets = [0, 64], sizes = [8, 32], strides = [1, 1]} : vector<8x128xf32> to vector<8x32xf32>
    %766 = vector.extract_strided_slice %751 {offsets = [0, 96], sizes = [8, 32], strides = [1, 1]} : vector<8x128xf32> to vector<8x32xf32>
    %767 = arith.addf %765, %766 : vector<8x32xf32>
    %768 = arith.mulf %762, %767 : vector<8x32xf32>
    %769 = arith.addf %764, %768 : vector<8x32xf32>
    %770 = math.tanh %769 : vector<8x32xf32>
    %cst_139 = arith.constant 1.000000e+00 : f32
    %771 = vector.broadcast %cst_139 : f32 to vector<8x32xf32>
    %772 = arith.subf %771, %763 : vector<8x32xf32>
    %773 = arith.mulf %772, %770 : vector<8x32xf32>
    %774 = arith.mulf %763, %750 : vector<8x32xf32>
    %775 = arith.addf %773, %774 : vector<8x32xf32>
    %776 = vector.extract_strided_slice %599 {offsets = [56, 0], sizes = [8, 128], strides = [1, 1]} : vector<64x128xf32> to vector<8x128xf32>
    %777 = arith.truncf %775 : vector<8x32xf32> to vector<8x32xbf16>
    %cst_140 = arith.constant dense<0.000000e+00> : vector<8x128xf32>
    %778 = tpu.matmul %777, %594, %cst_140 {dimension_numbers = #tpu.dot_dimension_numbers<[1], [0], [0], [1], [0, 0, 1, 1], [], []>} : vector<8x32xbf16>, vector<32x128xbf16>, vector<8x128xf32> -> vector<8x128xf32>
    %779 = vector.extract_strided_slice %776 {offsets = [0, 0], sizes = [8, 64], strides = [1, 1]} : vector<8x128xf32> to vector<8x64xf32>
    %780 = vector.extract_strided_slice %778 {offsets = [0, 0], sizes = [8, 64], strides = [1, 1]} : vector<8x128xf32> to vector<8x64xf32>
    %781 = arith.addf %779, %780 : vector<8x64xf32>
    %782 = arith.negf %781 : vector<8x64xf32>
    %783 = math.exp %782 : vector<8x64xf32>
    %cst_141 = arith.constant 1.000000e+00 : f32
    %784 = vector.broadcast %cst_141 : f32 to vector<8x64xf32>
    %785 = arith.addf %784, %783 : vector<8x64xf32>
    %786 = arith.divf %784, %785 : vector<8x64xf32>
    %787 = vector.extract_strided_slice %786 {offsets = [0, 0], sizes = [8, 32], strides = [1, 1]} : vector<8x64xf32> to vector<8x32xf32>
    %788 = vector.extract_strided_slice %786 {offsets = [0, 32], sizes = [8, 32], strides = [1, 1]} : vector<8x64xf32> to vector<8x32xf32>
    %789 = vector.extract_strided_slice %776 {offsets = [0, 64], sizes = [8, 32], strides = [1, 1]} : vector<8x128xf32> to vector<8x32xf32>
    %790 = vector.extract_strided_slice %778 {offsets = [0, 64], sizes = [8, 32], strides = [1, 1]} : vector<8x128xf32> to vector<8x32xf32>
    %791 = vector.extract_strided_slice %776 {offsets = [0, 96], sizes = [8, 32], strides = [1, 1]} : vector<8x128xf32> to vector<8x32xf32>
    %792 = arith.addf %790, %791 : vector<8x32xf32>
    %793 = arith.mulf %787, %792 : vector<8x32xf32>
    %794 = arith.addf %789, %793 : vector<8x32xf32>
    %795 = math.tanh %794 : vector<8x32xf32>
    %cst_142 = arith.constant 1.000000e+00 : f32
    %796 = vector.broadcast %cst_142 : f32 to vector<8x32xf32>
    %797 = arith.subf %796, %788 : vector<8x32xf32>
    %798 = arith.mulf %797, %795 : vector<8x32xf32>
    %799 = arith.mulf %788, %775 : vector<8x32xf32>
    %800 = arith.addf %798, %799 : vector<8x32xf32>
    %c0_143 = arith.constant 0 : index
    %c0_144 = arith.constant 0 : index
    %801 = vector.load %arg3[%c0_143, %c0_144] : memref<33x128xbf16, #tpu.memory_space<vmem>>, vector<33x128xbf16>
    %802 = vector.extract_strided_slice %801 {offsets = [0, 0], sizes = [32, 128], strides = [1, 1]} : vector<33x128xbf16> to vector<32x128xbf16>
    %803 = vector.extract_strided_slice %801 {offsets = [32, 0], sizes = [1, 128], strides = [1, 1]} : vector<33x128xbf16> to vector<1x128xbf16>
    %804 = arith.extf %803 : vector<1x128xbf16> to vector<1x128xf32>
    %805 = arith.truncf %800 : vector<8x32xf32> to vector<8x32xbf16>
    %cst_145 = arith.constant dense<0.000000e+00> : vector<8x128xf32>
    %806 = tpu.matmul %805, %802, %cst_145 {dimension_numbers = #tpu.dot_dimension_numbers<[1], [0], [0], [1], [0, 0, 1, 1], [], []>} : vector<8x32xbf16>, vector<32x128xbf16>, vector<8x128xf32> -> vector<8x128xf32>
    %807 = vector.broadcast %804 : vector<1x128xf32> to vector<8x128xf32>
    %808 = arith.addf %806, %807 : vector<8x128xf32>
    %cst_146 = arith.constant 0.000000e+00 : f32
    %809 = vector.broadcast %cst_146 : f32 to vector<8x128xf32>
    %810 = arith.maximumf %808, %809 : vector<8x128xf32>
    %c0_147 = arith.constant 0 : index
    %c0_148 = arith.constant 0 : index
    %811 = vector.load %arg4[%c0_147, %c0_148] : memref<8x128xf32, #tpu.memory_space<vmem>>, vector<8x128xf32>
    tpu.vector_store %arg4[%c0_147, %c0_148], %810 {strides = array<i32>} : memref<8x128xf32, #tpu.memory_space<vmem>>, vector<8x128xf32>,
    return
  }
}

</mosaic_0001>

<bundles_post_ra>
// kernel: tpu_custom_call.1
= control target key start
LH: loop header
LB: loop body
LE: loop exit
PB: predicated region body
PF: predicated region fallthrough
CT: control target
= control target key end

     0   :  { %9 = vsyncpa [#allocation3], 0  ;;  %s4589_s0 = inlined_call_operand.vmem [shape: bf16[64,32], index: 0, kind: input, shape index: {}]   ;;  %s4590_s1 = inlined_call_operand.hbm [shape: bf16[4,32,256], index: 1, kind: input, shape index: {}]   ;;  %s4591_s2 = inlined_call_operand.vmem [shape: f32[4,1,128], index: 2, kind: input, shape index: {}]   ;;  %s4592_s3 = inlined_call_operand.vmem [shape: bf16[33,128], index: 3, kind: input, shape index: {}]   ;;  %s4593_s4 = inlined_call_operand.hbm [shape: f32[8,128], index: 4, kind: output, shape index: {}]  }
   0x1   :  { %10 = vsyncpa [#allocation4], 0  ;;  %s3846_s15 = smov [#allocation2]   ;;  %s3798_s19 = scalar_lea.hbm %s4590_s1, 2048 }
   0x2   :  { %s18_s16 = sshll.u32 %s3846_s15, 4  ;;  %p3799_p0 = scmp.ne.s32.totalorder %s4590_s1, %s3798_s19  ;;  %s19_s16 = int_to_ptr.vmem [resolvable:$true] %s18_s16 }
   0x3   :  { %p3802_p1 = scmp.lt.u32.totalorder %s3798_s19, %s4590_s1 }
   0x5   :  { %p3804_p2 = pnand %p3802_p1, %p3799_p0 }
   0x7   :  { %3807 = shalt.err (!%p3804_p2)
}
   0x8   :  { %s3808_s24 = scalar_lea.vmem %s19_s16, 2048  ;;  %p3813_p4 = scmp.lt.s32.totalorder %s19_s16, %s19_s16 }
   0x9   :  { %p3809_p3 = scmp.ne.s32.totalorder %s19_s16, %s3808_s24  ;;  %p3814_p5 = scmp.lt.s32.totalorder %s3808_s24, %s3808_s24 }
   0xb   :  { %p3815_p6 = por %p3814_p5, %p3813_p4 }
   0xd   :  { %p3816_p7 = pnand %p3815_p6, %p3809_p3 }
   0xf   :  { %3819 = shalt.err (!%p3816_p7)
}
  0x10   :  { %s3847_s25 = smov 128   ;;  %s3848_s26 = smov 8  }
  0x11   :  { %24 = dma.hbm_to_vmem [thread:$0]  %s4590_s1, 2048, %s19_s16, [#allocation3], %s3847_s25, %s3847_s25, %s3848_s26  }
  0x12   :  { %3842 = dma.done.wait [#allocation3], 2048  }
  0x13   :  { %3843 = vsyncadd [#allocation3], 4294965248  ;;  %v3849_v0 = vmov 0.0   ;;  %vm3850_vm0 = vmmov 0   ;;  %v3576_v1 = vld [vmem:[#allocation2] ss:$8 sps:$4 sm:$0xff]  }
  0x14   :  { %3266 = vmatprep.subr.bf16.mxu1 %v3849_v0  ;;  %3270 = vmatprep.mubr.msk.bf16.mxu1 %vm3850_vm0, %v3849_v0  ;;  %v3896_v2 = vld [vmem:[#allocation2 + $0x4] ss:$8 sps:$4 sm:$0xff]   ;;  %vm84_vm1 = vcmask 261120   ;;  %v3579_v3 = vld [vmem:[#allocation2 + $0x10] ss:$8 sps:$4 sm:$0xff]   ;;  %v3851_v7 = vmov 0  }
  0x15   :  { %3254 = vmatprep.subr.bf16.mxu0 %v3576_v1  ;;  %v3898_v4 = vld [vmem:[#allocation2 + $0x14] ss:$8 sps:$4 sm:$0xff]   ;;  %3267 = vmatpush3.bf16.msra.mxu1 %v3896_v2  ;;  %v3582_v5 = vld [vmem:[%s4589_s0] sm:$0xff]   ;;  %s3852_s8 = smov 64   ;;  %s3853_s9 = smov 32   ;;  %v3585_v53 = vld [vmem:[%s4589_s0 + $0x18] sm:$0xff]  }
  0x16   :  { %3255 = vmatpush3.bf16.msra.mxu0 %v3576_v1  ;;  %3268 = vmatprep.subr.bf16.mxu1 %v3849_v0  ;;  %v3583_v6 = vld [vmem:[%s4589_s0 + $0x8] sm:$0xff]   ;;  %v3927_v8 = vld [vmem:[%s4591_s2] ss:$0 sm:$0xff]  ;;  %v3584_v52 = vld [vmem:[%s4589_s0 + $0x10] sm:$0xff]   ;;  %s3854_s17 = smov 96   ;;  %s3855_s25 = smov [#allocation5]  }
  0x17   :  { %3256 = vmatprep.subr.bf16.mxu0 %v3579_v3  ;;  %3258 = vmatprep.mubr.msk.bf16.mxu0 %vm84_vm1, %v3582_v5  ;;  %s3000_s26 = sshll.u32 %s3855_s25, 4  ;;  %s3001_s26 = int_to_ptr.vmem [resolvable:$true] %s3000_s26 }
  0x18   :  { %s3820_s27 = scalar_lea.vmem %s3001_s26, 128  ;;  %p3825_p9 = scmp.lt.s32.totalorder %s3001_s26, %s3001_s26 }
  0x19   :  { %3269 = vmatpush3.bf16.msra.mxu1 %v3898_v4  ;;  %p3821_p8 = scmp.ne.s32.totalorder %s3001_s26, %s3820_s27  ;;  %p3826_p10 = scmp.lt.s32.totalorder %s3820_s27, %s3820_s27 }
  0x1a   :  { %3257 = vmatpush3.bf16.msra.mxu0 %v3579_v3  ;;  %3274 = vmatprep.subr.bf16.mxu1 %v3849_v0 }
  0x1b   :  { %3282 = vmatprep.subr.bf16.mxu0 %v3849_v0  ;;  %p3827_p11 = por %p3826_p10, %p3825_p9 }
  0x1c   :  { %3271 = vmatmul.mubr.bf16.vlgmr.msra.gmra.mrb[0].mxu1 %v3851_v7 }
  0x1d   :  { %3259 = vmatmul.mubr.msk.bf16.vlgmr.msra.gmra.mrb[0].mxu0 %vm84_vm1, %v3583_v6  ;;  %3275 = vmatpush3.bf16.msra.mxu1 %v3896_v2  ;;  %p3828_p12 = pnand %p3827_p11, %p3821_p8 }
  0x1e   :  { %3278 = vmatprep.mubr.msk.bf16.mxu1 %vm3850_vm0, %v3849_v0  ;;  %3276 = vmatprep.subr.bf16.mxu1 %v3849_v0 }
  0x1f   :  { %3283 = vmatpush3.bf16.msra.mxu0 %v3896_v2  ;;  %3262 = vmatprep.mubr.msk.bf16.mxu0 %vm84_vm1, %v3584_v52 }
  0x20   :  { %3284 = vmatprep.subr.bf16.mxu0 %v3849_v0 }
  0x21   :  { %3277 = vmatpush3.bf16.msra.mxu1 %v3898_v4 }
  0x22   :  { %3290 = vmatprep.subr.bf16.mxu1 %v3849_v0 }
  0x23   :  { %3285 = vmatpush3.bf16.msra.mxu0 %v3898_v4 }
  0x24   :  { %3298 = vmatprep.subr.bf16.mxu0 %v3849_v0 }
  0x25   :  { %3263 = vmatmul.mubr.msk.bf16.gmra.mrb[4].mxu0 %vm84_vm1, %v3585_v53 }
  0x26   :  { %3286 = vmatprep.mubr.msk.bf16.mxu0 %vm3850_vm0, %v3849_v0 }
  0xef   :  { %v207_v10 = vpop.f32.mrb[0].mxu1 }
  0xf0   :  { %v3929_v9 = vpop.f32.mrb[0].mxu0  ;;  %v3272_v12 = vpop.f32.mrb[1].mxu1 }
  0xf1   :  { %v131_v11 = vpop.f32.mrb[1].mxu0  ;;  %v210_v15 = vpop.f32.mrb[2].mxu1  ;;  %v140_v63 = vadd.f32 %v3929_v9, %v3927_v8 }
  0xf2   :  { %v132_v13 = vadd.f32 %v3927_v8, %v131_v11  ;;  %v3932_v14 = vpop.f32.mrb[2].mxu0  ;;  %v3273_v17 = vpop.f32.mrb[3].mxu1 }
  0xf3   :  { %v134_v16 = vpop.f32.mrb[3].mxu0 }
  0xf4   :  { %v208_v18 = vadd.f32 %v207_v10, %v132_v13  ;;  %v135_v35 = vadd.f32 %v3927_v8, %v134_v16 }
  0xf6   :  { %v3022_v19 = vmul.f32 -1.442695, %v208_v18 }
  0xf8   :  { %3606 = vpow2.f32 %v3022_v19  ;;  %v3968_v58 = vpop.f32.mrb[4].mxu0 }
  0xf9   :  { %v3970_v59 = vpop.f32.mrb[5].mxu0 }
  0xfa   :  { %v3972_v60 = vpop.f32.mrb[6].mxu0 }
  0xfb   :  { %v3974_v61 = vpop.f32.mrb[7].mxu0 }
 0x102   :  { %v3607_v20 = vpop.eup %3606 }
 0x103   :  { %v216_v21 = vadd.f32 1.0, %v3607_v20 }
 0x105   :  { %3608 = vrcp.f32 %v216_v21 }
 0x10f   :  { %v3609_v22 = vpop.eup %3608 }
 0x110   :  { %v219_v23 = vmul.f32 2.0, %v3609_v22  ;;  %v221_v27 = vmul.f32 0.0, %v3609_v22 }
 0x112   :  { %v3023_v24 = vadd.f32 -1.0, %v219_v23 }
 0x114   :  { %223 = vrot.lane.b32.xlu0 %v3023_v24, %s3852_s8 }
 0x186   :  { %v224_v25 = vpop.permute.xlu0 %223 }
 0x187   :  { %v226_v26 = vmul.f32 %v3609_v22, %v224_v25 }
 0x189   :  { %228 = vrot.lane.b32.xlu0 %v226_v26, %s3853_s9 }
 0x1fb   :  { %v229_v28 = vpop.permute.xlu0 %228 }
 0x1fc   :  { %v231_v29 = vadd.f32 %v229_v28, %v221_v27  ;;  %v143_v27 = vadd.f32 %v3932_v14, %v3927_v8 }
 0x1fe   :  { %3610 = vtanh.f32 %v231_v29 }
 0x208   :  { %v3611_v30 = vpop.eup %3610 }
 0x209   :  { %234 = vrot.lane.b32.xlu1 %v3611_v30, %s3852_s8 }
 0x27b   :  { %v235_v31 = vpop.permute.xlu1 %234 }
 0x27c   :  { %v3937_v32 = vmul.f32 %v3609_v22, %v235_v31 }
 0x27e   :  { %v238_v33 = vpack.c.bf16 %v3937_v32, %v3937_v32 }
 0x280   :  { %240 = vrot.lane.b32.xlu1 %v238_v33, %s3853_s9 }
 0x2f2   :  { %v241_v34 = vpop.permute.xlu1 %240 }
 0x2f3   :  { %3279 = vmatmul.mubr.msk.bf16.vlgmr.msra.gmra.mrb[4].mxu1 %vm84_vm1, %v241_v34 }
 0x2f4   :  { %3291 = vmatpush3.bf16.msra.mxu1 %v3896_v2  ;;  %3294 = vmatprep.mubr.msk.bf16.mxu1 %vm3850_vm0, %v3849_v0 }
 0x2f5   :  { %3292 = vmatprep.subr.bf16.mxu1 %v3849_v0 }
 0x2f8   :  { %3293 = vmatpush3.bf16.msra.mxu1 %v3898_v4 }
 0x2f9   :  { %3306 = vmatprep.subr.bf16.mxu1 %v3849_v0 }
 0x3c6   :  { %v279_v36 = vpop.f32.mrb[4].mxu1 }
 0x3c7   :  { %v280_v37 = vadd.f32 %v279_v36, %v135_v35  ;;  %v3280_v38 = vpop.f32.mrb[5].mxu1 }
 0x3c8   :  { %v282_v39 = vpop.f32.mrb[6].mxu1 }
 0x3c9   :  { %v3025_v40 = vmul.f32 -1.442695, %v280_v37  ;;  %v3281_v41 = vpop.f32.mrb[7].mxu1 }
 0x3cb   :  { %3612 = vpow2.f32 %v3025_v40 }
 0x3d5   :  { %v3613_v42 = vpop.eup %3612 }
 0x3d6   :  { %v288_v43 = vadd.f32 1.0, %v3613_v42 }
 0x3d8   :  { %3614 = vrcp.f32 %v288_v43 }
 0x3e2   :  { %v3615_v44 = vpop.eup %3614 }
 0x3e3   :  { %v291_v45 = vmul.f32 2.0, %v3615_v44  ;;  %v293_v49 = vmul.f32 %v3615_v44, %v231_v29 }
 0x3e5   :  { %v3026_v46 = vadd.f32 -1.0, %v291_v45 }
 0x3e7   :  { %295 = vrot.lane.b32.xlu0 %v3026_v46, %s3852_s8 }
 0x459   :  { %v296_v47 = vpop.permute.xlu0 %295 }
 0x45a   :  { %v298_v48 = vmul.f32 %v3615_v44, %v296_v47 }
 0x45c   :  { %300 = vrot.lane.b32.xlu1 %v298_v48, %s3853_s9 }
 0x4ce   :  { %v301_v50 = vpop.permute.xlu1 %300 }
 0x4cf   :  { %v303_v51 = vadd.f32 %v301_v50, %v293_v49  ;;  %v148_v49 = vadd.f32 %v3927_v8, %v3970_v59 }
 0x4d1   :  { %3616 = vtanh.f32 %v303_v51 }
 0x4db   :  { %v3617_v54 = vpop.eup %3616 }
 0x4dc   :  { %306 = vrot.lane.b32.xlu0 %v3617_v54, %s3852_s8 }
 0x54e   :  { %v307_v55 = vpop.permute.xlu0 %306 }
 0x54f   :  { %v3963_v56 = vmul.f32 %v3615_v44, %v307_v55 }
 0x551   :  { %v310_v57 = vpack.c.bf16 %v3963_v56, %v3963_v56 }
 0x553   :  { %312 = vrot.lane.b32.xlu1 %v310_v57, %s3853_s9 }
 0x5c5   :  { %v313_v62 = vpop.permute.xlu1 %312 }
 0x5c6   :  { %3287 = vmatmul.mubr.msk.bf16.vlgmr.msra.gmra.mrb[8].mxu0 %vm84_vm1, %v313_v62 }
 0x5c7   :  { %3299 = vmatpush3.bf16.msra.mxu0 %v3896_v2  ;;  %3302 = vmatprep.mubr.msk.bf16.mxu0 %vm3850_vm0, %v3849_v0 }
 0x5c8   :  { %3300 = vmatprep.subr.bf16.mxu0 %v3849_v0 }
 0x5cb   :  { %3301 = vmatpush3.bf16.msra.mxu0 %v3898_v4 }
 0x5cc   :  { %3314 = vmatprep.subr.bf16.mxu0 %v3849_v0 }
 0x699   :  { %v351_v1 = vpop.f32.mrb[8].mxu0 }
 0x69a   :  { %v352_v3 = vadd.f32 %v351_v1, %v140_v63  ;;  %v3288_v5 = vpop.f32.mrb[9].mxu0 }
 0x69b   :  { %v354_v6 = vpop.f32.mrb[10].mxu0 }
 0x69c   :  { %v3028_v10 = vmul.f32 -1.442695, %v352_v3  ;;  %v3289_v11 = vpop.f32.mrb[11].mxu0 }
 0x69e   :  { %3618 = vpow2.f32 %v3028_v10 }
 0x6a8   :  { %v3619_v12 = vpop.eup %3618 }
 0x6a9   :  { %v360_v13 = vadd.f32 1.0, %v3619_v12 }
 0x6ab   :  { %3620 = vrcp.f32 %v360_v13 }
 0x6b5   :  { %v3621_v15 = vpop.eup %3620 }
 0x6b6   :  { %v363_v16 = vmul.f32 2.0, %v3621_v15  ;;  %v365_v9 = vmul.f32 %v3621_v15, %v303_v51 }
 0x6b8   :  { %v3029_v17 = vadd.f32 -1.0, %v363_v16 }
 0x6ba   :  { %367 = vrot.lane.b32.xlu0 %v3029_v17, %s3852_s8 }
 0x72c   :  { %v368_v18 = vpop.permute.xlu0 %367 }
 0x72d   :  { %v370_v19 = vmul.f32 %v3621_v15, %v368_v18  ;;  %v151_v18 = vadd.f32 %v3927_v8, %v3974_v61 }
 0x72f   :  { %372 = vrot.lane.b32.xlu1 %v370_v19, %s3853_s9 }
 0x7a1   :  { %v373_v20 = vpop.permute.xlu1 %372 }
 0x7a2   :  { %v375_v21 = vadd.f32 %v373_v20, %v365_v9 }
 0x7a4   :  { %3622 = vtanh.f32 %v375_v21 }
 0x7ae   :  { %v3623_v22 = vpop.eup %3622 }
 0x7af   :  { %378 = vrot.lane.b32.xlu0 %v3623_v22, %s3852_s8 }
 0x821   :  { %v379_v23 = vpop.permute.xlu0 %378 }
 0x822   :  { %v3988_v24 = vmul.f32 %v3621_v15, %v379_v23 }
 0x824   :  { %v382_v25 = vpack.c.bf16 %v3988_v24, %v3988_v24 }
 0x826   :  { %384 = vrot.lane.b32.xlu1 %v382_v25, %s3853_s9 }
 0x898   :  { %v385_v26 = vpop.permute.xlu1 %384 }
 0x899   :  { %3295 = vmatmul.mubr.msk.bf16.vlgmr.msra.gmra.mrb[8].mxu1 %vm84_vm1, %v385_v26 }
 0x89a   :  { %3307 = vmatpush3.bf16.msra.mxu1 %v3896_v2  ;;  %3310 = vmatprep.mubr.msk.bf16.mxu1 %vm3850_vm0, %v3849_v0 }
 0x89b   :  { %3308 = vmatprep.subr.bf16.mxu1 %v3849_v0 }
 0x89e   :  { %3309 = vmatpush3.bf16.msra.mxu1 %v3898_v4 }
 0x89f   :  { %3322 = vmatprep.subr.bf16.mxu1 %v3849_v0 }
 0x96c   :  { %v423_v28 = vpop.f32.mrb[8].mxu1 }
 0x96d   :  { %v424_v29 = vadd.f32 %v423_v28, %v143_v27  ;;  %v3296_v30 = vpop.f32.mrb[9].mxu1 }
 0x96e   :  { %v426_v31 = vpop.f32.mrb[10].mxu1 }
 0x96f   :  { %v3031_v33 = vmul.f32 -1.442695, %v424_v29  ;;  %v3297_v34 = vpop.f32.mrb[11].mxu1 }
 0x971   :  { %3624 = vpow2.f32 %v3031_v33 }
 0x97b   :  { %v3625_v35 = vpop.eup %3624 }
 0x97c   :  { %v432_v36 = vadd.f32 1.0, %v3625_v35 }
 0x97e   :  { %3626 = vrcp.f32 %v432_v36 }
 0x988   :  { %v3627_v37 = vpop.eup %3626 }
 0x989   :  { %v435_v38 = vmul.f32 2.0, %v3627_v37  ;;  %v437_v14 = vmul.f32 %v3627_v37, %v375_v21 }
 0x98b   :  { %v3032_v39 = vadd.f32 -1.0, %v435_v38  ;;  %v156_v38 = vadd.f32 %v3968_v58, %v3927_v8 }
 0x98d   :  { %439 = vrot.lane.b32.xlu0 %v3032_v39, %s3852_s8 }
 0x9ff   :  { %v440_v40 = vpop.permute.xlu0 %439 }
 0xa00   :  { %v442_v41 = vmul.f32 %v3627_v37, %v440_v40 }
 0xa02   :  { %444 = vrot.lane.b32.xlu1 %v442_v41, %s3853_s9 }
 0xa74   :  { %v445_v42 = vpop.permute.xlu1 %444 }
 0xa75   :  { %v447_v43 = vadd.f32 %v445_v42, %v437_v14 }
 0xa77   :  { %3628 = vtanh.f32 %v447_v43 }
 0xa81   :  { %v3629_v44 = vpop.eup %3628 }
 0xa82   :  { %450 = vrot.lane.b32.xlu0 %v3629_v44, %s3852_s8 }
 0xaf4   :  { %v451_v45 = vpop.permute.xlu0 %450 }
 0xaf5   :  { %v4005_v46 = vmul.f32 %v3627_v37, %v451_v45 }
 0xaf7   :  { %v454_v47 = vpack.c.bf16 %v4005_v46, %v4005_v46 }
 0xaf9   :  { %456 = vrot.lane.b32.xlu1 %v454_v47, %s3853_s9 }
 0xb6b   :  { %v457_v48 = vpop.permute.xlu1 %456 }
 0xb6c   :  { %3303 = vmatmul.mubr.msk.bf16.vlgmr.msra.gmra.mrb[12].mxu0 %vm84_vm1, %v457_v48 }
 0xb6d   :  { %3315 = vmatpush3.bf16.msra.mxu0 %v3896_v2  ;;  %3318 = vmatprep.mubr.msk.bf16.mxu0 %vm3850_vm0, %v3849_v0 }
 0xb6e   :  { %3316 = vmatprep.subr.bf16.mxu0 %v3849_v0 }
 0xb71   :  { %3317 = vmatpush3.bf16.msra.mxu0 %v3898_v4 }
 0xc3f   :  { %v495_v50 = vpop.f32.mrb[12].mxu0 }
 0xc40   :  { %v496_v51 = vadd.f32 %v495_v50, %v148_v49  ;;  %v3304_v52 = vpop.f32.mrb[13].mxu0 }
 0xc41   :  { %v498_v53 = vpop.f32.mrb[14].mxu0 }
 0xc42   :  { %v3034_v54 = vmul.f32 -1.442695, %v496_v51  ;;  %v3305_v55 = vpop.f32.mrb[15].mxu0 }
 0xc44   :  { %3630 = vpow2.f32 %v3034_v54  ;;  %v3586_v54 = vld [vmem:[#allocation2 + $0x20] ss:$8 sps:$4 sm:$0xff]  }
 0xc45   :  { %3330 = vmatprep.subr.bf16.mxu0 %v3586_v54 }
 0xc4e   :  { %v3631_v57 = vpop.eup %3630 }
 0xc4f   :  { %v504_v62 = vadd.f32 1.0, %v3631_v57  ;;  %v742_v57 = vpack.c.bf16 %v3963_v56, %v3937_v32  ;;  %v743_v32 = vpack.c.bf16 %v4005_v46, %v3988_v24  ;;  %v4065_v56 = vld [vmem:[#allocation2 + $0x24] ss:$8 sps:$4 sm:$0xff]   ;;  %v159_v24 = vadd.f32 %v3972_v60, %v3927_v8 }
 0xc51   :  { %3632 = vrcp.f32 %v504_v62  ;;  %v3589_v62 = vld [vmem:[#allocation2 + $0x30] ss:$8 sps:$4 sm:$0xff]  }
 0xc5b   :  { %v3633_v63 = vpop.eup %3632 }
 0xc5c   :  { %v507_v1 = vmul.f32 2.0, %v3633_v63  ;;  %v509_v59 = vmul.f32 %v3633_v63, %v447_v43 }
 0xc5e   :  { %v3035_v3 = vadd.f32 -1.0, %v507_v1 }
 0xc60   :  { %511 = vrot.lane.b32.xlu0 %v3035_v3, %s3852_s8 }
 0xcd2   :  { %v512_v5 = vpop.permute.xlu0 %511 }
 0xcd3   :  { %v514_v6 = vmul.f32 %v3633_v63, %v512_v5 }
 0xcd5   :  { %516 = vrot.lane.b32.xlu1 %v514_v6, %s3853_s9 }
 0xd47   :  { %v517_v10 = vpop.permute.xlu1 %516 }
 0xd48   :  { %v519_v11 = vadd.f32 %v517_v10, %v509_v59  ;;  %v4068_v59 = vld [vmem:[#allocation2 + $0x34] ss:$8 sps:$4 sm:$0xff]  }
 0xd4a   :  { %3634 = vtanh.f32 %v519_v11 }
 0xd54   :  { %v3635_v12 = vpop.eup %3634 }
 0xd55   :  { %522 = vrot.lane.b32.xlu0 %v3635_v12, %s3852_s8 }
 0xdc7   :  { %v523_v13 = vpop.permute.xlu0 %522 }
 0xdc8   :  { %v4021_v15 = vmul.f32 %v3633_v63, %v523_v13 }
 0xdca   :  { %v526_v16 = vpack.c.bf16 %v4021_v15, %v4021_v15 }
 0xdcc   :  { %528 = vrot.lane.b32.xlu1 %v526_v16, %s3853_s9 }
 0xe3e   :  { %v529_v17 = vpop.permute.xlu1 %528 }
 0xe3f   :  { %3311 = vmatmul.mubr.msk.bf16.vlgmr.msra.gmra.mrb[12].mxu1 %vm84_vm1, %v529_v17  ;;  %v4093_v17 = vld [vmem:[%s4591_s2 + $0x1] ss:$0 sm:$0xff] }
 0xe40   :  { %3323 = vmatpush3.bf16.msra.mxu1 %v3896_v2  ;;  %3326 = vmatprep.mubr.msk.bf16.mxu1 %vm3850_vm0, %v3849_v0 }
 0xe41   :  { %3324 = vmatprep.subr.bf16.mxu1 %v3849_v0 }
 0xe44   :  { %3325 = vmatpush3.bf16.msra.mxu1 %v3898_v4 }
 0xe45   :  { %3342 = vmatprep.subr.bf16.mxu1 %v3849_v0 }
 0xf12   :  { %v567_v19 = vpop.f32.mrb[12].mxu1 }
 0xf13   :  { %v568_v9 = vadd.f32 %v567_v19, %v151_v18  ;;  %v3312_v20 = vpop.f32.mrb[13].mxu1 }
 0xf14   :  { %v570_v21 = vpop.f32.mrb[14].mxu1 }
 0xf15   :  { %v3037_v22 = vmul.f32 -1.442695, %v568_v9  ;;  %v3313_v23 = vpop.f32.mrb[15].mxu1 }
 0xf17   :  { %3636 = vpow2.f32 %v3037_v22 }
 0xf21   :  { %v3637_v2 = vpop.eup %3636 }
 0xf22   :  { %v576_v25 = vadd.f32 1.0, %v3637_v2 }
 0xf24   :  { %3638 = vrcp.f32 %v576_v25 }
 0xf2e   :  { %v3639_v26 = vpop.eup %3638 }
 0xf2f   :  { %v579_v27 = vmul.f32 2.0, %v3639_v26  ;;  %v581_v61 = vmul.f32 %v3639_v26, %v519_v11 }
 0xf31   :  { %v3038_v28 = vadd.f32 -1.0, %v579_v27 }
 0xf33   :  { %583 = vrot.lane.b32.xlu0 %v3038_v28, %s3852_s8 }
 0xfa5   :  { %v584_v4 = vpop.permute.xlu0 %583 }
 0xfa6   :  { %v586_v29 = vmul.f32 %v3639_v26, %v584_v4 }
 0xfa8   :  { %588 = vrot.lane.b32.xlu1 %v586_v29, %s3853_s9 }
0x101a   :  { %v589_v30 = vpop.permute.xlu1 %588 }
0x101b   :  { %v591_v31 = vadd.f32 %v589_v30, %v581_v61 }
0x101d   :  { %3640 = vtanh.f32 %v591_v31 }
0x1027   :  { %v3641_v33 = vpop.eup %3640 }
0x1028   :  { %594 = vrot.lane.b32.xlu0 %v3641_v33, %s3852_s8 }
0x109a   :  { %v595_v34 = vpop.permute.xlu0 %594 }
0x109b   :  { %v4038_v35 = vmul.f32 %v3639_v26, %v595_v34 }
0x109d   :  { %v598_v36 = vpack.c.bf16 %v4038_v35, %v4038_v35 }
0x109f   :  { %600 = vrot.lane.b32.xlu1 %v598_v36, %s3853_s9 }
0x1111   :  { %v601_v37 = vpop.permute.xlu1 %600 }
0x1112   :  { %3319 = vmatmul.mubr.msk.bf16.vlgmr.msra.gmra.mrb[16].mxu0 %vm84_vm1, %v601_v37 }
0x1113   :  { %3331 = vmatpush3.bf16.msra.mxu0 %v3586_v54 }
0x1114   :  { %3332 = vmatprep.subr.bf16.mxu0 %v3589_v62 }
0x1117   :  { %3333 = vmatpush3.bf16.msra.mxu0 %v3589_v62 }
0x1118   :  { %3358 = vmatprep.subr.bf16.mxu0 %v3849_v0 }
0x11e5   :  { %v639_v39 = vpop.f32.mrb[16].mxu0 }
0x11e6   :  { %v640_v40 = vadd.f32 %v639_v39, %v156_v38  ;;  %v3320_v41 = vpop.f32.mrb[17].mxu0 }
0x11e7   :  { %v642_v14 = vpop.f32.mrb[18].mxu0 }
0x11e8   :  { %v3040_v42 = vmul.f32 -1.442695, %v640_v40  ;;  %v3321_v43 = vpop.f32.mrb[19].mxu0 }
0x11ea   :  { %3642 = vpow2.f32 %v3040_v42 }
0x11f4   :  { %v3643_v44 = vpop.eup %3642 }
0x11f5   :  { %v648_v45 = vadd.f32 1.0, %v3643_v44 }
0x11f7   :  { %3644 = vrcp.f32 %v648_v45 }
0x1201   :  { %v3645_v47 = vpop.eup %3644 }
0x1202   :  { %v651_v48 = vmul.f32 2.0, %v3645_v47  ;;  %v653_v58 = vmul.f32 %v3645_v47, %v591_v31 }
0x1204   :  { %v3041_v49 = vadd.f32 -1.0, %v651_v48 }
0x1206   :  { %655 = vrot.lane.b32.xlu0 %v3041_v49, %s3852_s8 }
0x1278   :  { %v656_v50 = vpop.permute.xlu0 %655 }
0x1279   :  { %v658_v51 = vmul.f32 %v3645_v47, %v656_v50 }
0x127b   :  { %660 = vrot.lane.b32.xlu1 %v658_v51, %s3853_s9 }
0x12ed   :  { %v661_v52 = vpop.permute.xlu1 %660 }
0x12ee   :  { %v4048_v53 = vadd.f32 %v661_v52, %v653_v58  ;;  %v744_v52 = vpack.c.bf16 %v4038_v35, %v4021_v15 }
0x12f0   :  { %3646 = vtanh.f32 %v4048_v53 }
0x12fa   :  { %v3647_v55 = vpop.eup %3646 }
0x12fb   :  { %666 = vrot.lane.b32.xlu0 %v3647_v55, %s3852_s8 }
0x12ff   :  { %763 = vrot.lane.b32.xlu0 %v742_v57, %s3853_s9 }
0x136d   :  { %v667_v63 = vpop.permute.xlu0 %666 }
0x136e   :  { %v4056_v1 = vmul.f32 %v3645_v47, %v667_v63 }
0x1370   :  { %v670_v3 = vpack.c.bf16 %v4056_v1, %v4056_v1 }
0x1371   :  { %v764_v5 = vpop.permute.xlu0 %763 }
0x1372   :  { %672 = vrot.lane.b32.xlu1 %v670_v3, %s3853_s9  ;;  %3334 = vmatprep.mubr.msk.bf16.mxu0 %vm84_vm1, %v764_v5 }
0x1376   :  { %765 = vrot.lane.b32.xlu1 %v743_v32, %s3853_s9 }
0x13e4   :  { %v673_v6 = vpop.permute.xlu1 %672 }
0x13e5   :  { %3327 = vmatmul.mubr.msk.bf16.vlgmr.msra.gmra.mrb[16].mxu1 %vm84_vm1, %v673_v6 }
0x13e6   :  { %3343 = vmatpush3.bf16.msra.mxu1 %v4065_v56  ;;  %3346 = vmatprep.mubr.msk.bf16.mxu1 %vm3850_vm0, %v3849_v0 }
0x13e7   :  { %3344 = vmatprep.subr.bf16.mxu1 %v3849_v0 }
0x13e8   :  { %v766_v10 = vpop.permute.xlu1 %765 }
0x13e9   :  { %3335 = vmatmul.mubr.msk.bf16.vlgmr.msra.gmra.mrb[20].mxu0 %vm84_vm1, %v766_v10 }
0x13ea   :  { %3345 = vmatpush3.bf16.msra.mxu1 %v4068_v59  ;;  %3359 = vmatpush3.bf16.msra.mxu0 %v4065_v56 }
0x13eb   :  { %3350 = vmatprep.subr.bf16.mxu1 %v3849_v0  ;;  %3360 = vmatprep.subr.bf16.mxu0 %v3849_v0 }
0x13ed   :  { %3347 = vmatmul.mubr.bf16.vlgmr.msra.gmra.mrb[20].mxu1 %v3851_v7 }
0x13ee   :  { %3351 = vmatpush3.bf16.msra.mxu1 %v4065_v56  ;;  %3354 = vmatprep.mubr.msk.bf16.mxu1 %vm3850_vm0, %v3849_v0 }
0x13ef   :  { %3352 = vmatprep.subr.bf16.mxu1 %v3849_v0  ;;  %3361 = vmatpush3.bf16.msra.mxu0 %v4068_v59 }
0x13f0   :  { %3374 = vmatprep.subr.bf16.mxu0 %v3849_v0 }
0x13f2   :  { %3353 = vmatpush3.bf16.msra.mxu1 %v4068_v59 }
0x13f3   :  { %3366 = vmatprep.subr.bf16.mxu1 %v3849_v0 }
0x14b8   :  { %v711_v46 = vpop.f32.mrb[16].mxu1 }
0x14b9   :  { %v712_v11 = vadd.f32 %v711_v46, %v159_v24  ;;  %v3328_v12 = vpop.f32.mrb[17].mxu1 }
0x14ba   :  { %v714_v13 = vpop.f32.mrb[18].mxu1 }
0x14bb   :  { %v3329_v16 = vpop.f32.mrb[19].mxu1  ;;  %v3043_v31 = vmul.f32 -1.442695, %v712_v11 }
0x14bc   :  { %v4095_v18 = vpop.f32.mrb[20].mxu0 }
0x14bd   :  { %v829_v19 = vpop.f32.mrb[21].mxu0 }
0x14be   :  { %v830_v9 = vadd.f32 %v4093_v17, %v829_v19  ;;  %v4098_v20 = vpop.f32.mrb[22].mxu0 }
0x14bf   :  { %v832_v21 = vpop.f32.mrb[23].mxu0 }
0x14c0   :  { %v902_v22 = vpop.f32.mrb[20].mxu1  ;;  %v833_v55 = vadd.f32 %v4093_v17, %v832_v21 }
0x14c1   :  { %v903_v8 = vadd.f32 %v902_v22, %v830_v9  ;;  %v3348_v60 = vpop.f32.mrb[21].mxu1 }
0x14c2   :  { %v905_v23 = vpop.f32.mrb[22].mxu1 }
0x14c3   :  { %v3055_v2 = vmul.f32 -1.442695, %v903_v8  ;;  %v3349_v25 = vpop.f32.mrb[23].mxu1 }
0x14c5   :  { %3648 = vpow2.f32 %v3055_v2 }
0x14cf   :  { %v3649_v26 = vpop.eup %3648 }
0x14d0   :  { %v911_v27 = vadd.f32 1.0, %v3649_v26 }
0x14d2   :  { %3650 = vrcp.f32 %v911_v27 }
0x14d3   :  { %3652 = vpow2.f32 %v3043_v31 }
0x14dc   :  { %v3651_v28 = vpop.eup %3650 }
0x14dd   :  { %v914_v4 = vmul.f32 2.0, %v3651_v28  ;;  %v3653_v33 = vpop.eup %3652  ;;  %v916_v36 = vmul.f32 0.0, %v3651_v28 }
0x14de   :  { %v720_v34 = vadd.f32 1.0, %v3653_v33 }
0x14df   :  { %v3056_v29 = vadd.f32 -1.0, %v914_v4 }
0x14e0   :  { %3654 = vrcp.f32 %v720_v34 }
0x14e1   :  { %918 = vrot.lane.b32.xlu0 %v3056_v29, %s3852_s8 }
0x14ea   :  { %v3655_v39 = vpop.eup %3654 }
0x14eb   :  { %v723_v40 = vmul.f32 2.0, %v3655_v39  ;;  %v725_v49 = vmul.f32 %v3655_v39, %v4048_v53 }
0x14ed   :  { %v3044_v14 = vadd.f32 -1.0, %v723_v40 }
0x1553   :  { %v919_v61 = vpop.permute.xlu0 %918 }
0x1554   :  { %v921_v30 = vmul.f32 %v3651_v28, %v919_v61 }
0x1556   :  { %923 = vrot.lane.b32.xlu1 %v921_v30, %s3853_s9 }
0x15c8   :  { %v924_v37 = vpop.permute.xlu1 %923 }
0x15c9   :  { %v926_v38 = vadd.f32 %v924_v37, %v916_v36 }
0x15cb   :  { %3656 = vtanh.f32 %v926_v38 }
0x15d5   :  { %v3657_v41 = vpop.eup %3656 }
0x15d6   :  { %929 = vrot.lane.b32.xlu0 %v3657_v41, %s3852_s8 }
0x15da   :  { %727 = vrot.lane.b32.xlu0 %v3044_v14, %s3852_s8 }
0x1648   :  { %v930_v42 = vpop.permute.xlu0 %929 }
0x1649   :  { %v4104_v43 = vmul.f32 %v3651_v28, %v930_v42  ;;  %v838_v28 = vadd.f32 %v4095_v18, %v4093_v17 }
0x164b   :  { %v933_v44 = vpack.c.bf16 %v4104_v43, %v4104_v43 }
0x164c   :  { %v728_v45 = vpop.permute.xlu0 %727 }
0x164d   :  { %v730_v47 = vmul.f32 %v3655_v39, %v728_v45  ;;  %935 = vrot.lane.b32.xlu1 %v933_v44, %s3853_s9 }
0x164f   :  { %732 = vrot.lane.b32.xlu0 %v730_v47, %s3853_s9 }
0x16bf   :  { %v936_v48 = vpop.permute.xlu1 %935 }
0x16c0   :  { %3355 = vmatmul.mubr.msk.bf16.vlgmr.msra.gmra.mrb[24].mxu1 %vm84_vm1, %v936_v48 }
0x16c1   :  { %v733_v50 = vpop.permute.xlu0 %732  ;;  %3367 = vmatpush3.bf16.msra.mxu1 %v4065_v56  ;;  %3370 = vmatprep.mubr.msk.bf16.mxu1 %vm3850_vm0, %v3849_v0 }
0x16c2   :  { %v735_v51 = vadd.f32 %v733_v50, %v725_v49  ;;  %3368 = vmatprep.subr.bf16.mxu1 %v3849_v0  ;;  %v841_v50 = vadd.f32 %v4098_v20, %v4093_v17 }
0x16c4   :  { %3658 = vtanh.f32 %v735_v51 }
0x16c5   :  { %3369 = vmatpush3.bf16.msra.mxu1 %v4068_v59 }
0x16c6   :  { %3382 = vmatprep.subr.bf16.mxu1 %v3849_v0 }
0x16ce   :  { %v3659_v58 = vpop.eup %3658 }
0x16cf   :  { %738 = vrot.lane.b32.xlu0 %v3659_v58, %s3852_s8 }
0x16d3   :  { %767 = vrot.lane.b32.xlu0 %v744_v52, %s3853_s9 }
0x1741   :  { %v739_v53 = vpop.permute.xlu0 %738 }
0x1742   :  { %v741_v19 = vmul.f32 %v3655_v39, %v739_v53 }
0x1744   :  { %v745_v21 = vpack.c.bf16 %v741_v19, %v4056_v1 }
0x1745   :  { %v768_v54 = vpop.permute.xlu0 %767 }
0x1746   :  { %3338 = vmatprep.mubr.msk.bf16.mxu0 %vm84_vm1, %v768_v54 }
0x1793   :  { %v974_v57 = vpop.f32.mrb[24].mxu1 }
0x1794   :  { %v975_v62 = vadd.f32 %v974_v57, %v833_v55  ;;  %v3356_v63 = vpop.f32.mrb[25].mxu1 }
0x1795   :  { %v977_v3 = vpop.f32.mrb[26].mxu1 }
0x1796   :  { %v3058_v5 = vmul.f32 -1.442695, %v975_v62  ;;  %v3357_v32 = vpop.f32.mrb[27].mxu1 }
0x1798   :  { %3660 = vpow2.f32 %v3058_v5 }
0x17a2   :  { %v3661_v6 = vpop.eup %3660 }
0x17a3   :  { %v983_v10 = vadd.f32 1.0, %v3661_v6 }
0x17a5   :  { %3662 = vrcp.f32 %v983_v10 }
0x17af   :  { %v3663_v24 = vpop.eup %3662 }
0x17b0   :  { %v986_v15 = vmul.f32 2.0, %v3663_v24  ;;  %v988_v12 = vmul.f32 %v3663_v24, %v926_v38 }
0x17b2   :  { %v3059_v35 = vadd.f32 -1.0, %v986_v15 }
0x17b4   :  { %990 = vrot.lane.b32.xlu1 %v3059_v35, %s3852_s8 }
0x1826   :  { %v991_v46 = vpop.permute.xlu1 %990 }
0x1827   :  { %v993_v11 = vmul.f32 %v3663_v24, %v991_v46 }
0x1829   :  { %995 = vrot.lane.b32.xlu1 %v993_v11, %s3853_s9 }
0x189b   :  { %v996_v13 = vpop.permute.xlu1 %995 }
0x189c   :  { %v998_v16 = vadd.f32 %v996_v13, %v988_v12 }
0x189e   :  { %3664 = vtanh.f32 %v998_v16 }
0x18a8   :  { %v3665_v9 = vpop.eup %3664 }
0x18a9   :  { %1001 = vrot.lane.b32.xlu1 %v3665_v9, %s3852_s8 }
0x18ad   :  { %769 = vrot.lane.b32.xlu1 %v745_v21, %s3853_s9 }
0x191b   :  { %v1002_v22 = vpop.permute.xlu1 %1001 }
0x191c   :  { %v4129_v8 = vmul.f32 %v3663_v24, %v1002_v22 }
0x191e   :  { %v1005_v60 = vpack.c.bf16 %v4129_v8, %v4129_v8 }
0x191f   :  { %v770_v23 = vpop.permute.xlu1 %769 }
0x1920   :  { %1007 = vrot.lane.b32.xlu0 %v1005_v60, %s3853_s9  ;;  %3339 = vmatmul.mubr.msk.bf16.gmra.mrb[24].mxu0 %vm84_vm1, %v770_v23 }
0x1921   :  { %3362 = vmatprep.mubr.msk.bf16.mxu0 %vm3850_vm0, %v3849_v0 }
0x1992   :  { %v1008_v2 = vpop.permute.xlu0 %1007 }
0x1993   :  { %3363 = vmatmul.mubr.msk.bf16.vlgmr.msra.gmra.mrb[28].mxu0 %vm84_vm1, %v1008_v2 }
0x1994   :  { %3375 = vmatpush3.bf16.msra.mxu0 %v4065_v56  ;;  %3378 = vmatprep.mubr.msk.bf16.mxu0 %vm3850_vm0, %v3849_v0 }
0x1995   :  { %3376 = vmatprep.subr.bf16.mxu0 %v3849_v0 }
0x1998   :  { %3377 = vmatpush3.bf16.msra.mxu0 %v4068_v59 }
0x1999   :  { %3390 = vmatprep.subr.bf16.mxu0 %v3849_v0 }
0x19f3   :  { %v4144_v1 = vpop.f32.mrb[24].mxu0 }
0x19f4   :  { %v4146_v25 = vpop.f32.mrb[25].mxu0 }
0x19f5   :  { %v4148_v26 = vpop.f32.mrb[26].mxu0  ;;  %v846_v13 = vadd.f32 %v4093_v17, %v4146_v25 }
0x19f6   :  { %v4150_v27 = vpop.f32.mrb[27].mxu0 }
0x1a66   :  { %v1046_v4 = vpop.f32.mrb[28].mxu0 }
0x1a67   :  { %v1047_v29 = vadd.f32 %v1046_v4, %v838_v28  ;;  %v3364_v61 = vpop.f32.mrb[29].mxu0 }
0x1a68   :  { %v1049_v30 = vpop.f32.mrb[30].mxu0 }
0x1a69   :  { %v3061_v31 = vmul.f32 -1.442695, %v1047_v29  ;;  %v3365_v33 = vpop.f32.mrb[31].mxu0 }
0x1a6b   :  { %3666 = vpow2.f32 %v3061_v31 }
0x1a75   :  { %v3667_v34 = vpop.eup %3666 }
0x1a76   :  { %v1055_v36 = vadd.f32 1.0, %v3667_v34 }
0x1a78   :  { %3668 = vrcp.f32 %v1055_v36 }
0x1a82   :  { %v3669_v37 = vpop.eup %3668 }
0x1a83   :  { %v1058_v38 = vmul.f32 2.0, %v3669_v37  ;;  %v1060_v18 = vmul.f32 %v3669_v37, %v998_v16 }
0x1a85   :  { %v3062_v39 = vadd.f32 -1.0, %v1058_v38 }
0x1a87   :  { %1062 = vrot.lane.b32.xlu1 %v3062_v39, %s3852_s8 }
0x1af9   :  { %v1063_v40 = vpop.permute.xlu1 %1062 }
0x1afa   :  { %v1065_v41 = vmul.f32 %v3669_v37, %v1063_v40  ;;  %v849_v40 = vadd.f32 %v4093_v17, %v4150_v27 }
0x1afc   :  { %1067 = vrot.lane.b32.xlu0 %v1065_v41, %s3853_s9 }
0x1b6e   :  { %v1068_v14 = vpop.permute.xlu0 %1067 }
0x1b6f   :  { %v1070_v42 = vadd.f32 %v1068_v14, %v1060_v18 }
0x1b71   :  { %3670 = vtanh.f32 %v1070_v42 }
0x1b7b   :  { %v3671_v44 = vpop.eup %3670 }
0x1b7c   :  { %1073 = vrot.lane.b32.xlu1 %v3671_v44, %s3852_s8 }
0x1bee   :  { %v1074_v45 = vpop.permute.xlu1 %1073 }
0x1bef   :  { %v4157_v47 = vmul.f32 %v3669_v37, %v1074_v45 }
0x1bf1   :  { %v1077_v48 = vpack.c.bf16 %v4157_v47, %v4157_v47 }
0x1bf3   :  { %1079 = vrot.lane.b32.xlu0 %v1077_v48, %s3853_s9 }
0x1c65   :  { %v1080_v49 = vpop.permute.xlu0 %1079 }
0x1c66   :  { %3371 = vmatmul.mubr.msk.bf16.vlgmr.msra.gmra.mrb[28].mxu1 %vm84_vm1, %v1080_v49 }
0x1c67   :  { %3383 = vmatpush3.bf16.msra.mxu1 %v4065_v56  ;;  %3386 = vmatprep.mubr.msk.bf16.mxu1 %vm3850_vm0, %v3849_v0 }
0x1c68   :  { %3384 = vmatprep.subr.bf16.mxu1 %v3849_v0 }
0x1c6b   :  { %3385 = vmatpush3.bf16.msra.mxu1 %v4068_v59 }
0x1c6c   :  { %3398 = vmatprep.subr.bf16.mxu1 %v3849_v0 }
0x1d39   :  { %v1118_v51 = vpop.f32.mrb[28].mxu1 }
0x1d3a   :  { %v1119_v58 = vadd.f32 %v1118_v51, %v841_v50  ;;  %v3372_v52 = vpop.f32.mrb[29].mxu1 }
0x1d3b   :  { %v1121_v53 = vpop.f32.mrb[30].mxu1 }
0x1d3c   :  { %v3064_v54 = vmul.f32 -1.442695, %v1119_v58  ;;  %v3373_v55 = vpop.f32.mrb[31].mxu1 }
0x1d3e   :  { %3672 = vpow2.f32 %v3064_v54 }
0x1d48   :  { %v3673_v57 = vpop.eup %3672 }
0x1d49   :  { %v1127_v62 = vadd.f32 1.0, %v3673_v57 }
0x1d4b   :  { %3674 = vrcp.f32 %v1127_v62 }
0x1d55   :  { %v3675_v63 = vpop.eup %3674 }
0x1d56   :  { %v1130_v3 = vmul.f32 2.0, %v3675_v63  ;;  %v1132_v20 = vmul.f32 %v3675_v63, %v1070_v42 }
0x1d58   :  { %v3065_v5 = vadd.f32 -1.0, %v1130_v3  ;;  %v854_v3 = vadd.f32 %v4144_v1, %v4093_v17  ;;  %v1437_v1 = vpack.c.bf16 %v4129_v8, %v4104_v43 }
0x1d5a   :  { %1134 = vrot.lane.b32.xlu1 %v3065_v5, %s3852_s8 }
0x1dcc   :  { %v1135_v32 = vpop.permute.xlu1 %1134 }
0x1dcd   :  { %v1137_v6 = vmul.f32 %v3675_v63, %v1135_v32 }
0x1dcf   :  { %1139 = vrot.lane.b32.xlu0 %v1137_v6, %s3853_s9 }
0x1e41   :  { %v1140_v10 = vpop.permute.xlu0 %1139 }
0x1e42   :  { %v1142_v24 = vadd.f32 %v1140_v10, %v1132_v20 }
0x1e44   :  { %3676 = vtanh.f32 %v1142_v24 }
0x1e4e   :  { %v3677_v15 = vpop.eup %3676 }
0x1e4f   :  { %1145 = vrot.lane.b32.xlu1 %v3677_v15, %s3852_s8 }
0x1ec1   :  { %v1146_v35 = vpop.permute.xlu1 %1145 }
0x1ec2   :  { %v4174_v46 = vmul.f32 %v3675_v63, %v1146_v35 }
0x1ec4   :  { %v1149_v11 = vpack.c.bf16 %v4174_v46, %v4174_v46  ;;  %v1438_v8 = vpack.c.bf16 %v4174_v46, %v4157_v47  ;;  %v4239_v47 = vld [vmem:[#allocation2 + $0x54] ss:$8 sps:$4 sm:$0xff]  }
0x1ec6   :  { %1151 = vrot.lane.b32.xlu0 %v1149_v11, %s3853_s9 }
0x1f38   :  { %v1152_v12 = vpop.permute.xlu0 %1151 }
0x1f39   :  { %3379 = vmatmul.mubr.msk.bf16.vlgmr.msra.gmra.mrb[32].mxu0 %vm84_vm1, %v1152_v12 }
0x1f3a   :  { %3391 = vmatpush3.bf16.msra.mxu0 %v4065_v56  ;;  %3394 = vmatprep.mubr.msk.bf16.mxu0 %vm3850_vm0, %v3849_v0 }
0x1f3b   :  { %3392 = vmatprep.subr.bf16.mxu0 %v3849_v0 }
0x1f3e   :  { %3393 = vmatpush3.bf16.msra.mxu0 %v4068_v59 }
0x200c   :  { %v1190_v16 = vpop.f32.mrb[32].mxu0 }
0x200d   :  { %v1191_v19 = vadd.f32 %v1190_v16, %v846_v13  ;;  %v3380_v9 = vpop.f32.mrb[33].mxu0 }
0x200e   :  { %v1193_v21 = vpop.f32.mrb[34].mxu0  ;;  %v3592_v9 = vld [vmem:[#allocation2 + $0x40] ss:$8 sps:$4 sm:$0xff]  }
0x200f   :  { %v3067_v22 = vmul.f32 -1.442695, %v1191_v19  ;;  %v3381_v60 = vpop.f32.mrb[35].mxu0  ;;  %3406 = vmatprep.subr.bf16.mxu0 %v3592_v9 }
0x2011   :  { %3678 = vpow2.f32 %v3067_v22  ;;  %v3595_v22 = vld [vmem:[#allocation2 + $0x50] ss:$8 sps:$4 sm:$0xff]  }
0x201b   :  { %v3679_v23 = vpop.eup %3678 }
0x201c   :  { %v1199_v2 = vadd.f32 1.0, %v3679_v23 }
0x201e   :  { %3680 = vrcp.f32 %v1199_v2 }
0x2028   :  { %v3681_v28 = vpop.eup %3680 }
0x2029   :  { %v1202_v4 = vmul.f32 2.0, %v3681_v28  ;;  %v1204_v25 = vmul.f32 %v3681_v28, %v1142_v24 }
0x202b   :  { %v3068_v29 = vadd.f32 -1.0, %v1202_v4 }
0x202d   :  { %1206 = vrot.lane.b32.xlu1 %v3068_v29, %s3852_s8 }
0x209f   :  { %v1207_v61 = vpop.permute.xlu1 %1206 }
0x20a0   :  { %v1209_v30 = vmul.f32 %v3681_v28, %v1207_v61  ;;  %v4233_v61 = vld [vmem:[#allocation2 + $0x44] ss:$8 sps:$4 sm:$0xff]  }
0x20a2   :  { %1211 = vrot.lane.b32.xlu0 %v1209_v30, %s3853_s9 }
0x2114   :  { %v1212_v31 = vpop.permute.xlu0 %1211 }
0x2115   :  { %v1214_v33 = vadd.f32 %v1212_v31, %v1204_v25  ;;  %v4260_v25 = vld [vmem:[%s4591_s2 + $0x2] ss:$0 sm:$0xff] }
0x2117   :  { %3682 = vtanh.f32 %v1214_v33 }
0x2121   :  { %v3683_v34 = vpop.eup %3682 }
0x2122   :  { %1217 = vrot.lane.b32.xlu1 %v3683_v34, %s3852_s8 }
0x2194   :  { %v1218_v36 = vpop.permute.xlu1 %1217 }
0x2195   :  { %v4190_v37 = vmul.f32 %v3681_v28, %v1218_v36 }
0x2197   :  { %v1221_v38 = vpack.c.bf16 %v4190_v37, %v4190_v37 }
0x2199   :  { %1223 = vrot.lane.b32.xlu0 %v1221_v38, %s3853_s9 }
0x220b   :  { %v1224_v39 = vpop.permute.xlu0 %1223 }
0x220c   :  { %3387 = vmatmul.mubr.msk.bf16.vlgmr.msra.gmra.mrb[32].mxu1 %vm84_vm1, %v1224_v39  ;;  %v857_v39 = vadd.f32 %v4148_v26, %v4093_v17 }
0x220d   :  { %3399 = vmatpush3.bf16.msra.mxu1 %v4065_v56  ;;  %3402 = vmatprep.mubr.msk.bf16.mxu1 %vm3850_vm0, %v3849_v0 }
0x220e   :  { %3400 = vmatprep.subr.bf16.mxu1 %v3849_v0 }
0x2211   :  { %3401 = vmatpush3.bf16.msra.mxu1 %v4068_v59 }
0x2212   :  { %3418 = vmatprep.subr.bf16.mxu1 %v3849_v0 }
0x22df   :  { %v1262_v41 = vpop.f32.mrb[32].mxu1 }
0x22e0   :  { %v1263_v18 = vadd.f32 %v1262_v41, %v849_v40  ;;  %v3388_v14 = vpop.f32.mrb[33].mxu1 }
0x22e1   :  { %v1265_v42 = vpop.f32.mrb[34].mxu1 }
0x22e2   :  { %v3070_v44 = vmul.f32 -1.442695, %v1263_v18  ;;  %v3389_v45 = vpop.f32.mrb[35].mxu1 }
0x22e4   :  { %3684 = vpow2.f32 %v3070_v44 }
0x22ee   :  { %v3685_v56 = vpop.eup %3684 }
0x22ef   :  { %v1271_v48 = vadd.f32 1.0, %v3685_v56 }
0x22f1   :  { %3686 = vrcp.f32 %v1271_v48 }
0x22fb   :  { %v3687_v49 = vpop.eup %3686 }
0x22fc   :  { %v1274_v50 = vmul.f32 2.0, %v3687_v49  ;;  %v1276_v27 = vmul.f32 %v3687_v49, %v1214_v33 }
0x22fe   :  { %v3071_v51 = vadd.f32 -1.0, %v1274_v50 }
0x2300   :  { %1278 = vrot.lane.b32.xlu1 %v3071_v51, %s3852_s8 }
0x2372   :  { %v1279_v59 = vpop.permute.xlu1 %1278 }
0x2373   :  { %v1281_v58 = vmul.f32 %v3687_v49, %v1279_v59 }
0x2375   :  { %1283 = vrot.lane.b32.xlu0 %v1281_v58, %s3853_s9 }
0x23e7   :  { %v1284_v52 = vpop.permute.xlu0 %1283 }
0x23e8   :  { %v1286_v53 = vadd.f32 %v1284_v52, %v1276_v27 }
0x23ea   :  { %3688 = vtanh.f32 %v1286_v53 }
0x23f4   :  { %v3689_v54 = vpop.eup %3688 }
0x23f5   :  { %1289 = vrot.lane.b32.xlu1 %v3689_v54, %s3852_s8 }
0x2467   :  { %v1290_v55 = vpop.permute.xlu1 %1289 }
0x2468   :  { %v4207_v57 = vmul.f32 %v3687_v49, %v1290_v55 }
0x246a   :  { %v1293_v62 = vpack.c.bf16 %v4207_v57, %v4207_v57 }
0x246c   :  { %1295 = vrot.lane.b32.xlu0 %v1293_v62, %s3853_s9 }
0x24de   :  { %v1296_v63 = vpop.permute.xlu0 %1295 }
0x24df   :  { %3395 = vmatmul.mubr.msk.bf16.vlgmr.msra.gmra.mrb[36].mxu0 %vm84_vm1, %v1296_v63 }
0x24e0   :  { %3407 = vmatpush3.bf16.msra.mxu0 %v3592_v9 }
0x24e1   :  { %3408 = vmatprep.subr.bf16.mxu0 %v3595_v22 }
0x24e4   :  { %3409 = vmatpush3.bf16.msra.mxu0 %v3595_v22 }
0x24e5   :  { %3434 = vmatprep.subr.bf16.mxu0 %v3849_v0 }
0x25b2   :  { %v1334_v5 = vpop.f32.mrb[36].mxu0 }
0x25b3   :  { %v1335_v32 = vadd.f32 %v1334_v5, %v854_v3  ;;  %v3396_v6 = vpop.f32.mrb[37].mxu0 }
0x25b4   :  { %v1337_v20 = vpop.f32.mrb[38].mxu0 }
0x25b5   :  { %v3073_v10 = vmul.f32 -1.442695, %v1335_v32  ;;  %v3397_v24 = vpop.f32.mrb[39].mxu0 }
0x25b7   :  { %3690 = vpow2.f32 %v3073_v10 }
0x25c1   :  { %v3691_v15 = vpop.eup %3690 }
0x25c2   :  { %v1343_v35 = vadd.f32 1.0, %v3691_v15 }
0x25c4   :  { %3692 = vrcp.f32 %v1343_v35 }
0x25ce   :  { %v3693_v11 = vpop.eup %3692 }
0x25cf   :  { %v1346_v12 = vmul.f32 2.0, %v3693_v11  ;;  %v1348_v21 = vmul.f32 %v3693_v11, %v1286_v53 }
0x25d1   :  { %v3074_v13 = vadd.f32 -1.0, %v1346_v12 }
0x25d3   :  { %1350 = vrot.lane.b32.xlu1 %v3074_v13, %s3852_s8 }
0x2645   :  { %v1351_v16 = vpop.permute.xlu1 %1350 }
0x2646   :  { %v1353_v19 = vmul.f32 %v3693_v11, %v1351_v16 }
0x2648   :  { %1355 = vrot.lane.b32.xlu0 %v1353_v19, %s3853_s9 }
0x264c   :  { %1458 = vrot.lane.b32.xlu0 %v1437_v1, %s3853_s9 }
0x26ba   :  { %v1356_v60 = vpop.permute.xlu0 %1355 }
0x26bb   :  { %v4220_v23 = vadd.f32 %v1356_v60, %v1348_v21  ;;  %v1439_v60 = vpack.c.bf16 %v4207_v57, %v4190_v37 }
0x26bd   :  { %3694 = vtanh.f32 %v4220_v23 }
0x26be   :  { %v1459_v2 = vpop.permute.xlu0 %1458 }
0x26bf   :  { %3410 = vmatprep.mubr.msk.bf16.mxu0 %vm84_vm1, %v1459_v2 }
0x26c7   :  { %v3695_v43 = vpop.eup %3694 }
0x26c8   :  { %1361 = vrot.lane.b32.xlu1 %v3695_v43, %s3852_s8 }
0x26cc   :  { %1460 = vrot.lane.b32.xlu1 %v1438_v8, %s3853_s9 }
0x273a   :  { %v1362_v28 = vpop.permute.xlu1 %1361 }
0x273b   :  { %v4229_v4 = vmul.f32 %v3693_v11, %v1362_v28 }
0x273d   :  { %v1365_v29 = vpack.c.bf16 %v4229_v4, %v4229_v4 }
0x273e   :  { %v1461_v30 = vpop.permute.xlu1 %1460 }
0x273f   :  { %1367 = vrot.lane.b32.xlu0 %v1365_v29, %s3853_s9  ;;  %3411 = vmatmul.mubr.msk.bf16.vlgmr.msra.gmra.mrb[40].mxu0 %vm84_vm1, %v1461_v30 }
0x2740   :  { %3435 = vmatpush3.bf16.msra.mxu0 %v4233_v61 }
0x2741   :  { %3436 = vmatprep.subr.bf16.mxu0 %v3849_v0 }
0x2744   :  { %3437 = vmatpush3.bf16.msra.mxu0 %v4239_v47 }
0x2745   :  { %3450 = vmatprep.subr.bf16.mxu0 %v3849_v0 }
0x27b1   :  { %v1368_v46 = vpop.permute.xlu0 %1367 }
0x27b2   :  { %3403 = vmatmul.mubr.msk.bf16.vlgmr.msra.gmra.mrb[36].mxu1 %vm84_vm1, %v1368_v46 }
0x27b3   :  { %3419 = vmatpush3.bf16.msra.mxu1 %v4233_v61  ;;  %3422 = vmatprep.mubr.msk.bf16.mxu1 %vm3850_vm0, %v3849_v0 }
0x27b4   :  { %3420 = vmatprep.subr.bf16.mxu1 %v3849_v0 }
0x27b7   :  { %3421 = vmatpush3.bf16.msra.mxu1 %v4239_v47 }
0x27b8   :  { %3426 = vmatprep.subr.bf16.mxu1 %v3849_v0 }
0x27ba   :  { %3423 = vmatmul.mubr.bf16.vlgmr.msra.gmra.mrb[40].mxu1 %v3851_v7 }
0x27bb   :  { %3427 = vmatpush3.bf16.msra.mxu1 %v4233_v61  ;;  %3430 = vmatprep.mubr.msk.bf16.mxu1 %vm3850_vm0, %v3849_v0 }
0x27bc   :  { %3428 = vmatprep.subr.bf16.mxu1 %v3849_v0 }
0x27bf   :  { %3429 = vmatpush3.bf16.msra.mxu1 %v4239_v47 }
0x27c0   :  { %3442 = vmatprep.subr.bf16.mxu1 %v3849_v0 }
0x2812   :  { %v4262_v31 = vpop.f32.mrb[40].mxu0 }
0x2813   :  { %v1524_v33 = vpop.f32.mrb[41].mxu0 }
0x2814   :  { %v1525_v34 = vadd.f32 %v4260_v25, %v1524_v33  ;;  %v4265_v36 = vpop.f32.mrb[42].mxu0 }
0x2815   :  { %v1527_v38 = vpop.f32.mrb[43].mxu0 }
0x2816   :  { %1611 = vrot.lane.b32.xlu1 %v1525_v34, %s3854_s17  ;;  %v1528_v62 = vadd.f32 %v4260_v25, %v1527_v38 }
0x2885   :  { %v1406_v40 = vpop.f32.mrb[36].mxu1 }
0x2886   :  { %v1407_v41 = vadd.f32 %v1406_v40, %v857_v39  ;;  %v3404_v18 = vpop.f32.mrb[37].mxu1 }
0x2887   :  { %v1409_v14 = vpop.f32.mrb[38].mxu1 }
0x2888   :  { %v3405_v42 = vpop.f32.mrb[39].mxu1  ;;  %v1612_v44 = vpop.permute.xlu1 %1611  ;;  %v3076_v63 = vmul.f32 -1.442695, %v1407_v41 }
0x288d   :  { %v1597_v45 = vpop.f32.mrb[40].mxu1 }
0x288e   :  { %v1614_v56 = vadd.f32 %v1612_v44, %v1597_v45  ;;  %v3424_v48 = vpop.f32.mrb[41].mxu1  ;;  %v1603_v51 = vadd.f32 %v1597_v45, %v1525_v34  ;;  %v1533_v45 = vadd.f32 %v4262_v31, %v4260_v25 }
0x288f   :  { %v1600_v49 = vpop.f32.mrb[42].mxu1 }
0x2890   :  { %1616 = vrot.lane.b32.xlu0 %v1614_v56, %s3852_s8  ;;  %v3425_v50 = vpop.f32.mrb[43].mxu1  ;;  %v3088_v59 = vmul.f32 -1.442695, %v1603_v51 }
0x2892   :  { %3696 = vpow2.f32 %v3088_v59 }
0x289c   :  { %v3697_v58 = vpop.eup %3696 }
0x289d   :  { %v1607_v27 = vadd.f32 1.0, %v3697_v58 }
0x289f   :  { %3698 = vrcp.f32 %v1607_v27 }
0x28a9   :  { %v3699_v17 = vpop.eup %3698 }
0x28aa   :  { %v1626_v32 = vsub.f32 1.0, %v3699_v17  ;;  %v1632_v20 = vmul.f32 0.0, %v3699_v17 }
0x2902   :  { %v1617_v26 = vpop.permute.xlu0 %1616 }
0x2903   :  { %v1619_v52 = vmul.f32 %v3699_v17, %v1617_v26 }
0x2905   :  { %1621 = vrot.lane.b32.xlu1 %v1619_v52, %s3852_s8 }
0x2977   :  { %v1622_v53 = vpop.permute.xlu1 %1621 }
0x2978   :  { %v1624_v54 = vadd.f32 %v1622_v53, %v1525_v34 }
0x297a   :  { %3700 = vtanh.f32 %v1624_v54 }
0x297b   :  { %3702 = vpow2.f32 %v3076_v63 }
0x2984   :  { %v3701_v55 = vpop.eup %3700 }
0x2985   :  { %1628 = vrot.lane.b32.xlu0 %v3701_v55, %s3854_s17  ;;  %v3703_v3 = vpop.eup %3702 }
0x2986   :  { %v1415_v5 = vadd.f32 1.0, %v3703_v3 }
0x2988   :  { %3704 = vrcp.f32 %v1415_v5 }
0x2989   :  { %1689 = vrot.lane.b32.xlu0 %v1528_v62, %s3854_s17 }
0x2992   :  { %v3705_v24 = vpop.eup %3704 }
0x2993   :  { %v1418_v11 = vmul.f32 2.0, %v3705_v24  ;;  %v1420_v1 = vmul.f32 %v3705_v24, %v4220_v23 }
0x2995   :  { %v3077_v12 = vadd.f32 -1.0, %v1418_v11 }
0x29f7   :  { %v1629_v6 = vpop.permute.xlu0 %1628 }
0x29f8   :  { %v1631_v10 = vmul.f32 %v1629_v6, %v1626_v32 }
0x29fa   :  { %v4275_v15 = vadd.f32 %v1632_v20, %v1631_v10 }
0x29fb   :  { %v1690_v2 = vpop.permute.xlu0 %1689 }
0x29fc   :  { %v1634_v35 = vpack.c.bf16 %v4275_v15, %v4275_v15 }
0x29fe   :  { %1636 = vrot.lane.b32.xlu1 %v1634_v35, %s3854_s17 }
0x2a02   :  { %1422 = vrot.lane.b32.xlu1 %v3077_v12, %s3852_s8 }
0x2a70   :  { %v1637_v13 = vpop.permute.xlu1 %1636 }
0x2a71   :  { %3431 = vmatmul.mubr.msk.bf16.vlgmr.msra.gmra.mrb[44].mxu1 %vm84_vm1, %v1637_v13  ;;  %v1536_v13 = vadd.f32 %v4265_v36, %v4260_v25 }
0x2a72   :  { %3443 = vmatpush3.bf16.msra.mxu1 %v4233_v61  ;;  %3446 = vmatprep.mubr.msk.bf16.mxu1 %vm3850_vm0, %v3849_v0 }
0x2a73   :  { %3444 = vmatprep.subr.bf16.mxu1 %v3849_v0 }
0x2a74   :  { %v1423_v16 = vpop.permute.xlu1 %1422 }
0x2a75   :  { %v1425_v19 = vmul.f32 %v3705_v24, %v1423_v16 }
0x2a76   :  { %3445 = vmatpush3.bf16.msra.mxu1 %v4239_v47 }
0x2a77   :  { %1427 = vrot.lane.b32.xlu1 %v1425_v19, %s3853_s9  ;;  %3458 = vmatprep.subr.bf16.mxu1 %v3849_v0 }
0x2ae9   :  { %v1428_v9 = vpop.permute.xlu1 %1427 }
0x2aea   :  { %v1430_v21 = vadd.f32 %v1428_v9, %v1420_v1 }
0x2aec   :  { %3706 = vtanh.f32 %v1430_v21 }
0x2af6   :  { %v3707_v22 = vpop.eup %3706 }
0x2af7   :  { %1433 = vrot.lane.b32.xlu1 %v3707_v22, %s3852_s8 }
0x2afb   :  { %1462 = vrot.lane.b32.xlu1 %v1439_v60, %s3853_s9 }
0x2b44   :  { %v1675_v43 = vpop.f32.mrb[44].mxu1 }
0x2b45   :  { %v1692_v8 = vadd.f32 %v1690_v2, %v1675_v43  ;;  %v3432_v28 = vpop.f32.mrb[45].mxu1  ;;  %v1681_v33 = vadd.f32 %v1675_v43, %v1528_v62 }
0x2b46   :  { %v1678_v29 = vpop.f32.mrb[46].mxu1 }
0x2b47   :  { %1694 = vrot.lane.b32.xlu0 %v1692_v8, %s3852_s8  ;;  %v3433_v30 = vpop.f32.mrb[47].mxu1  ;;  %v3090_v34 = vmul.f32 -1.442695, %v1681_v33 }
0x2b49   :  { %3708 = vpow2.f32 %v3090_v34 }
0x2b53   :  { %v3709_v38 = vpop.eup %3708 }
0x2b54   :  { %v1685_v39 = vadd.f32 1.0, %v3709_v38 }
0x2b56   :  { %3710 = vrcp.f32 %v1685_v39 }
0x2b60   :  { %v3711_v37 = vpop.eup %3710 }
0x2b61   :  { %v1704_v56 = vsub.f32 1.0, %v3711_v37  ;;  %v1710_v49 = vmul.f32 %v3711_v37, %v4275_v15 }
0x2b69   :  { %v1434_v23 = vpop.permute.xlu1 %1433 }
0x2b6a   :  { %v1436_v14 = vmul.f32 %v3705_v24, %v1434_v23 }
0x2b6c   :  { %v1440_v44 = vpack.c.bf16 %v1436_v14, %v4229_v4 }
0x2b6d   :  { %v1463_v46 = vpop.permute.xlu1 %1462 }
0x2b6e   :  { %3414 = vmatprep.mubr.msk.bf16.mxu0 %vm84_vm1, %v1463_v46 }
0x2bb9   :  { %v1695_v57 = vpop.permute.xlu0 %1694 }
0x2bba   :  { %v1697_v40 = vmul.f32 %v3711_v37, %v1695_v57 }
0x2bbc   :  { %1699 = vrot.lane.b32.xlu0 %v1697_v40, %s3852_s8 }
0x2c2e   :  { %v1700_v41 = vpop.permute.xlu0 %1699 }
0x2c2f   :  { %v1702_v18 = vadd.f32 %v1700_v41, %v1528_v62 }
0x2c31   :  { %3712 = vtanh.f32 %v1702_v18 }
0x2c3b   :  { %v3713_v42 = vpop.eup %3712 }
0x2c3c   :  { %1706 = vrot.lane.b32.xlu0 %v3713_v42, %s3854_s17 }
0x2c40   :  { %1464 = vrot.lane.b32.xlu0 %v1440_v44, %s3853_s9 }
0x2c44   :  { %1767 = vrot.lane.b32.xlu0 %v1533_v45, %s3854_s17 }
0x2cae   :  { %v1707_v48 = vpop.permute.xlu0 %1706 }
0x2caf   :  { %v1709_v50 = vmul.f32 %v1707_v48, %v1704_v56 }
0x2cb1   :  { %v4304_v51 = vadd.f32 %v1710_v49, %v1709_v50 }
0x2cb2   :  { %v1465_v59 = vpop.permute.xlu0 %1464 }
0x2cb3   :  { %3415 = vmatmul.mubr.msk.bf16.gmra.mrb[44].mxu0 %vm84_vm1, %v1465_v59  ;;  %v1712_v4 = vpack.c.bf16 %v4304_v51, %v4304_v51 }
0x2cb4   :  { %3438 = vmatprep.mubr.msk.bf16.mxu0 %vm3850_vm0, %v3849_v0 }
0x2cb5   :  { %1714 = vrot.lane.b32.xlu1 %v1712_v4, %s3854_s17 }
0x2cb6   :  { %v1768_v52 = vpop.permute.xlu0 %1767 }
0x2d27   :  { %v1715_v31 = vpop.permute.xlu1 %1714 }
0x2d28   :  { %3439 = vmatmul.mubr.msk.bf16.vlgmr.msra.gmra.mrb[48].mxu0 %vm84_vm1, %v1715_v31 }
0x2d29   :  { %3451 = vmatpush3.bf16.msra.mxu0 %v4233_v61  ;;  %3454 = vmatprep.mubr.msk.bf16.mxu0 %vm3850_vm0, %v3849_v0 }
0x2d2a   :  { %3452 = vmatprep.subr.bf16.mxu0 %v3849_v0 }
0x2d2d   :  { %3453 = vmatpush3.bf16.msra.mxu0 %v4239_v47 }
0x2d2e   :  { %3466 = vmatprep.subr.bf16.mxu0 %v3849_v0 }
0x2d86   :  { %v4319_v58 = vpop.f32.mrb[44].mxu0 }
0x2d87   :  { %v4321_v27 = vpop.f32.mrb[45].mxu0 }
0x2d88   :  { %v4323_v17 = vpop.f32.mrb[46].mxu0  ;;  %v1541_v41 = vadd.f32 %v4260_v25, %v4321_v27 }
0x2d89   :  { %v4325_v26 = vpop.f32.mrb[47].mxu0 }
0x2dfb   :  { %v1753_v53 = vpop.f32.mrb[48].mxu0 }
0x2dfc   :  { %v1770_v54 = vadd.f32 %v1768_v52, %v1753_v53  ;;  %v3440_v55 = vpop.f32.mrb[49].mxu0  ;;  %v1759_v3 = vadd.f32 %v1753_v53, %v1533_v45 }
0x2dfd   :  { %v1756_v62 = vpop.f32.mrb[50].mxu0 }
0x2dfe   :  { %v3441_v63 = vpop.f32.mrb[51].mxu0  ;;  %1772 = vrot.lane.b32.xlu1 %v1770_v54, %s3852_s8  ;;  %v3092_v5 = vmul.f32 -1.442695, %v1759_v3 }
0x2e00   :  { %3714 = vpow2.f32 %v3092_v5 }
0x2e0a   :  { %v3715_v32 = vpop.eup %3714 }
0x2e0b   :  { %v1763_v6 = vadd.f32 1.0, %v3715_v32 }
0x2e0d   :  { %3716 = vrcp.f32 %v1763_v6 }
0x2e17   :  { %v3717_v20 = vpop.eup %3716 }
0x2e18   :  { %v1782_v16 = vsub.f32 1.0, %v3717_v20  ;;  %v1788_v1 = vmul.f32 %v3717_v20, %v4304_v51 }
0x2e70   :  { %v1773_v10 = vpop.permute.xlu1 %1772 }
0x2e71   :  { %v1775_v24 = vmul.f32 %v3717_v20, %v1773_v10  ;;  %v1544_v20 = vadd.f32 %v4260_v25, %v4325_v26 }
0x2e73   :  { %1777 = vrot.lane.b32.xlu0 %v1775_v24, %s3852_s8 }
0x2ee5   :  { %v1778_v35 = vpop.permute.xlu0 %1777 }
0x2ee6   :  { %v1780_v11 = vadd.f32 %v1778_v35, %v1533_v45 }
0x2ee8   :  { %3718 = vtanh.f32 %v1780_v11 }
0x2ef2   :  { %v3719_v12 = vpop.eup %3718 }
0x2ef3   :  { %1784 = vrot.lane.b32.xlu1 %v3719_v12, %s3854_s17 }
0x2ef7   :  { %1845 = vrot.lane.b32.xlu1 %v1536_v13, %s3854_s17 }
0x2f65   :  { %v1785_v19 = vpop.permute.xlu1 %1784 }
0x2f66   :  { %v1787_v9 = vmul.f32 %v1785_v19, %v1782_v16 }
0x2f68   :  { %v4334_v21 = vadd.f32 %v1788_v1, %v1787_v9 }
0x2f69   :  { %v1846_v36 = vpop.permute.xlu1 %1845 }
0x2f6a   :  { %v1790_v22 = vpack.c.bf16 %v4334_v21, %v4334_v21 }
0x2f6c   :  { %1792 = vrot.lane.b32.xlu0 %v1790_v22, %s3854_s17 }
0x2fde   :  { %v1793_v60 = vpop.permute.xlu0 %1792 }
0x2fdf   :  { %3447 = vmatmul.mubr.msk.bf16.vlgmr.msra.gmra.mrb[48].mxu1 %vm84_vm1, %v1793_v60 }
0x2fe0   :  { %3459 = vmatpush3.bf16.msra.mxu1 %v4233_v61  ;;  %3462 = vmatprep.mubr.msk.bf16.mxu1 %vm3850_vm0, %v3849_v0 }
0x2fe1   :  { %3460 = vmatprep.subr.bf16.mxu1 %v3849_v0 }
0x2fe4   :  { %3461 = vmatpush3.bf16.msra.mxu1 %v4239_v47 }
0x2fe5   :  { %3474 = vmatprep.subr.bf16.mxu1 %v3849_v0 }
0x30b2   :  { %v1831_v2 = vpop.f32.mrb[48].mxu1 }
0x30b3   :  { %v1848_v43 = vadd.f32 %v1846_v36, %v1831_v2  ;;  %v3448_v8 = vpop.f32.mrb[49].mxu1  ;;  %v1837_v30 = vadd.f32 %v1831_v2, %v1536_v13 }
0x30b4   :  { %v1834_v28 = vpop.f32.mrb[50].mxu1 }
0x30b5   :  { %1850 = vrot.lane.b32.xlu0 %v1848_v43, %s3852_s8  ;;  %v3449_v29 = vpop.f32.mrb[51].mxu1  ;;  %v3094_v23 = vmul.f32 -1.442695, %v1837_v30 }
0x30b7   :  { %3720 = vpow2.f32 %v3094_v23 }
0x30c1   :  { %v3721_v46 = vpop.eup %3720 }
0x30c2   :  { %v1841_v33 = vadd.f32 1.0, %v3721_v46  ;;  %v1549_v46 = vadd.f32 %v4319_v58, %v4260_v25 }
0x30c4   :  { %3722 = vrcp.f32 %v1841_v33 }
0x30ce   :  { %v3723_v34 = vpop.eup %3722 }
0x30cf   :  { %v1860_v18 = vsub.f32 1.0, %v3723_v34  ;;  %v1866_v42 = vmul.f32 %v3723_v34, %v4334_v21 }
0x3127   :  { %v1851_v38 = vpop.permute.xlu0 %1850 }
0x3128   :  { %v1853_v39 = vmul.f32 %v3723_v34, %v1851_v38 }
0x312a   :  { %1855 = vrot.lane.b32.xlu1 %v1853_v39, %s3852_s8 }
0x319c   :  { %v1856_v37 = vpop.permute.xlu1 %1855 }
0x319d   :  { %v1858_v57 = vadd.f32 %v1856_v37, %v1536_v13 }
0x319f   :  { %3724 = vtanh.f32 %v1858_v57 }
0x31a9   :  { %v3725_v40 = vpop.eup %3724 }
0x31aa   :  { %1862 = vrot.lane.b32.xlu0 %v3725_v40, %s3854_s17 }
0x31ae   :  { %1923 = vrot.lane.b32.xlu0 %v1541_v41, %s3854_s17 }
0x321c   :  { %v1863_v14 = vpop.permute.xlu0 %1862 }
0x321d   :  { %v1865_v44 = vmul.f32 %v1863_v14, %v1860_v18 }
0x321f   :  { %v4353_v45 = vadd.f32 %v1866_v42, %v1865_v44 }
0x3220   :  { %v1924_v49 = vpop.permute.xlu0 %1923 }
0x3221   :  { %v1868_v56 = vpack.c.bf16 %v4353_v45, %v4353_v45 }
0x3223   :  { %1870 = vrot.lane.b32.xlu1 %v1868_v56, %s3854_s17 }
0x3295   :  { %v1871_v48 = vpop.permute.xlu1 %1870 }
0x3296   :  { %3455 = vmatmul.mubr.msk.bf16.vlgmr.msra.gmra.mrb[52].mxu0 %vm84_vm1, %v1871_v48 }
0x3297   :  { %3467 = vmatpush3.bf16.msra.mxu0 %v4233_v61  ;;  %3470 = vmatprep.mubr.msk.bf16.mxu0 %vm3850_vm0, %v3849_v0 }
0x3298   :  { %3468 = vmatprep.subr.bf16.mxu0 %v3849_v0 }
0x329b   :  { %3469 = vmatpush3.bf16.msra.mxu0 %v4239_v47 }
0x3369   :  { %v1909_v50 = vpop.f32.mrb[52].mxu0 }
0x336a   :  { %v1926_v59 = vadd.f32 %v1924_v49, %v1909_v50  ;;  %v3456_v4 = vpop.f32.mrb[53].mxu0  ;;  %v1915_v52 = vadd.f32 %v1909_v50, %v1541_v41 }
0x336b   :  { %v1912_v31 = vpop.f32.mrb[54].mxu0 }
0x336c   :  { %v3457_v27 = vpop.f32.mrb[55].mxu0  ;;  %1928 = vrot.lane.b32.xlu1 %v1926_v59, %s3852_s8  ;;  %v3096_v53 = vmul.f32 -1.442695, %v1915_v52  ;;  %v3598_v52 = vld [vmem:[#allocation2 + $0x60] ss:$8 sps:$4 sm:$0xff]  }
0x336d   :  { %v2180_v27 = vpack.c.bf16 %v4304_v51, %v4275_v15  ;;  %3482 = vmatprep.subr.bf16.mxu0 %v3598_v52  ;;  %v2181_v15 = vpack.c.bf16 %v4353_v45, %v4334_v21  ;;  %v4418_v21 = vld [vmem:[#allocation2 + $0x74] ss:$8 sps:$4 sm:$0xff]  }
0x336e   :  { %3726 = vpow2.f32 %v3096_v53  ;;  %v3601_v53 = vld [vmem:[#allocation2 + $0x70] ss:$8 sps:$4 sm:$0xff]  }
0x3378   :  { %v3727_v54 = vpop.eup %3726 }
0x3379   :  { %v1919_v55 = vadd.f32 1.0, %v3727_v54 }
0x337b   :  { %3728 = vrcp.f32 %v1919_v55 }
0x3385   :  { %v3729_v62 = vpop.eup %3728 }
0x3386   :  { %v1938_v10 = vsub.f32 1.0, %v3729_v62  ;;  %v1944_v35 = vmul.f32 %v3729_v62, %v4353_v45 }
0x33de   :  { %v1929_v63 = vpop.permute.xlu1 %1928 }
0x33df   :  { %v1931_v3 = vmul.f32 %v3729_v62, %v1929_v63 }
0x33e1   :  { %1933 = vrot.lane.b32.xlu0 %v1931_v3, %s3852_s8 }
0x3453   :  { %v1934_v5 = vpop.permute.xlu0 %1933 }
0x3454   :  { %v1936_v32 = vadd.f32 %v1934_v5, %v1541_v41 }
0x3456   :  { %3730 = vtanh.f32 %v1936_v32 }
0x3460   :  { %v3731_v6 = vpop.eup %3730 }
0x3461   :  { %1940 = vrot.lane.b32.xlu1 %v3731_v6, %s3854_s17 }
0x3465   :  { %2001 = vrot.lane.b32.xlu1 %v1544_v20, %s3854_s17 }
0x34d3   :  { %v1941_v24 = vpop.permute.xlu1 %1940 }
0x34d4   :  { %v1943_v11 = vmul.f32 %v1941_v24, %v1938_v10 }
0x34d6   :  { %v4371_v12 = vadd.f32 %v1944_v35, %v1943_v11  ;;  %v4439_v35 = vld [vmem:[%s4591_s2 + $0x3] ss:$0 sm:$0xff] }
0x34d7   :  { %v2002_v26 = vpop.permute.xlu1 %2001 }
0x34d8   :  { %v1946_v13 = vpack.c.bf16 %v4371_v12, %v4371_v12 }
0x34da   :  { %1948 = vrot.lane.b32.xlu0 %v1946_v13, %s3854_s17 }
0x354c   :  { %v1949_v16 = vpop.permute.xlu0 %1948 }
0x354d   :  { %3463 = vmatmul.mubr.msk.bf16.vlgmr.msra.gmra.mrb[52].mxu1 %vm84_vm1, %v1949_v16 }
0x354e   :  { %3475 = vmatpush3.bf16.msra.mxu1 %v4233_v61  ;;  %3478 = vmatprep.mubr.msk.bf16.mxu1 %vm3850_vm0, %v3849_v0 }
0x354f   :  { %3476 = vmatprep.subr.bf16.mxu1 %v3849_v0 }
0x3552   :  { %3477 = vmatpush3.bf16.msra.mxu1 %v4239_v47 }
0x3553   :  { %3494 = vmatprep.subr.bf16.mxu1 %v3849_v0 }
0x3620   :  { %v1987_v19 = vpop.f32.mrb[52].mxu1 }
0x3621   :  { %v2004_v1 = vadd.f32 %v2002_v26, %v1987_v19  ;;  %v3464_v9 = vpop.f32.mrb[53].mxu1  ;;  %v1993_v36 = vadd.f32 %v1987_v19, %v1544_v20 }
0x3622   :  { %v1990_v22 = vpop.f32.mrb[54].mxu1 }
0x3623   :  { %2006 = vrot.lane.b32.xlu0 %v2004_v1, %s3852_s8  ;;  %v3465_v60 = vpop.f32.mrb[55].mxu1  ;;  %v3098_v2 = vmul.f32 -1.442695, %v1993_v36 }
0x3625   :  { %3732 = vpow2.f32 %v3098_v2 }
0x362f   :  { %v3733_v61 = vpop.eup %3732 }
0x3630   :  { %v1997_v43 = vadd.f32 1.0, %v3733_v61 }
0x3632   :  { %3734 = vrcp.f32 %v1997_v43 }
0x363c   :  { %v3735_v8 = vpop.eup %3734 }
0x363d   :  { %v2016_v33 = vsub.f32 1.0, %v3735_v8  ;;  %v2022_v38 = vmul.f32 %v3735_v8, %v4371_v12 }
0x3695   :  { %v2007_v28 = vpop.permute.xlu0 %2006 }
0x3696   :  { %v2009_v29 = vmul.f32 %v3735_v8, %v2007_v28 }
0x3698   :  { %2011 = vrot.lane.b32.xlu1 %v2009_v29, %s3852_s8 }
0x370a   :  { %v2012_v47 = vpop.permute.xlu1 %2011 }
0x370b   :  { %v2014_v30 = vadd.f32 %v2012_v47, %v1544_v20  ;;  %v4410_v20 = vld [vmem:[#allocation2 + $0x64] ss:$8 sps:$4 sm:$0xff]  }
0x370d   :  { %3736 = vtanh.f32 %v2014_v30 }
0x3717   :  { %v3737_v23 = vpop.eup %3736 }
0x3718   :  { %2018 = vrot.lane.b32.xlu0 %v3737_v23, %s3854_s17 }
0x371c   :  { %2079 = vrot.lane.b32.xlu0 %v1549_v46, %s3854_s17 }
0x378a   :  { %v2019_v34 = vpop.permute.xlu0 %2018 }
0x378b   :  { %v2021_v39 = vmul.f32 %v2019_v34, %v2016_v33 }
0x378d   :  { %v4390_v37 = vadd.f32 %v2022_v38, %v2021_v39 }
0x378e   :  { %v2080_v41 = vpop.permute.xlu0 %2079 }
0x378f   :  { %v2024_v57 = vpack.c.bf16 %v4390_v37, %v4390_v37 }
0x3791   :  { %2026 = vrot.lane.b32.xlu1 %v2024_v57, %s3854_s17  ;;  %v1552_v57 = vadd.f32 %v4323_v17, %v4260_v25 }
0x3803   :  { %v2027_v40 = vpop.permute.xlu1 %2026 }
0x3804   :  { %3471 = vmatmul.mubr.msk.bf16.vlgmr.msra.gmra.mrb[56].mxu0 %vm84_vm1, %v2027_v40 }
0x3805   :  { %3483 = vmatpush3.bf16.msra.mxu0 %v3598_v52 }
0x3806   :  { %3484 = vmatprep.subr.bf16.mxu0 %v3601_v53 }
0x3809   :  { %3485 = vmatpush3.bf16.msra.mxu0 %v3601_v53 }
0x380a   :  { %3510 = vmatprep.subr.bf16.mxu0 %v3849_v0 }
0x38d7   :  { %v2065_v18 = vpop.f32.mrb[56].mxu0 }
0x38d8   :  { %v2082_v58 = vadd.f32 %v2080_v41, %v2065_v18  ;;  %v3472_v14 = vpop.f32.mrb[57].mxu0  ;;  %v2071_v56 = vadd.f32 %v2065_v18, %v1549_v46 }
0x38d9   :  { %v2068_v42 = vpop.f32.mrb[58].mxu0 }
0x38da   :  { %v3473_v44 = vpop.f32.mrb[59].mxu0  ;;  %2084 = vrot.lane.b32.xlu1 %v2082_v58, %s3852_s8  ;;  %v3100_v48 = vmul.f32 -1.442695, %v2071_v56 }
0x38dc   :  { %3738 = vpow2.f32 %v3100_v48 }
0x38e6   :  { %v3739_v49 = vpop.eup %3738 }
0x38e7   :  { %v2075_v50 = vadd.f32 1.0, %v3739_v49 }
0x38e9   :  { %3740 = vrcp.f32 %v2075_v50 }
0x38f3   :  { %v3741_v59 = vpop.eup %3740 }
0x38f4   :  { %v2094_v51 = vsub.f32 1.0, %v3741_v59  ;;  %v2100_v5 = vmul.f32 %v3741_v59, %v4390_v37 }
0x394c   :  { %v2085_v4 = vpop.permute.xlu1 %2084 }
0x394d   :  { %v2087_v31 = vmul.f32 %v3741_v59, %v2085_v4 }
0x394f   :  { %2089 = vrot.lane.b32.xlu0 %v2087_v31, %s3852_s8 }
0x3953   :  { %2201 = vrot.lane.b32.xlu0 %v2180_v27, %s3854_s17 }
0x39c1   :  { %v2090_v54 = vpop.permute.xlu0 %2089 }
0x39c2   :  { %v2092_v55 = vadd.f32 %v2090_v54, %v1549_v46 }
0x39c4   :  { %3742 = vtanh.f32 %v2092_v55  ;;  %v2182_v55 = vpack.c.bf16 %v4390_v37, %v4371_v12 }
0x39c5   :  { %v2202_v62 = vpop.permute.xlu0 %2201 }
0x39c6   :  { %3486 = vmatprep.mubr.msk.bf16.mxu0 %vm84_vm1, %v2202_v62 }
0x39ce   :  { %v3743_v63 = vpop.eup %3742 }
0x39cf   :  { %2096 = vrot.lane.b32.xlu1 %v3743_v63, %s3854_s17 }
0x39d3   :  { %2203 = vrot.lane.b32.xlu1 %v2181_v15, %s3854_s17 }
0x3a41   :  { %v2097_v3 = vpop.permute.xlu1 %2096 }
0x3a42   :  { %v2099_v32 = vmul.f32 %v2097_v3, %v2094_v51 }
0x3a44   :  { %v4408_v6 = vadd.f32 %v2100_v5, %v2099_v32 }
0x3a45   :  { %v2204_v10 = vpop.permute.xlu1 %2203 }
0x3a46   :  { %v2102_v24 = vpack.c.bf16 %v4408_v6, %v4408_v6  ;;  %3487 = vmatmul.mubr.msk.bf16.vlgmr.msra.gmra.mrb[60].mxu0 %vm84_vm1, %v2204_v10 }
0x3a47   :  { %3511 = vmatpush3.bf16.msra.mxu0 %v4410_v20 }
0x3a48   :  { %2104 = vrot.lane.b32.xlu0 %v2102_v24, %s3854_s17  ;;  %3512 = vmatprep.subr.bf16.mxu0 %v3849_v0 }
0x3a4b   :  { %3513 = vmatpush3.bf16.msra.mxu0 %v4418_v21 }
0x3a4c   :  { %3526 = vmatprep.subr.bf16.mxu0 %v3849_v0 }
0x3aba   :  { %v2105_v45 = vpop.permute.xlu0 %2104 }
0x3abb   :  { %3479 = vmatmul.mubr.msk.bf16.vlgmr.msra.gmra.mrb[56].mxu1 %vm84_vm1, %v2105_v45 }
0x3abc   :  { %3495 = vmatpush3.bf16.msra.mxu1 %v4410_v20  ;;  %3498 = vmatprep.mubr.msk.bf16.mxu1 %vm3850_vm0, %v3849_v0 }
0x3abd   :  { %3496 = vmatprep.subr.bf16.mxu1 %v3849_v0 }
0x3ac0   :  { %3497 = vmatpush3.bf16.msra.mxu1 %v4418_v21 }
0x3ac1   :  { %3502 = vmatprep.subr.bf16.mxu1 %v3849_v0 }
0x3ac3   :  { %3499 = vmatmul.mubr.bf16.vlgmr.msra.gmra.mrb[60].mxu1 %v3851_v7 }
0x3ac4   :  { %3503 = vmatpush3.bf16.msra.mxu1 %v4410_v20  ;;  %3506 = vmatprep.mubr.msk.bf16.mxu1 %vm3850_vm0, %v3849_v0 }
0x3ac5   :  { %3504 = vmatprep.subr.bf16.mxu1 %v3849_v0 }
0x3ac8   :  { %3505 = vmatpush3.bf16.msra.mxu1 %v4418_v21 }
0x3ac9   :  { %3518 = vmatprep.subr.bf16.mxu1 %v3849_v0 }
0x3b19   :  { %v4441_v11 = vpop.f32.mrb[60].mxu0 }
0x3b1a   :  { %v2267_v13 = vpop.f32.mrb[61].mxu0 }
0x3b1b   :  { %v2268_v7 = vadd.f32 %v4439_v35, %v2267_v13  ;;  %v4444_v16 = vpop.f32.mrb[62].mxu0 }
0x3b1c   :  { %v2270_v26 = vpop.f32.mrb[63].mxu0 }
0x3b1d   :  { %2354 = vrot.lane.b32.xlu1 %v2268_v7, %s3854_s17  ;;  %v2271_v48 = vadd.f32 %v4439_v35, %v2270_v26 }
0x3b8e   :  { %v2143_v19 = vpop.f32.mrb[56].mxu1 }
0x3b8f   :  { %v3480_v1 = vpop.f32.mrb[57].mxu1  ;;  %v2355_v60 = vpop.permute.xlu1 %2354  ;;  %v2149_v25 = vadd.f32 %v2143_v19, %v1552_v57 }
0x3b90   :  { %v2146_v9 = vpop.f32.mrb[58].mxu1 }
0x3b91   :  { %v3481_v22 = vpop.f32.mrb[59].mxu1  ;;  %v3102_v17 = vmul.f32 -1.442695, %v2149_v25 }
0x3b96   :  { %v2340_v36 = vpop.f32.mrb[60].mxu1 }
0x3b97   :  { %v2357_v2 = vadd.f32 %v2355_v60, %v2340_v36  ;;  %v3500_v61 = vpop.f32.mrb[61].mxu1  ;;  %v2346_v28 = vadd.f32 %v2340_v36, %v2268_v7 }
0x3b98   :  { %v2343_v43 = vpop.f32.mrb[62].mxu1 }
0x3b99   :  { %2359 = vrot.lane.b32.xlu0 %v2357_v2, %s3852_s8  ;;  %v3501_v8 = vpop.f32.mrb[63].mxu1  ;;  %v3113_v29 = vmul.f32 -1.442695, %v2346_v28  ;;  %v2276_v43 = vadd.f32 %v4441_v11, %v4439_v35 }
0x3b9b   :  { %3744 = vpow2.f32 %v3113_v29 }
0x3ba5   :  { %v3745_v47 = vpop.eup %3744 }
0x3ba6   :  { %v2350_v30 = vadd.f32 1.0, %v3745_v47 }
0x3ba8   :  { %3746 = vrcp.f32 %v2350_v30 }
0x3bb2   :  { %v3747_v23 = vpop.eup %3746 }
0x3bb3   :  { %v2369_v40 = vsub.f32 1.0, %v3747_v23  ;;  %v2375_v18 = vmul.f32 0.0, %v3747_v23 }
0x3c0b   :  { %v2360_v46 = vpop.permute.xlu0 %2359 }
0x3c0c   :  { %v2362_v33 = vmul.f32 %v3747_v23, %v2360_v46 }
0x3c0e   :  { %2364 = vrot.lane.b32.xlu1 %v2362_v33, %s3852_s8 }
0x3c80   :  { %v2365_v34 = vpop.permute.xlu1 %2364 }
0x3c81   :  { %v2367_v38 = vadd.f32 %v2365_v34, %v2268_v7 }
0x3c83   :  { %3748 = vtanh.f32 %v2367_v38 }
0x3c84   :  { %3750 = vpow2.f32 %v3102_v17 }
0x3c8d   :  { %v3749_v39 = vpop.eup %3748 }
0x3c8e   :  { %2371 = vrot.lane.b32.xlu0 %v3749_v39, %s3854_s17  ;;  %v3751_v49 = vpop.eup %3750 }
0x3c8f   :  { %v2153_v50 = vadd.f32 1.0, %v3751_v49 }
0x3c91   :  { %3752 = vrcp.f32 %v2153_v50 }
0x3c92   :  { %2157 = vrot.lane.b32.xlu0 %v1552_v57, %s3854_s17 }
0x3c9b   :  { %v3753_v59 = vpop.eup %3752 }
0x3c9c   :  { %v2172_v9 = vsub.f32 1.0, %v3753_v59  ;;  %v2178_v60 = vmul.f32 %v3753_v59, %v4408_v6 }
0x3d00   :  { %v2372_v41 = vpop.permute.xlu0 %2371 }
0x3d01   :  { %v2374_v58 = vmul.f32 %v2372_v41, %v2369_v40 }
0x3d03   :  { %v4453_v14 = vadd.f32 %v2375_v18, %v2374_v58 }
0x3d04   :  { %v2158_v42 = vpop.permute.xlu0 %2157 }
0x3d05   :  { %v2377_v44 = vpack.c.bf16 %v4453_v14, %v4453_v14  ;;  %v2160_v56 = vadd.f32 %v2158_v42, %v2143_v19 }
0x3d07   :  { %2379 = vrot.lane.b32.xlu1 %v2377_v44, %s3854_s17  ;;  %2162 = vrot.lane.b32.xlu0 %v2160_v56, %s3852_s8 }
0x3d0b   :  { %2432 = vrot.lane.b32.xlu1 %v2271_v48, %s3854_s17 }
0x3d79   :  { %v2380_v4 = vpop.permute.xlu1 %2379  ;;  %v2163_v31 = vpop.permute.xlu0 %2162 }
0x3d7a   :  { %v2165_v27 = vmul.f32 %v3753_v59, %v2163_v31  ;;  %3507 = vmatmul.mubr.msk.bf16.vlgmr.msra.gmra.mrb[64].mxu1 %vm84_vm1, %v2380_v4  ;;  %v2279_v4 = vadd.f32 %v4444_v16, %v4439_v35 }
0x3d7b   :  { %3519 = vmatpush3.bf16.msra.mxu1 %v4410_v20  ;;  %3522 = vmatprep.mubr.msk.bf16.mxu1 %vm3850_vm0, %v3849_v0 }
0x3d7c   :  { %2167 = vrot.lane.b32.xlu0 %v2165_v27, %s3852_s8  ;;  %3520 = vmatprep.subr.bf16.mxu1 %v3849_v0 }
0x3d7d   :  { %v2433_v62 = vpop.permute.xlu1 %2432 }
0x3d7f   :  { %3521 = vmatpush3.bf16.msra.mxu1 %v4418_v21 }
0x3d80   :  { %3534 = vmatprep.subr.bf16.mxu1 %v3849_v0 }
0x3dee   :  { %v2168_v52 = vpop.permute.xlu0 %2167 }
0x3def   :  { %v2170_v53 = vadd.f32 %v2168_v52, %v1552_v57 }
0x3df1   :  { %3754 = vtanh.f32 %v2170_v53 }
0x3dfb   :  { %v3755_v54 = vpop.eup %3754 }
0x3dfc   :  { %2174 = vrot.lane.b32.xlu0 %v3755_v54, %s3854_s17 }
0x3e00   :  { %2205 = vrot.lane.b32.xlu0 %v2182_v55, %s3854_s17 }
0x3e4d   :  { %v2418_v63 = vpop.f32.mrb[64].mxu1 }
0x3e4e   :  { %v2435_v15 = vadd.f32 %v2433_v62, %v2418_v63  ;;  %v3508_v51 = vpop.f32.mrb[65].mxu1  ;;  %v2424_v24 = vadd.f32 %v2418_v63, %v2271_v48 }
0x3e4f   :  { %v2421_v3 = vpop.f32.mrb[66].mxu1 }
0x3e50   :  { %2437 = vrot.lane.b32.xlu1 %v2435_v15, %s3852_s8  ;;  %v3509_v5 = vpop.f32.mrb[67].mxu1  ;;  %v3115_v45 = vmul.f32 -1.442695, %v2424_v24 }
0x3e52   :  { %3756 = vpow2.f32 %v3115_v45 }
0x3e5c   :  { %v3757_v13 = vpop.eup %3756 }
0x3e5d   :  { %v2428_v7 = vadd.f32 1.0, %v3757_v13 }
0x3e5f   :  { %3758 = vrcp.f32 %v2428_v7 }
0x3e69   :  { %v3759_v12 = vpop.eup %3758 }
0x3e6a   :  { %v2447_v8 = vsub.f32 1.0, %v3759_v12  ;;  %v2453_v29 = vmul.f32 %v3759_v12, %v4453_v14 }
0x3e6e   :  { %v2175_v32 = vpop.permute.xlu0 %2174 }
0x3e6f   :  { %v2177_v22 = vmul.f32 %v2175_v32, %v2172_v9 }
0x3e71   :  { %v2179_v36 = vadd.f32 %v2178_v60, %v2177_v22 }
0x3e72   :  { %v2206_v10 = vpop.permute.xlu0 %2205 }
0x3e73   :  { %3490 = vmatprep.mubr.msk.bf16.mxu0 %vm84_vm1, %v2206_v10  ;;  %v2183_v61 = vpack.c.bf16 %v2179_v36, %v4408_v6 }
0x3ec2   :  { %v2438_v37 = vpop.permute.xlu1 %2437 }
0x3ec3   :  { %v2440_v26 = vmul.f32 %v3759_v12, %v2438_v37 }
0x3ec5   :  { %2442 = vrot.lane.b32.xlu1 %v2440_v26, %s3852_s8 }
0x3f37   :  { %v2443_v19 = vpop.permute.xlu1 %2442 }
0x3f38   :  { %v2445_v1 = vadd.f32 %v2443_v19, %v2271_v48 }
0x3f3a   :  { %3760 = vtanh.f32 %v2445_v1 }
0x3f44   :  { %v3761_v2 = vpop.eup %3760 }
0x3f45   :  { %2449 = vrot.lane.b32.xlu1 %v3761_v2, %s3854_s17 }
0x3f49   :  { %2207 = vrot.lane.b32.xlu1 %v2183_v61, %s3854_s17 }
0x3f4d   :  { %2510 = vrot.lane.b32.xlu1 %v2276_v43, %s3854_s17 }
0x3fb7   :  { %v2450_v28 = vpop.permute.xlu1 %2449 }
0x3fb8   :  { %v2452_v47 = vmul.f32 %v2450_v28, %v2447_v8 }
0x3fba   :  { %v2454_v30 = vadd.f32 %v2453_v29, %v2452_v47 }
0x3fbb   :  { %v2208_v23 = vpop.permute.xlu1 %2207 }
0x3fbc   :  { %v2455_v46 = vpack.c.bf16 %v2454_v30, %v2454_v30  ;;  %3491 = vmatmul.mubr.msk.bf16.gmra.mrb[64].mxu0 %vm84_vm1, %v2208_v23 }
0x3fbd   :  { %3514 = vmatprep.mubr.msk.bf16.mxu0 %vm3850_vm0, %v3849_v0 }
0x3fbe   :  { %2457 = vrot.lane.b32.xlu0 %v2455_v46, %s3854_s17 }
0x3fbf   :  { %v2511_v39 = vpop.permute.xlu1 %2510 }
0x4030   :  { %v2458_v6 = vpop.permute.xlu0 %2457 }
0x4031   :  { %3515 = vmatmul.mubr.msk.bf16.vlgmr.msra.gmra.mrb[68].mxu0 %vm84_vm1, %v2458_v6 }
0x4032   :  { %3527 = vmatpush3.bf16.msra.mxu0 %v4410_v20  ;;  %3530 = vmatprep.mubr.msk.bf16.mxu0 %vm3850_vm0, %v3849_v0 }
0x4033   :  { %3528 = vmatprep.subr.bf16.mxu0 %v3849_v0 }
0x4036   :  { %3529 = vmatpush3.bf16.msra.mxu0 %v4418_v21 }
0x4037   :  { %3542 = vmatprep.subr.bf16.mxu0 %v3849_v0 }
0x408f   :  { %v4495_v11 = vpop.f32.mrb[64].mxu0 }
0x4090   :  { %v4497_v33 = vpop.f32.mrb[65].mxu0 }
0x4091   :  { %v4499_v34 = vpop.f32.mrb[66].mxu0  ;;  %v2284_v1 = vadd.f32 %v4439_v35, %v4497_v33 }
0x4092   :  { %v4501_v38 = vpop.f32.mrb[67].mxu0 }
0x4104   :  { %v2496_v57 = vpop.f32.mrb[68].mxu0 }
0x4105   :  { %v2513_v40 = vadd.f32 %v2511_v39, %v2496_v57  ;;  %v3516_v41 = vpop.f32.mrb[69].mxu0  ;;  %v2502_v14 = vadd.f32 %v2496_v57, %v2276_v43 }
0x4106   :  { %v2499_v18 = vpop.f32.mrb[70].mxu0 }
0x4107   :  { %v3517_v58 = vpop.f32.mrb[71].mxu0  ;;  %2515 = vrot.lane.b32.xlu0 %v2513_v40, %s3852_s8  ;;  %v3117_v42 = vmul.f32 -1.442695, %v2502_v14 }
0x4109   :  { %3762 = vpow2.f32 %v3117_v42  ;;  %v2287_v42 = vadd.f32 %v4439_v35, %v4501_v38 }
0x4113   :  { %v3763_v44 = vpop.eup %3762 }
0x4114   :  { %v2506_v56 = vadd.f32 1.0, %v3763_v44 }
0x4116   :  { %3764 = vrcp.f32 %v2506_v56 }
0x4120   :  { %v3765_v48 = vpop.eup %3764 }
0x4121   :  { %v2525_v31 = vsub.f32 1.0, %v3765_v48  ;;  %v2531_v52 = vmul.f32 %v3765_v48, %v2454_v30 }
0x4179   :  { %v2516_v25 = vpop.permute.xlu0 %2515 }
0x417a   :  { %v2518_v17 = vmul.f32 %v3765_v48, %v2516_v25 }
0x417c   :  { %2520 = vrot.lane.b32.xlu1 %v2518_v17, %s3852_s8 }
0x41ee   :  { %v2521_v49 = vpop.permute.xlu1 %2520 }
0x41ef   :  { %v2523_v50 = vadd.f32 %v2521_v49, %v2276_v43 }
0x41f1   :  { %3766 = vtanh.f32 %v2523_v50 }
0x41fb   :  { %v3767_v59 = vpop.eup %3766 }
0x41fc   :  { %2527 = vrot.lane.b32.xlu0 %v3767_v59, %s3854_s17 }
0x4200   :  { %2588 = vrot.lane.b32.xlu0 %v2279_v4, %s3854_s17 }
0x426e   :  { %v2528_v27 = vpop.permute.xlu0 %2527 }
0x426f   :  { %v2530_v53 = vmul.f32 %v2528_v27, %v2525_v31 }
0x4271   :  { %v2532_v54 = vadd.f32 %v2531_v52, %v2530_v53 }
0x4272   :  { %v2589_v16 = vpop.permute.xlu0 %2588 }
0x4273   :  { %v2533_v55 = vpack.c.bf16 %v2532_v54, %v2532_v54 }
0x4275   :  { %2535 = vrot.lane.b32.xlu1 %v2533_v55, %s3854_s17 }
0x42e7   :  { %v2536_v62 = vpop.permute.xlu1 %2535 }
0x42e8   :  { %3523 = vmatmul.mubr.msk.bf16.vlgmr.msra.gmra.mrb[68].mxu1 %vm84_vm1, %v2536_v62 }
0x42e9   :  { %3535 = vmatpush3.bf16.msra.mxu1 %v4410_v20  ;;  %3538 = vmatprep.mubr.msk.bf16.mxu1 %vm3850_vm0, %v3849_v0 }
0x42ea   :  { %3536 = vmatprep.subr.bf16.mxu1 %v3849_v0 }
0x42ed   :  { %3537 = vmatpush3.bf16.msra.mxu1 %v4418_v21 }
0x42ee   :  { %3550 = vmatprep.subr.bf16.mxu1 %v3849_v0 }
0x43bb   :  { %v2574_v63 = vpop.f32.mrb[68].mxu1 }
0x43bc   :  { %v2591_v15 = vadd.f32 %v2589_v16, %v2574_v63  ;;  %v3524_v51 = vpop.f32.mrb[69].mxu1  ;;  %v2580_v32 = vadd.f32 %v2574_v63, %v2279_v4 }
0x43bd   :  { %v2577_v3 = vpop.f32.mrb[70].mxu1 }
0x43be   :  { %2593 = vrot.lane.b32.xlu1 %v2591_v15, %s3852_s8  ;;  %v3525_v5 = vpop.f32.mrb[71].mxu1  ;;  %v3119_v10 = vmul.f32 -1.442695, %v2580_v32  ;;  %v2292_v3 = vadd.f32 %v4495_v11, %v4439_v35 }
0x43c0   :  { %3768 = vpow2.f32 %v3119_v10 }
0x43ca   :  { %v3769_v24 = vpop.eup %3768 }
0x43cb   :  { %v2584_v45 = vadd.f32 1.0, %v3769_v24 }
0x43cd   :  { %3770 = vrcp.f32 %v2584_v45 }
0x43d7   :  { %v3771_v13 = vpop.eup %3770 }
0x43d8   :  { %v2603_v9 = vsub.f32 1.0, %v3771_v13  ;;  %v2609_v60 = vmul.f32 %v3771_v13, %v2532_v54 }
0x4430   :  { %v2594_v7 = vpop.permute.xlu1 %2593 }
0x4431   :  { %v2596_v12 = vmul.f32 %v3771_v13, %v2594_v7 }
0x4433   :  { %2598 = vrot.lane.b32.xlu0 %v2596_v12, %s3852_s8 }
0x44a5   :  { %v2599_v37 = vpop.permute.xlu0 %2598 }
0x44a6   :  { %v2601_v26 = vadd.f32 %v2599_v37, %v2279_v4 }
0x44a8   :  { %3772 = vtanh.f32 %v2601_v26 }
0x44b2   :  { %v3773_v19 = vpop.eup %3772 }
0x44b3   :  { %2605 = vrot.lane.b32.xlu1 %v3773_v19, %s3854_s17 }
0x44b7   :  { %2666 = vrot.lane.b32.xlu1 %v2284_v1, %s3854_s17 }
0x4525   :  { %v2606_v22 = vpop.permute.xlu1 %2605 }
0x4526   :  { %v2608_v36 = vmul.f32 %v2606_v22, %v2603_v9 }
0x4528   :  { %v2610_v2 = vadd.f32 %v2609_v60, %v2608_v36 }
0x4529   :  { %v2667_v8 = vpop.permute.xlu1 %2666 }
0x452a   :  { %v2611_v61 = vpack.c.bf16 %v2610_v2, %v2610_v2 }
0x452c   :  { %2613 = vrot.lane.b32.xlu0 %v2611_v61, %s3854_s17 }
0x459e   :  { %v2614_v43 = vpop.permute.xlu0 %2613 }
0x459f   :  { %3531 = vmatmul.mubr.msk.bf16.vlgmr.msra.gmra.mrb[72].mxu0 %vm84_vm1, %v2614_v43 }
0x45a0   :  { %3543 = vmatpush3.bf16.msra.mxu0 %v4410_v20  ;;  %3546 = vmatprep.mubr.msk.bf16.mxu0 %vm3850_vm0, %v3849_v0 }
0x45a1   :  { %3544 = vmatprep.subr.bf16.mxu0 %v3849_v0 }
0x45a4   :  { %3545 = vmatpush3.bf16.msra.mxu0 %v4418_v21 }
0x45a5   :  { %3558 = vmatprep.subr.bf16.mxu0 %v3849_v0 }
0x4672   :  { %v2652_v28 = vpop.f32.mrb[72].mxu0 }
0x4673   :  { %v2669_v29 = vadd.f32 %v2667_v8, %v2652_v28  ;;  %v3532_v47 = vpop.f32.mrb[73].mxu0  ;;  %v2658_v46 = vadd.f32 %v2652_v28, %v2284_v1 }
0x4674   :  { %v2655_v30 = vpop.f32.mrb[74].mxu0  ;;  %v2295_v47 = vadd.f32 %v4499_v34, %v4439_v35 }
0x4675   :  { %v3533_v23 = vpop.f32.mrb[75].mxu0  ;;  %2671 = vrot.lane.b32.xlu0 %v2669_v29, %s3852_s8  ;;  %v3121_v6 = vmul.f32 -1.442695, %v2658_v46 }
0x4677   :  { %3774 = vpow2.f32 %v3121_v6 }
0x4681   :  { %v3775_v33 = vpop.eup %3774 }
0x4682   :  { %v2662_v39 = vadd.f32 1.0, %v3775_v33 }
0x4684   :  { %3776 = vrcp.f32 %v2662_v39 }
0x468e   :  { %v3777_v57 = vpop.eup %3776 }
0x468f   :  { %v2681_v44 = vsub.f32 1.0, %v3777_v57  ;;  %v2687_v48 = vmul.f32 %v3777_v57, %v2610_v2 }
0x46e7   :  { %v2672_v40 = vpop.permute.xlu0 %2671 }
0x46e8   :  { %v2674_v41 = vmul.f32 %v3777_v57, %v2672_v40 }
0x46ea   :  { %2676 = vrot.lane.b32.xlu1 %v2674_v41, %s3852_s8 }
0x475c   :  { %v2677_v18 = vpop.permute.xlu1 %2676 }
0x475d   :  { %v2679_v58 = vadd.f32 %v2677_v18, %v2284_v1 }
0x475f   :  { %3778 = vtanh.f32 %v2679_v58 }
0x4769   :  { %v3779_v14 = vpop.eup %3778 }
0x476a   :  { %2683 = vrot.lane.b32.xlu0 %v3779_v14, %s3854_s17 }
0x476e   :  { %2744 = vrot.lane.b32.xlu0 %v2287_v42, %s3854_s17 }
0x47dc   :  { %v2684_v56 = vpop.permute.xlu0 %2683 }
0x47dd   :  { %v2686_v25 = vmul.f32 %v2684_v56, %v2681_v44 }
0x47df   :  { %v2688_v17 = vadd.f32 %v2687_v48, %v2686_v25 }
0x47e0   :  { %v2745_v38 = vpop.permute.xlu0 %2744 }
0x47e1   :  { %v2689_v49 = vpack.c.bf16 %v2688_v17, %v2688_v17 }
0x47e3   :  { %2691 = vrot.lane.b32.xlu1 %v2689_v49, %s3854_s17 }
0x4855   :  { %v2692_v50 = vpop.permute.xlu1 %2691 }
0x4856   :  { %3539 = vmatmul.mubr.msk.bf16.vlgmr.msra.gmra.mrb[72].mxu1 %vm84_vm1, %v2692_v50 }
0x4857   :  { %3551 = vmatpush3.bf16.msra.mxu1 %v4410_v20  ;;  %3554 = vmatprep.mubr.msk.bf16.mxu1 %vm3850_vm0, %v3849_v0 }
0x4858   :  { %3552 = vmatprep.subr.bf16.mxu1 %v3849_v0 }
0x485b   :  { %3553 = vmatpush3.bf16.msra.mxu1 %v4418_v21 }
0x4929   :  { %v2730_v59 = vpop.f32.mrb[72].mxu1 }
0x492a   :  { %v2747_v4 = vadd.f32 %v2745_v38, %v2730_v59  ;;  %v3540_v31 = vpop.f32.mrb[73].mxu1  ;;  %v2736_v53 = vadd.f32 %v2730_v59, %v2287_v42  ;;  %v3604_v38 = vld [vmem:[%s4592_s3] sm:$0xff]   ;;  %v3605_v59 = vld [vmem:[%s4592_s3 + $0x8] sm:$0xff]  }
0x492b   :  { %v2733_v27 = vpop.f32.mrb[74].mxu1 }
0x492c   :  { %2749 = vrot.lane.b32.xlu1 %v2747_v4, %s3852_s8  ;;  %v3541_v52 = vpop.f32.mrb[75].mxu1  ;;  %v3123_v54 = vmul.f32 -1.442695, %v2736_v53 }
0x492e   :  { %3780 = vpow2.f32 %v3123_v54 }
0x4938   :  { %v3781_v55 = vpop.eup %3780 }
0x4939   :  { %v2740_v20 = vadd.f32 1.0, %v3781_v55 }
0x493b   :  { %3782 = vrcp.f32 %v2740_v20 }
0x4945   :  { %v3783_v62 = vpop.eup %3782 }
0x4946   :  { %v2759_v5 = vsub.f32 1.0, %v3783_v62  ;;  %v2765_v10 = vmul.f32 %v3783_v62, %v2688_v17 }
0x499e   :  { %v2750_v16 = vpop.permute.xlu1 %2749 }
0x499f   :  { %v2752_v63 = vmul.f32 %v3783_v62, %v2750_v16  ;;  %v2930_v62 = vlaneseq }
0x49a1   :  { %2754 = vrot.lane.b32.xlu0 %v2752_v63, %s3852_s8  ;;  %v2931_v16 = vshrl.u32 %v2930_v62, 7 }
0x4a13   :  { %v2755_v21 = vpop.permute.xlu0 %2754 }
0x4a14   :  { %v2757_v15 = vadd.f32 %v2755_v21, %v2287_v42  ;;  %v2932_v21 = vsub.s32 0, %v2931_v16 }
0x4a16   :  { %3784 = vtanh.f32 %v2757_v15 }
0x4a20   :  { %v3785_v51 = vpop.eup %3784 }
0x4a21   :  { %2761 = vrot.lane.b32.xlu1 %v3785_v51, %s3854_s17 }
0x4a25   :  { %2822 = vrot.lane.b32.xlu1 %v2292_v3, %s3854_s17 }
0x4a93   :  { %v2762_v32 = vpop.permute.xlu1 %2761 }
0x4a94   :  { %v2764_v24 = vmul.f32 %v2762_v32, %v2759_v5 }
0x4a96   :  { %v2766_v45 = vadd.f32 %v2765_v10, %v2764_v24 }
0x4a97   :  { %v2823_v12 = vpop.permute.xlu1 %2822 }
0x4a98   :  { %v2767_v13 = vpack.c.bf16 %v2766_v45, %v2766_v45 }
0x4a9a   :  { %2769 = vrot.lane.b32.xlu0 %v2767_v13, %s3854_s17 }
0x4b0c   :  { %v2770_v7 = vpop.permute.xlu0 %2769 }
0x4b0d   :  { %3547 = vmatmul.mubr.msk.bf16.vlgmr.msra.gmra.mrb[76].mxu0 %vm84_vm1, %v2770_v7 }
0x4b0e   :  { %3562 = vmatprep.mubr.msk.bf16.mxu0 %vm3850_vm0, %v3849_v0  ;;  %3559 = vmatpush3.bf16.msra.mxu0 %v3604_v38 }
0x4b0f   :  { %3560 = vmatprep.subr.bf16.mxu0 %v3849_v0  ;;  %v2927_v0 = vld [vmem:[%s4592_s3 + $0x10] sm:$0x1] }
0x4b10   :  { %v2928_v63 = vunpack.c.l.bf16 %v2927_v0 }
0x4b12   :  { %3561 = vmatpush3.bf16.msra.mxu0 %v3605_v59  ;;  %v2933_v15 = vrot.slane %v2928_v63, %v2932_v21 }
0x4be0   :  { %v2808_v37 = vpop.f32.mrb[76].mxu0 }
0x4be1   :  { %v2825_v26 = vadd.f32 %v2823_v12, %v2808_v37  ;;  %v3548_v11 = vpop.f32.mrb[77].mxu0  ;;  %v2814_v9 = vadd.f32 %v2808_v37, %v2292_v3 }
0x4be2   :  { %v2811_v19 = vpop.f32.mrb[78].mxu0 }
0x4be3   :  { %v3549_v1 = vpop.f32.mrb[79].mxu0  ;;  %2827 = vrot.lane.b32.xlu0 %v2825_v26, %s3852_s8  ;;  %v3125_v22 = vmul.f32 -1.442695, %v2814_v9 }
0x4be5   :  { %3786 = vpow2.f32 %v3125_v22 }
0x4bef   :  { %v3787_v60 = vpop.eup %3786 }
0x4bf0   :  { %v2818_v36 = vadd.f32 1.0, %v3787_v60 }
0x4bf2   :  { %3788 = vrcp.f32 %v2818_v36 }
0x4bfc   :  { %v3789_v2 = vpop.eup %3788 }
0x4bfd   :  { %v2837_v30 = vsub.f32 1.0, %v3789_v2  ;;  %v2843_v46 = vmul.f32 %v3789_v2, %v2766_v45 }
0x4c55   :  { %v2828_v61 = vpop.permute.xlu0 %2827 }
0x4c56   :  { %v2830_v43 = vmul.f32 %v3789_v2, %v2828_v61 }
0x4c58   :  { %2832 = vrot.lane.b32.xlu1 %v2830_v43, %s3852_s8 }
0x4cca   :  { %v2833_v8 = vpop.permute.xlu1 %2832 }
0x4ccb   :  { %v2835_v28 = vadd.f32 %v2833_v8, %v2292_v3 }
0x4ccd   :  { %3790 = vtanh.f32 %v2835_v28 }
0x4cd7   :  { %v3791_v29 = vpop.eup %3790 }
0x4cd8   :  { %2839 = vrot.lane.b32.xlu0 %v3791_v29, %s3854_s17 }
0x4cdc   :  { %2900 = vrot.lane.b32.xlu0 %v2295_v47, %s3854_s17 }
0x4d4a   :  { %v2840_v23 = vpop.permute.xlu0 %2839 }
0x4d4b   :  { %v2842_v6 = vmul.f32 %v2840_v23, %v2837_v30 }
0x4d4d   :  { %v2844_v33 = vadd.f32 %v2843_v46, %v2842_v6 }
0x4d4e   :  { %v2901_v40 = vpop.permute.xlu0 %2900 }
0x4d4f   :  { %v2845_v39 = vpack.c.bf16 %v2844_v33, %v2844_v33 }
0x4d51   :  { %2847 = vrot.lane.b32.xlu1 %v2845_v39, %s3854_s17 }
0x4dc3   :  { %v2848_v57 = vpop.permute.xlu1 %2847 }
0x4dc4   :  { %3555 = vmatmul.mubr.msk.bf16.vlgmr.msra.gmra.mrb[76].mxu1 %vm84_vm1, %v2848_v57 }
0x4e97   :  { %v2886_v41 = vpop.f32.mrb[76].mxu1 }
0x4e98   :  { %v2903_v18 = vadd.f32 %v2901_v40, %v2886_v41  ;;  %v3556_v58 = vpop.f32.mrb[77].mxu1  ;;  %v2892_v34 = vadd.f32 %v2886_v41, %v2295_v47 }
0x4e99   :  { %v2889_v14 = vpop.f32.mrb[78].mxu1 }
0x4e9a   :  { %2905 = vrot.lane.b32.xlu1 %v2903_v18, %s3852_s8  ;;  %v3557_v35 = vpop.f32.mrb[79].mxu1  ;;  %v3127_v42 = vmul.f32 -1.442695, %v2892_v34 }
0x4e9c   :  { %3792 = vpow2.f32 %v3127_v42 }
0x4ea6   :  { %v3793_v44 = vpop.eup %3792 }
0x4ea7   :  { %v2896_v56 = vadd.f32 1.0, %v3793_v44 }
0x4ea9   :  { %3794 = vrcp.f32 %v2896_v56 }
0x4eb3   :  { %v3795_v48 = vpop.eup %3794 }
0x4eb4   :  { %v2915_v31 = vsub.f32 1.0, %v3795_v48  ;;  %v2921_v52 = vmul.f32 %v3795_v48, %v2844_v33 }
0x4f0c   :  { %v2906_v25 = vpop.permute.xlu1 %2905 }
0x4f0d   :  { %v2908_v17 = vmul.f32 %v3795_v48, %v2906_v25 }
0x4f0f   :  { %2910 = vrot.lane.b32.xlu0 %v2908_v17, %s3852_s8 }
0x4f81   :  { %v2911_v49 = vpop.permute.xlu0 %2910 }
0x4f82   :  { %v2913_v50 = vadd.f32 %v2911_v49, %v2295_v47 }
0x4f84   :  { %3796 = vtanh.f32 %v2913_v50 }
0x4f8e   :  { %v3797_v4 = vpop.eup %3796 }
0x4f8f   :  { %2917 = vrot.lane.b32.xlu1 %v3797_v4, %s3854_s17 }
0x5001   :  { %v2918_v27 = vpop.permute.xlu1 %2917 }
0x5002   :  { %v2920_v53 = vmul.f32 %v2918_v27, %v2915_v31 }
0x5004   :  { %v2922_v54 = vadd.f32 %v2921_v52, %v2920_v53 }
0x5006   :  { %v2929_v55 = vpack.c.bf16 %v2922_v54, %v2922_v54 }
0x5008   :  { %2935 = vrot.lane.b32.xlu0 %v2929_v55, %s3854_s17 }
0x507a   :  { %v2936_v20 = vpop.permute.xlu0 %2935 }
0x507b   :  { %3563 = vmatmul.mubr.msk.bf16.vlgmr.msra.gmra.mrb[80].mxu0 %vm84_vm1, %v2936_v20 }
0x514e   :  { %v2986_v51 = vpop.f32.mrb[80].mxu0 }
0x514f   :  { %v2987_v3 = vadd.f32 %v2986_v51, %v2933_v15  ;;  %v3564_v5 = vpop.f32.mrb[81].mxu0 }
0x5150   :  { %v2989_v32 = vpop.f32.mrb[82].mxu0 }
0x5151   :  { %v2992_v10 = vmax.f32 %v2987_v3, 0.0  ;;  %v3565_v24 = vpop.f32.mrb[83].mxu0 }
0x5153   :  { %2993 = vst [vmem:[#allocation5] sm:$0xff] %v2992_v10 }
0x5154   :  { %3831 = shalt.err (!%p3828_p12)
}
0x5155   :  { %s3832_s1 = scalar_lea.hbm %s4593_s4, 128 }
0x5156   :  { %p3833_p13 = scmp.ne.s32.totalorder %s4593_s4, %s3832_s1  ;;  %p3836_p0 = scmp.lt.u32.totalorder %s3832_s1, %s4593_s4 }
0x5158   :  { %p3838_p1 = pnand %p3836_p0, %p3833_p13 }
0x515a   :  { %3841 = shalt.err (!%p3838_p1)
}
0x515b   :  { %3003 = dma.vmem_to_hbm [thread:$0]  %s3001_s26, 128, %s4593_s4, [#allocation4]  }
0x515c   :  { %3844 = dma.done.wait [#allocation4], 128  }
0x515d   :  { %3845 = vsyncadd [#allocation4], 4294967168 }
0x515e   :  { %3007 = vsyncpa [#allocation3], 1 }
0x515f   :  { %3008 = vsyncpa [#allocation4], 1 }

</bundles_post_ra>
